<compile_context>
chip_gen: v6e
topology: v6e:2x2x1
jax: 0.10.0
libtpu: 0.0.40
codegen_flags: <defaults>
</compile_context>

<pallas_src>
import jax
import jax.numpy as jnp
from jax import lax
from jax.experimental import pallas as pl
from jax.experimental.pallas import tpu as pltpu


def basic_block_kernel(x_ref, w1_ref, b1_ref, w2_ref, b2_ref, out_ref, col_ref):
    """One batch element per grid step.

    x_ref   : (1, H, W, C)        input (compute dtype), also the identity
    w1_ref  : (3, 3*C, C)         conv1 weights, BN1 scale folded, (kh, kw*C+i, o)
    b1_ref  : (1, C)  f32         folded BN1 bias
    w2_ref  : (3, 3*C, C)         conv2 weights, BN2 scale folded
    b2_ref  : (1, C)  f32         folded BN2 bias
    out_ref : (1, H, W, C) f32
    col_ref : (H+2, W, 3*C)       VMEM scratch: width-im2col with row halo
    """
    _, H, W, C = x_ref.shape
    cdt = col_ref.dtype

    # --- zero halo regions (rows 0 / H+1, and the two always-zero width
    # --- columns). Written once per step; build_col never touches them.
    col_ref[0] = jnp.zeros((W, 3 * C), cdt)
    col_ref[H + 1] = jnp.zeros((W, 3 * C), cdt)
    zero_col = jnp.zeros((H, 1, C), cdt)
    col_ref[1:H + 1, 0:1, 0:C] = zero_col
    col_ref[1:H + 1, W - 1:W, 2 * C:3 * C] = zero_col

    def build_col(v):
        """col[1+h, w, kw*C:(kw+1)*C] = v[h, w + kw - 1]  (zero outside)."""
        # center tap (kw=1): aligned full-width store
        col_ref[1:H + 1, :, C:2 * C] = v
        # left tap (kw=0): value at w-1; column 0 stays zero
        col_ref[1:H + 1, 1:W, 0:C] = v[:, :W - 1, :]
        # right tap (kw=2): value at w+1; column W-1 stays zero
        col_ref[1:H + 1, 0:W - 1, 2 * C:3 * C] = v[:, 1:W, :]

    def conv3x3(w_ref):
        """3x3 conv from the col buffer: 3 matmuls with K = 3*C, f32 acc."""
        acc = jnp.zeros((H * W, w_ref.shape[-1]), jnp.float32)
        for kh in range(3):
            patch = col_ref[kh:kh + H].reshape(H * W, 3 * C)
            acc = acc + jnp.dot(patch, w_ref[kh],
                                preferred_element_type=jnp.float32)
        return acc

    xv = x_ref[0]                                        # (H, W, C)

    # conv1 + bn1 (scale folded into weights, bias here) + relu
    build_col(xv)
    h1 = jnp.maximum(conv3x3(w1_ref) + b1_ref[...], 0.0)      # (H*W, C) f32

    # conv2 + bn2
    build_col(h1.reshape(H, W, C).astype(cdt))
    h2 = conv3x3(w2_ref) + b2_ref[...]                         # (H*W, C) f32

    # residual add + relu
    res = h2 + xv.reshape(H * W, C).astype(jnp.float32)
    out_ref[0] = jnp.maximum(res, 0.0).reshape(H, W, C).astype(out_ref.dtype)


def basic_block_forward(x_nchw, params, eps=1e-5, compute_dtype=jnp.bfloat16):
    """x_nchw: (N, C, H, W) float32 (PyTorch layout). Returns same layout, f32."""
    w1, g1, be1, m1, v1, w2, g2, be2, m2, v2 = params

    N, C, H, W = x_nchw.shape
    cout, cin = w1.shape[0], w1.shape[1]
    assert cin == cout == C, "BasicBlock with downsample=None needs Cin == Cout"

    # Fold eval-mode BatchNorm:  bn(y) = y * s + (beta - mean * s)
    s1 = g1 / jnp.sqrt(v1 + eps)
    s2 = g2 / jnp.sqrt(v2 + eps)
    b1 = (be1 - m1 * s1).reshape(1, cout).astype(jnp.float32)
    b2 = (be2 - m2 * s2).reshape(1, cout).astype(jnp.float32)

    def pack_weights(w, s):
        # OIHW * s[o]  ->  (kh, kw, I, O)  ->  (kh, kw*I, O)   (matches col layout)
        w = (w * s[:, None, None, None]).astype(jnp.float32)
        w = jnp.transpose(w, (2, 3, 1, 0))
        return w.reshape(3, 3 * w.shape[2], w.shape[3]).astype(compute_dtype)

    w1k = pack_weights(w1, s1)
    w2k = pack_weights(w2, s2)

    # NCHW -> NHWC (channels on lanes). No host-side spatial padding.
    x = jnp.transpose(x_nchw, (0, 2, 3, 1)).astype(compute_dtype)

    out_nhwc = pl.pallas_call(
        basic_block_kernel,
        out_shape=jax.ShapeDtypeStruct((N, H, W, cout), jnp.float32),
        grid=(N,),
        in_specs=[
            pl.BlockSpec((1, H, W, C), lambda n: (n, 0, 0, 0)),
            pl.BlockSpec((3, 3 * C, cout), lambda n: (0, 0, 0)),
            pl.BlockSpec((1, cout), lambda n: (0, 0)),
            pl.BlockSpec((3, 3 * cout, cout), lambda n: (0, 0, 0)),
            pl.BlockSpec((1, cout), lambda n: (0, 0)),
        ],
        out_specs=pl.BlockSpec((1, H, W, cout), lambda n: (n, 0, 0, 0)),
        scratch_shapes=[pltpu.VMEM((H + 2, W, 3 * C), compute_dtype)],
        compiler_params=pltpu.CompilerParams(
            dimension_semantics=("parallel",)),
    )(x, w1k, b1, w2k, b2)

    return jnp.transpose(out_nhwc, (0, 3, 1, 2))  # back to NCHW


def reference_forward(x_nchw, params, eps=1e-5):
    """Pure-JAX reference (lax convs), NCHW throughout, eval-mode BN, f32."""
    w1, g1, be1, m1, v1, w2, g2, be2, m2, v2 = params

    def conv(x, w):
        return lax.conv_general_dilated(
            x, w, window_strides=(1, 1), padding=((1, 1), (1, 1)),
            dimension_numbers=("NCHW", "OIHW", "NCHW"),
            precision=lax.Precision.HIGHEST)

    def bn(x, g, b, m, v):
        g = g[None, :, None, None]
        b = b[None, :, None, None]
        m = m[None, :, None, None]
        v = v[None, :, None, None]
        return (x - m) / jnp.sqrt(v + eps) * g + b

    out = jnp.maximum(bn(conv(x_nchw, w1), g1, be1, m1, v1), 0.0)
    out = bn(conv(out, w2), g2, be2, m2, v2)
    out = out + x_nchw
    return jnp.maximum(out, 0.0)


def make_params(key, inplanes, planes):
    ks = jax.random.split(key, 8)
    w1 = jax.random.normal(ks[0], (planes, inplanes, 3, 3), jnp.float32) * 0.1
    g1 = jax.random.uniform(ks[1], (planes,), jnp.float32, 0.5, 1.5)
    be1 = jax.random.normal(ks[2], (planes,), jnp.float32) * 0.1
    m1 = jax.random.normal(ks[3], (planes,), jnp.float32) * 0.1
    v1 = jax.random.uniform(ks[4], (planes,), jnp.float32, 0.5, 1.5)
    w2 = jax.random.normal(ks[5], (planes, planes, 3, 3), jnp.float32) * 0.1
    g2 = jax.random.uniform(ks[6], (planes,), jnp.float32, 0.5, 1.5)
    be2 = jax.random.normal(ks[7], (planes,), jnp.float32) * 0.1
    m2 = jnp.zeros((planes,), jnp.float32)
    v2 = jnp.ones((planes,), jnp.float32)
    return (w1, g1, be1, m1, v1, w2, g2, be2, m2, v2)


if __name__ == "__main__":
    # Lane-dense channel count (ResNet layer2-like block), no downsample.
    N, C, H, W = 2, 128, 16, 16
    key = jax.random.PRNGKey(0)
    kx, kp = jax.random.split(key)
    x = jax.random.normal(kx, (N, C, H, W), jnp.float32)
    params = make_params(kp, C, C)

    ref = jax.block_until_ready(reference_forward(x, params))

    # f32 operand path: tight check of the fused algorithm.
    out_f32 = jax.block_until_ready(
        basic_block_forward(x, params, compute_dtype=jnp.float32))
    assert out_f32.shape == (N, C, H, W)
    assert jnp.allclose(out_f32, ref, atol=2e-3, rtol=2e-3), (
        float(jnp.max(jnp.abs(out_f32 - ref))))

    # bf16 operand path (MXU-friendly, f32 accumulation): relative-L2 check.
    out_bf16 = jax.block_until_ready(
        basic_block_forward(x, params, compute_dtype=jnp.bfloat16))
    rel = float(jnp.linalg.norm(out_bf16 - ref) /
                (jnp.linalg.norm(ref) + 1e-9))
    assert rel < 2e-2, rel

    print("KERNEL_OK")
</pallas_src>

<mosaic_0001>
module attributes {stable_mosaic.version = 11 : i64} {
  func.func @basic_block_kernel(%arg0: i32, %arg1: memref<1x16x16x128xf32, #tpu.memory_space<vmem>>, %arg2: memref<3x384x128xf32, #tpu.memory_space<vmem>>, %arg3: memref<1x128xf32, #tpu.memory_space<vmem>>, %arg4: memref<3x384x128xf32, #tpu.memory_space<vmem>>, %arg5: memref<1x128xf32, #tpu.memory_space<vmem>>, %arg6: memref<1x16x16x128xf32, #tpu.memory_space<vmem>>, %arg7: memref<18x16x384xf32, #tpu.memory_space<vmem>>) attributes {dimension_semantics = [#tpu.dimension_semantics<parallel>], iteration_bounds = array<i64: 2>, scalar_prefetch = 0 : i64, scratch_operands = 1 : i64, tpu.core_type = #tpu.core_type<tc>, window_params = [{transform_indices = @transform_0, window_bounds = array<i64: 1, 16, 16, 128>}, {pipeline_mode = #tpu.pipeline_mode<synchronous>, transform_indices = @transform_1, window_bounds = array<i64: 3, 384, 128>}, {pipeline_mode = #tpu.pipeline_mode<synchronous>, transform_indices = @transform_2, window_bounds = array<i64: 1, 128>}, {pipeline_mode = #tpu.pipeline_mode<synchronous>, transform_indices = @transform_3, window_bounds = array<i64: 3, 384, 128>}, {pipeline_mode = #tpu.pipeline_mode<synchronous>, transform_indices = @transform_4, window_bounds = array<i64: 1, 128>}, {transform_indices = @transform_5, window_bounds = array<i64: 1, 16, 16, 128>}]} {
    %cst = arith.constant 0.000000e+00 : f32
    %0 = vector.broadcast %cst : f32 to vector<16x384xf32>
    %c0 = arith.constant 0 : index
    %c0_0 = arith.constant 0 : index
    %c0_1 = arith.constant 0 : index
    %1 = vector.load %arg7[%c0, %c0_0, %c0_1] : memref<18x16x384xf32, #tpu.memory_space<vmem>>, vector<1x16x384xf32>
    %2 = vector.shape_cast %1 : vector<1x16x384xf32> to vector<16x384xf32>
    %3 = vector.shape_cast %0 : vector<16x384xf32> to vector<1x16x384xf32>
    tpu.vector_store %arg7[%c0, %c0_0, %c0_1], %3 {strides = array<i32>} : memref<18x16x384xf32, #tpu.memory_space<vmem>>, vector<1x16x384xf32>,
    %cst_2 = arith.constant 0.000000e+00 : f32
    %4 = vector.broadcast %cst_2 : f32 to vector<16x384xf32>
    %c17 = arith.constant 17 : index
    %c0_3 = arith.constant 0 : index
    %c0_4 = arith.constant 0 : index
    %5 = vector.load %arg7[%c17, %c0_3, %c0_4] : memref<18x16x384xf32, #tpu.memory_space<vmem>>, vector<1x16x384xf32>
    %6 = vector.shape_cast %5 : vector<1x16x384xf32> to vector<16x384xf32>
    %7 = vector.shape_cast %4 : vector<16x384xf32> to vector<1x16x384xf32>
    tpu.vector_store %arg7[%c17, %c0_3, %c0_4], %7 {strides = array<i32>} : memref<18x16x384xf32, #tpu.memory_space<vmem>>, vector<1x16x384xf32>,
    %cst_5 = arith.constant 0.000000e+00 : f32
    %8 = vector.broadcast %cst_5 : f32 to vector<16x1x128xf32>
    %c1 = arith.constant 1 : index
    %c0_6 = arith.constant 0 : index
    %c0_7 = arith.constant 0 : index
    %9 = vector.load %arg7[%c1, %c0_6, %c0_7] : memref<18x16x384xf32, #tpu.memory_space<vmem>>, vector<16x1x128xf32>
    tpu.vector_store %arg7[%c1, %c0_6, %c0_7], %8 {strides = array<i32>} : memref<18x16x384xf32, #tpu.memory_space<vmem>>, vector<16x1x128xf32>,
    %c1_8 = arith.constant 1 : index
    %c15 = arith.constant 15 : index
    %c256 = arith.constant 256 : index
    %10 = vector.load %arg7[%c1_8, %c15, %c256] : memref<18x16x384xf32, #tpu.memory_space<vmem>>, vector<16x1x128xf32>
    tpu.vector_store %arg7[%c1_8, %c15, %c256], %8 {strides = array<i32>} : memref<18x16x384xf32, #tpu.memory_space<vmem>>, vector<16x1x128xf32>,
    %c0_9 = arith.constant 0 : index
    %c0_10 = arith.constant 0 : index
    %c0_11 = arith.constant 0 : index
    %c0_12 = arith.constant 0 : index
    %11 = vector.load %arg1[%c0_9, %c0_10, %c0_11, %c0_12] : memref<1x16x16x128xf32, #tpu.memory_space<vmem>>, vector<1x16x16x128xf32>
    %12 = vector.shape_cast %11 : vector<1x16x16x128xf32> to vector<16x16x128xf32>
    %c1_13 = arith.constant 1 : index
    %c0_14 = arith.constant 0 : index
    %c128 = arith.constant 128 : index
    %13 = vector.load %arg7[%c1_13, %c0_14, %c128] : memref<18x16x384xf32, #tpu.memory_space<vmem>>, vector<16x16x128xf32>
    tpu.vector_store %arg7[%c1_13, %c0_14, %c128], %12 {strides = array<i32>} : memref<18x16x384xf32, #tpu.memory_space<vmem>>, vector<16x16x128xf32>,
    %14 = vector.extract_strided_slice %12 {offsets = [0, 0, 0], sizes = [16, 15, 128], strides = [1, 1, 1]} : vector<16x16x128xf32> to vector<16x15x128xf32>
    %c1_15 = arith.constant 1 : index
    %c1_16 = arith.constant 1 : index
    %c0_17 = arith.constant 0 : index
    %15 = vector.load %arg7[%c1_15, %c1_16, %c0_17] : memref<18x16x384xf32, #tpu.memory_space<vmem>>, vector<16x15x128xf32>
    tpu.vector_store %arg7[%c1_15, %c1_16, %c0_17], %14 {strides = array<i32>} : memref<18x16x384xf32, #tpu.memory_space<vmem>>, vector<16x15x128xf32>,
    %16 = vector.extract_strided_slice %12 {offsets = [0, 1, 0], sizes = [16, 15, 128], strides = [1, 1, 1]} : vector<16x16x128xf32> to vector<16x15x128xf32>
    %c1_18 = arith.constant 1 : index
    %c0_19 = arith.constant 0 : index
    %c256_20 = arith.constant 256 : index
    %17 = vector.load %arg7[%c1_18, %c0_19, %c256_20] : memref<18x16x384xf32, #tpu.memory_space<vmem>>, vector<16x15x128xf32>
    tpu.vector_store %arg7[%c1_18, %c0_19, %c256_20], %16 {strides = array<i32>} : memref<18x16x384xf32, #tpu.memory_space<vmem>>, vector<16x15x128xf32>,
    %cst_21 = arith.constant 0.000000e+00 : f32
    %18 = vector.broadcast %cst_21 : f32 to vector<256x128xf32>
    %c0_22 = arith.constant 0 : index
    %c0_23 = arith.constant 0 : index
    %c0_24 = arith.constant 0 : index
    %19 = vector.load %arg7[%c0_22, %c0_23, %c0_24] : memref<18x16x384xf32, #tpu.memory_space<vmem>>, vector<16x16x384xf32>
    %20 = vector.shape_cast %19 : vector<16x16x384xf32> to vector<256x384xf32>
    %c0_25 = arith.constant 0 : index
    %c0_26 = arith.constant 0 : index
    %c0_27 = arith.constant 0 : index
    %21 = vector.load %arg2[%c0_25, %c0_26, %c0_27] : memref<3x384x128xf32, #tpu.memory_space<vmem>>, vector<1x384x128xf32>
    %22 = vector.shape_cast %21 : vector<1x384x128xf32> to vector<384x128xf32>
    %cst_28 = arith.constant dense<0.000000e+00> : vector<256x128xf32>
    %23 = tpu.matmul %20, %22, %cst_28 {dimension_numbers = #tpu.dot_dimension_numbers<[1], [0], [0], [1], [0, 0, 1, 1], [], []>} : vector<256x384xf32>, vector<384x128xf32>, vector<256x128xf32> -> vector<256x128xf32>
    %24 = arith.addf %18, %23 : vector<256x128xf32>
    %c1_29 = arith.constant 1 : index
    %c0_30 = arith.constant 0 : index
    %c0_31 = arith.constant 0 : index
    %25 = vector.load %arg7[%c1_29, %c0_30, %c0_31] : memref<18x16x384xf32, #tpu.memory_space<vmem>>, vector<16x16x384xf32>
    %26 = vector.shape_cast %25 : vector<16x16x384xf32> to vector<256x384xf32>
    %c1_32 = arith.constant 1 : index
    %c0_33 = arith.constant 0 : index
    %c0_34 = arith.constant 0 : index
    %27 = vector.load %arg2[%c1_32, %c0_33, %c0_34] : memref<3x384x128xf32, #tpu.memory_space<vmem>>, vector<1x384x128xf32>
    %28 = vector.shape_cast %27 : vector<1x384x128xf32> to vector<384x128xf32>
    %cst_35 = arith.constant dense<0.000000e+00> : vector<256x128xf32>
    %29 = tpu.matmul %26, %28, %cst_35 {dimension_numbers = #tpu.dot_dimension_numbers<[1], [0], [0], [1], [0, 0, 1, 1], [], []>} : vector<256x384xf32>, vector<384x128xf32>, vector<256x128xf32> -> vector<256x128xf32>
    %30 = arith.addf %24, %29 : vector<256x128xf32>
    %c2 = arith.constant 2 : index
    %c0_36 = arith.constant 0 : index
    %c0_37 = arith.constant 0 : index
    %31 = vector.load %arg7[%c2, %c0_36, %c0_37] : memref<18x16x384xf32, #tpu.memory_space<vmem>>, vector<16x16x384xf32>
    %32 = vector.shape_cast %31 : vector<16x16x384xf32> to vector<256x384xf32>
    %c2_38 = arith.constant 2 : index
    %c0_39 = arith.constant 0 : index
    %c0_40 = arith.constant 0 : index
    %33 = vector.load %arg2[%c2_38, %c0_39, %c0_40] : memref<3x384x128xf32, #tpu.memory_space<vmem>>, vector<1x384x128xf32>
    %34 = vector.shape_cast %33 : vector<1x384x128xf32> to vector<384x128xf32>
    %cst_41 = arith.constant dense<0.000000e+00> : vector<256x128xf32>
    %35 = tpu.matmul %32, %34, %cst_41 {dimension_numbers = #tpu.dot_dimension_numbers<[1], [0], [0], [1], [0, 0, 1, 1], [], []>} : vector<256x384xf32>, vector<384x128xf32>, vector<256x128xf32> -> vector<256x128xf32>
    %36 = arith.addf %30, %35 : vector<256x128xf32>
    %c0_42 = arith.constant 0 : index
    %c0_43 = arith.constant 0 : index
    %37 = vector.load %arg3[%c0_42, %c0_43] : memref<1x128xf32, #tpu.memory_space<vmem>>, vector<1x128xf32>
    %38 = vector.broadcast %37 : vector<1x128xf32> to vector<256x128xf32>
    %39 = arith.addf %36, %38 : vector<256x128xf32>
    %cst_44 = arith.constant 0.000000e+00 : f32
    %40 = vector.broadcast %cst_44 : f32 to vector<256x128xf32>
    %41 = arith.maximumf %39, %40 : vector<256x128xf32>
    %42 = vector.shape_cast %41 : vector<256x128xf32> to vector<16x16x128xf32>
    %c1_45 = arith.constant 1 : index
    %c0_46 = arith.constant 0 : index
    %c128_47 = arith.constant 128 : index
    %43 = vector.load %arg7[%c1_45, %c0_46, %c128_47] : memref<18x16x384xf32, #tpu.memory_space<vmem>>, vector<16x16x128xf32>
    tpu.vector_store %arg7[%c1_45, %c0_46, %c128_47], %42 {strides = array<i32>} : memref<18x16x384xf32, #tpu.memory_space<vmem>>, vector<16x16x128xf32>,
    %44 = vector.extract_strided_slice %42 {offsets = [0, 0, 0], sizes = [16, 15, 128], strides = [1, 1, 1]} : vector<16x16x128xf32> to vector<16x15x128xf32>
    %c1_48 = arith.constant 1 : index
    %c1_49 = arith.constant 1 : index
    %c0_50 = arith.constant 0 : index
    %45 = vector.load %arg7[%c1_48, %c1_49, %c0_50] : memref<18x16x384xf32, #tpu.memory_space<vmem>>, vector<16x15x128xf32>
    tpu.vector_store %arg7[%c1_48, %c1_49, %c0_50], %44 {strides = array<i32>} : memref<18x16x384xf32, #tpu.memory_space<vmem>>, vector<16x15x128xf32>,
    %46 = vector.extract_strided_slice %42 {offsets = [0, 1, 0], sizes = [16, 15, 128], strides = [1, 1, 1]} : vector<16x16x128xf32> to vector<16x15x128xf32>
    %c1_51 = arith.constant 1 : index
    %c0_52 = arith.constant 0 : index
    %c256_53 = arith.constant 256 : index
    %47 = vector.load %arg7[%c1_51, %c0_52, %c256_53] : memref<18x16x384xf32, #tpu.memory_space<vmem>>, vector<16x15x128xf32>
    tpu.vector_store %arg7[%c1_51, %c0_52, %c256_53], %46 {strides = array<i32>} : memref<18x16x384xf32, #tpu.memory_space<vmem>>, vector<16x15x128xf32>,
    %cst_54 = arith.constant 0.000000e+00 : f32
    %48 = vector.broadcast %cst_54 : f32 to vector<256x128xf32>
    %c0_55 = arith.constant 0 : index
    %c0_56 = arith.constant 0 : index
    %c0_57 = arith.constant 0 : index
    %49 = vector.load %arg7[%c0_55, %c0_56, %c0_57] : memref<18x16x384xf32, #tpu.memory_space<vmem>>, vector<16x16x384xf32>
    %50 = vector.shape_cast %49 : vector<16x16x384xf32> to vector<256x384xf32>
    %c0_58 = arith.constant 0 : index
    %c0_59 = arith.constant 0 : index
    %c0_60 = arith.constant 0 : index
    %51 = vector.load %arg4[%c0_58, %c0_59, %c0_60] : memref<3x384x128xf32, #tpu.memory_space<vmem>>, vector<1x384x128xf32>
    %52 = vector.shape_cast %51 : vector<1x384x128xf32> to vector<384x128xf32>
    %cst_61 = arith.constant dense<0.000000e+00> : vector<256x128xf32>
    %53 = tpu.matmul %50, %52, %cst_61 {dimension_numbers = #tpu.dot_dimension_numbers<[1], [0], [0], [1], [0, 0, 1, 1], [], []>} : vector<256x384xf32>, vector<384x128xf32>, vector<256x128xf32> -> vector<256x128xf32>
    %54 = arith.addf %48, %53 : vector<256x128xf32>
    %c1_62 = arith.constant 1 : index
    %c0_63 = arith.constant 0 : index
    %c0_64 = arith.constant 0 : index
    %55 = vector.load %arg7[%c1_62, %c0_63, %c0_64] : memref<18x16x384xf32, #tpu.memory_space<vmem>>, vector<16x16x384xf32>
    %56 = vector.shape_cast %55 : vector<16x16x384xf32> to vector<256x384xf32>
    %c1_65 = arith.constant 1 : index
    %c0_66 = arith.constant 0 : index
    %c0_67 = arith.constant 0 : index
    %57 = vector.load %arg4[%c1_65, %c0_66, %c0_67] : memref<3x384x128xf32, #tpu.memory_space<vmem>>, vector<1x384x128xf32>
    %58 = vector.shape_cast %57 : vector<1x384x128xf32> to vector<384x128xf32>
    %cst_68 = arith.constant dense<0.000000e+00> : vector<256x128xf32>
    %59 = tpu.matmul %56, %58, %cst_68 {dimension_numbers = #tpu.dot_dimension_numbers<[1], [0], [0], [1], [0, 0, 1, 1], [], []>} : vector<256x384xf32>, vector<384x128xf32>, vector<256x128xf32> -> vector<256x128xf32>
    %60 = arith.addf %54, %59 : vector<256x128xf32>
    %c2_69 = arith.constant 2 : index
    %c0_70 = arith.constant 0 : index
    %c0_71 = arith.constant 0 : index
    %61 = vector.load %arg7[%c2_69, %c0_70, %c0_71] : memref<18x16x384xf32, #tpu.memory_space<vmem>>, vector<16x16x384xf32>
    %62 = vector.shape_cast %61 : vector<16x16x384xf32> to vector<256x384xf32>
    %c2_72 = arith.constant 2 : index
    %c0_73 = arith.constant 0 : index
    %c0_74 = arith.constant 0 : index
    %63 = vector.load %arg4[%c2_72, %c0_73, %c0_74] : memref<3x384x128xf32, #tpu.memory_space<vmem>>, vector<1x384x128xf32>
    %64 = vector.shape_cast %63 : vector<1x384x128xf32> to vector<384x128xf32>
    %cst_75 = arith.constant dense<0.000000e+00> : vector<256x128xf32>
    %65 = tpu.matmul %62, %64, %cst_75 {dimension_numbers = #tpu.dot_dimension_numbers<[1], [0], [0], [1], [0, 0, 1, 1], [], []>} : vector<256x384xf32>, vector<384x128xf32>, vector<256x128xf32> -> vector<256x128xf32>
    %66 = arith.addf %60, %65 : vector<256x128xf32>
    %c0_76 = arith.constant 0 : index
    %c0_77 = arith.constant 0 : index
    %67 = vector.load %arg5[%c0_76, %c0_77] : memref<1x128xf32, #tpu.memory_space<vmem>>, vector<1x128xf32>
    %68 = vector.broadcast %67 : vector<1x128xf32> to vector<256x128xf32>
    %69 = arith.addf %66, %68 : vector<256x128xf32>
    %70 = vector.shape_cast %12 : vector<16x16x128xf32> to vector<256x128xf32>
    %71 = arith.addf %69, %70 : vector<256x128xf32>
    %cst_78 = arith.constant 0.000000e+00 : f32
    %72 = vector.broadcast %cst_78 : f32 to vector<256x128xf32>
    %73 = arith.maximumf %71, %72 : vector<256x128xf32>
    %74 = vector.shape_cast %73 : vector<256x128xf32> to vector<16x16x128xf32>
    %c0_79 = arith.constant 0 : index
    %c0_80 = arith.constant 0 : index
    %c0_81 = arith.constant 0 : index
    %c0_82 = arith.constant 0 : index
    %75 = vector.load %arg6[%c0_79, %c0_80, %c0_81, %c0_82] : memref<1x16x16x128xf32, #tpu.memory_space<vmem>>, vector<1x16x16x128xf32>
    %76 = vector.shape_cast %75 : vector<1x16x16x128xf32> to vector<16x16x128xf32>
    %77 = vector.shape_cast %74 : vector<16x16x128xf32> to vector<1x16x16x128xf32>
    tpu.vector_store %arg6[%c0_79, %c0_80, %c0_81, %c0_82], %77 {strides = array<i32>} : memref<1x16x16x128xf32, #tpu.memory_space<vmem>>, vector<1x16x16x128xf32>,
    return
  }
  func.func @transform_0(%arg0: i32) -> (i32, i32, i32, i32) {
    %c0_i32 = arith.constant 0 : i32
    %c0_i32_0 = arith.constant 0 : i32
    %c0_i32_1 = arith.constant 0 : i32
    %c0_i32_2 = arith.constant 0 : i32
    return %arg0, %c0_i32, %c0_i32_0, %c0_i32_1 : i32, i32, i32, i32
  }
  func.func @transform_1(%arg0: i32) -> (i32, i32, i32) {
    %c0_i32 = arith.constant 0 : i32
    %c0_i32_0 = arith.constant 0 : i32
    %c0_i32_1 = arith.constant 0 : i32
    %c0_i32_2 = arith.constant 0 : i32
    return %c0_i32, %c0_i32_0, %c0_i32_1 : i32, i32, i32
  }
  func.func @transform_2(%arg0: i32) -> (i32, i32) {
    %c0_i32 = arith.constant 0 : i32
    %c0_i32_0 = arith.constant 0 : i32
    %c0_i32_1 = arith.constant 0 : i32
    return %c0_i32, %c0_i32_0 : i32, i32
  }
  func.func @transform_3(%arg0: i32) -> (i32, i32, i32) {
    %c0_i32 = arith.constant 0 : i32
    %c0_i32_0 = arith.constant 0 : i32
    %c0_i32_1 = arith.constant 0 : i32
    %c0_i32_2 = arith.constant 0 : i32
    return %c0_i32, %c0_i32_0, %c0_i32_1 : i32, i32, i32
  }
  func.func @transform_4(%arg0: i32) -> (i32, i32) {
    %c0_i32 = arith.constant 0 : i32
    %c0_i32_0 = arith.constant 0 : i32
    %c0_i32_1 = arith.constant 0 : i32
    return %c0_i32, %c0_i32_0 : i32, i32
  }
  func.func @transform_5(%arg0: i32) -> (i32, i32, i32, i32) {
    %c0_i32 = arith.constant 0 : i32
    %c0_i32_0 = arith.constant 0 : i32
    %c0_i32_1 = arith.constant 0 : i32
    %c0_i32_2 = arith.constant 0 : i32
    return %arg0, %c0_i32, %c0_i32_0, %c0_i32_1 : i32, i32, i32, i32
  }
}

</mosaic_0001>

<bundles_post_ra>
// kernel: tpu_custom_call.1
= control target key start
LH: loop header
LB: loop body
LE: loop exit
PB: predicated region body
PF: predicated region fallthrough
CT: control target
= control target key end

     0   :  { %10 = vsyncpa [#allocation4], 0  ;;  %s8499_s0 = inlined_call_operand.hbm [shape: f32[2,16,16,128], index: 0, kind: input, shape index: {}]   ;;  %s8500_s1 = inlined_call_operand.hbm [shape: f32[3,384,128], index: 1, kind: input, shape index: {}]   ;;  %s8501_s2 = inlined_call_operand.vmem [shape: f32[1,128], index: 2, kind: input, shape index: {}]   ;;  %s8502_s3 = inlined_call_operand.hbm [shape: f32[3,384,128], index: 3, kind: input, shape index: {}]   ;;  %s8503_s4 = inlined_call_operand.vmem [shape: f32[1,128], index: 4, kind: input, shape index: {}]   ;;  %s8504_s5 = inlined_call_operand.hbm [shape: f32[2,16,16,128], index: 5, kind: output, shape index: {}]  }
   0x1   :  { %12 = vsyncpa [#allocation4 + $0x1], 0 }
   0x2   :  { %13 = vsyncpa [#allocation7], 0 }
   0x3   :  { %14 = vsyncpa [#allocation5], 0 }
   0x4   :  { %16 = vsyncpa [#allocation5 + $0x1], 0  ;;  %s5965_s18 = smov 0   ;;  %s5967_s19 = smov 0  }
   0x5   :  { %s5969_s20 = smov 0   ;;  %s5971_s21 = smov 0  }
   0x6 LB: > { %s5986_s22 = sadd.s32 4294967295, %s5924_s21   ;;  %s4873_s23 = sadd.s32 4294967294, %s5924_s21   ;;  %s5924_s21 = sphi %s5971_s21, %s8689_s21   ;;  %s5920_s20 = sphi %s5969_s20, %s8688_s20   ;;  %s5916_s19 = sphi %s5967_s19, %s8687_s19   ;;  %s5912_s18 = sphi %s5965_s18, %s8686_s18  }
   0x7   : > { %p42_p0 = scmp.ne.s32.totalorder %s5916_s19, %s5912_s18  ;;  %p8505_p1 = scmp.eq.s32.totalorder %s5986_s22, 0 }
   0x8   : > { %p150_p2 = scmp.eq.s32.totalorder %s5986_s22, 1  ;;  %p156_p3 = scmp.eq.s32.totalorder %s4873_s23, 1 }
   0x9   : > { %p5995_p4 = por %p8505_p1, %p42_p0  ;;  %p4874_p5 = scmp.ge.s32.totalorder %s5924_s21, 1 }
   0xa   : > { %p6000_p6 = por %p156_p3, %p42_p0  ;;  %p163_p7 = scmp.lt.s32.totalorder %s5924_s21, 3 }
   0xb   : > { %s8553_s24 = scalar_select %p5995_p4, 1, 0 }
   0xc   : > { %s8554_s25 = scalar_select %p6000_p6, 1, 0 }
   0xd   : > { %p6005_p8 = pnand %p4874_p5, %p163_p7  ;;  %s5926_s27 = smov [#allocation6]  }
   0xe   : > { %s175_s28 = sshll.u32 %s5926_s27, 4  ;;  %s5927_s30 = smov [#allocation8]   ;;  %s176_s28 = int_to_ptr.vmem [resolvable:$true] %s175_s28 }
   0xf   : > { %s8555_s26 = scalar_select %p6005_p8, 1, 0 }
  0x10   : > { %p5675_p9 = pneg %p6005_p8  ;;  %s191_s6 = sshll.u32 %s5927_s30, 4  ;;  %s192_s6 = int_to_ptr.vmem [resolvable:$true] %s191_s6 }
  0x11   : > { %s5787_s7 = scalar_lea.vmem %s176_s28, 18432  ;;  %p5795_p5 = scmp.lt.s32.totalorder %s176_s28, %s176_s28 }
  0x12   : > { %p6014_p11 = pnand %p5675_p9, %p8505_p1  ;;  %p5788_p13 = scmp.ne.s32.totalorder %s176_s28, %s5787_s7 }
  0x13   : > { %p5796_p7 = scmp.lt.s32.totalorder %s5787_s7, %s5787_s7 }
  0x14   : > { %p5778_p12 = pneg %p6014_p11 }
  0x15   : > { %p5797_p10 = por %p5796_p7, %p5795_p5 }
  0x16   : > { %p5790_p0 = pnand %p5788_p13, %p5778_p12 }
  0x18   : > { %p5791_p3 = pneg %p5790_p0 }
  0x1a   : > { %p5798_p9 = pnand %p5797_p10, %p5791_p3 }
  0x1c   : > { %5801 = shalt.err (!%p5798_p9)
}
  0x1d   : > { %s8506_s8 = smov 128   ;;  %s5929_s9 = smov 8  }
  0x1e   : > { %5678 = dma.hbm_to_vmem [thread:$0]  (!%p6014_p11), %s8500_s1, 18432, %s176_s28, [#allocation7], %s8506_s8, %s8506_s8, %s5929_s9  }
  0x1f   : > { %s5813_s12 = scalar_lea.vmem %s192_s6, 18432  ;;  %p5821_p10 = scmp.lt.s32.totalorder %s192_s6, %s192_s6 }
  0x20   : > { %p5814_p13 = scmp.ne.s32.totalorder %s192_s6, %s5813_s12  ;;  %p5822_p3 = scmp.lt.s32.totalorder %s5813_s12, %s5813_s12 }
  0x22   : > { %p5816_p0 = pnand %p5814_p13, %p5778_p12  ;;  %p5823_p7 = por %p5822_p3, %p5821_p10 }
  0x24   : > { %p5817_p5 = pneg %p5816_p0 }
  0x26   : > { %p5824_p9 = pnand %p5823_p7, %p5817_p5 }
  0x28   : > { %5827 = shalt.err (!%p5824_p9)
}
  0x29   : > { %5681 = dma.hbm_to_vmem [thread:$0]  (!%p6014_p11), %s8502_s3, 18432, %s192_s6, [#allocation7], %s8506_s8, %s8506_s8, %s5929_s9  }
  0x2a   : > { %s6043_s15 = sadd.s32 1, %s5924_s21   ;;  %s29_s16 = sadd.s32 1, %s5920_s20 }
  0x2b   : > { %s26_s17 = ssub.s32 %s5924_s21, %s6043_s15  ;;  %p36_p12 = scmp.ne.s32.totalorder %s5920_s20, %s5916_s19 }
  0x2c   : > { %p27_p13 = scmp.eq.s32.totalorder %s26_s17, 0  ;;  %p37_p0 = scmp.eq.s32.totalorder %s5924_s21, 0 }
  0x2d   : > { %p6053_p5 = por %p150_p2, %p36_p12  ;;  %p5692_p10 = scmp.lt.s32.totalorder %s5924_s21, 2 }
  0x2e   : > { %s6059_s27 = scalar_select %p27_p13, %s5920_s20, %s29_s16  }
  0x2f   : > { %s8557_s23 = scalar_select %p6053_p5, 1, 0 }
  0x30   : > { %p38_p3 = por %p37_p0, %p36_p12  ;;  %s208_s28 = sand.u32 1, %s5920_s20  }
  0x31   : > { %s4878_s29 = sshll.u32 %s208_s28, 8  ;;  %s4893_s30 = sshll.u32 %s5924_s21, 12 }
  0x32   : > { %s6066_s10 = scalar_lea.hbm %s8499_s0, %s4893_s30  ;;  %s212_s11 = scalar_lea.vmem [#allocation3], %s4878_s29 }
  0x33   : > { %s219_s12 = sshll.u32 %s212_s11, 4  ;;  %p6070_p2 = pnand %p5692_p10, %p38_p3  ;;  %s6068_s12 = int_to_ptr.vmem [resolvable:$true] %s219_s12 }
  0x34   : > { %s6074_s14 = scalar_lea.sflag [#allocation4], %s208_s28  ;;  %s5828_s16 = scalar_lea.hbm %s6066_s10, 4096 }
  0x35   : > { %p5829_p11 = scmp.ne.s32.totalorder %s6066_s10, %s5828_s16  ;;  %p5830_p7 = pneg %p6070_p2 }
  0x36   : > { %s5833_s29 = scalar_lea.hbm %s8499_s0, 8192  ;;  %p5834_p13 = scmp.lt.s32.totalorder %s6066_s10, %s8499_s0 }
  0x37   : > { %p5831_p9 = pnand %p5830_p7, %p5829_p11  ;;  %p5835_p0 = scmp.lt.s32.totalorder %s5833_s29, %s5828_s16 }
  0x39   : > { %p5832_p12 = pneg %p5831_p9  ;;  %p5836_p10 = por %p5835_p0, %p5834_p13 }
  0x3b   : > { %p5837_p3 = pnand %p5836_p10, %p5832_p12 }
  0x3d   : > { %5840 = shalt.err (!%p5837_p3)
}
  0x3e   : > { %s5841_s28 = scalar_lea.vmem %s6068_s12, 4096  ;;  %s5930_s11 = smov [#allocation3]  }
  0x3f   : > { %p5842_p1 = scmp.ne.s32.totalorder %s6068_s12, %s5841_s28  ;;  %s5846_s8 = sshll.u32 %s5930_s11, 4  ;;  %s5847_s8 = int_to_ptr.vmem [resolvable:$false] %s5846_s8 }
  0x40   : > { %s5848_s17 = scalar_lea.vmem %s5847_s8, 8192  ;;  %p5849_p9 = scmp.lt.s32.totalorder %s6068_s12, %s5847_s8 }
  0x41   : > { %p5844_p6 = pnand %p5842_p1, %p5830_p7  ;;  %p5850_p5 = scmp.lt.s32.totalorder %s5848_s17, %s5841_s28 }
  0x43   : > { %p5845_p11 = pneg %p5844_p6  ;;  %p5851_p4 = por %p5850_p5, %p5849_p9 }
  0x45   : > { %p5852_p8 = pnand %p5851_p4, %p5845_p11 }
  0x47   : > { %5855 = shalt.err (!%p5852_p8)
}
  0x48   : > { %s8559_s16 = smov 128   ;;  %p8560_p1 = scmp.ne.s32.totalorder %s8555_s26, 0 }
  0x49   : > { %5685 = dma.hbm_to_vmem [thread:$0]  (!%p6070_p2), %s6066_s10, 4096, %s6068_s12, %s6074_s14, %s8559_s16, %s8559_s16, %s5929_s9  }
  0x4a   : > { %231 = sbr.rel (%p8560_p1) target bundleno = 1130 (0x46a), region = 40 }
  0x4f   : > { %s6101_s30 = sand.u32 1, %s5916_s19   ;;  %p8561_p4 = scmp.ne.s32.totalorder %s8553_s24, 0 }
  0x50   : > { %s4882_s8 = sshll.u32 %s6101_s30, 8  ;;  %s234_s29 = scalar_lea.sflag [#allocation4], %s6101_s30 }
  0x51   : > { %s6107_s13 = scalar_lea.vmem [#allocation3], %s4882_s8 }
  0x52   : > { %5899 = dma.done.wait (%p8561_p4), %s234_s29, 4096  }
  0x53   : > { %5901 = vsyncadd (%p8561_p4), %s234_s29, 4294963200  ;;  %p8562_p6 = scmp.eq.s32.totalorder %s5986_s22, 0 }
  0x55   : > { %5903 = dma.done.wait (%p8562_p6), [#allocation7], 36864   ;;  %p8563_p8 = pmov %p8562_p6 }
  0x56   : > { %v8513_v0 = vmov 0.0   ;;  %v896_v1 = vld [vmem:[#allocation6 + $0x1f8] sm:$0xff]  ;;  %v895_v3 = vld [vmem:[#allocation6 + $0x1f0] sm:$0xff]  ;;  %v894_v5 = vld [vmem:[#allocation6 + $0x1e8] sm:$0xff]  ;;  %vm527_vm0 = vcmask 1046528   ;;  %vm414_vm1 = vcmask 1040384  }
  0x57   : > { %5905 = vsyncadd (%p8563_p8), [#allocation7], 4294930432  ;;  %929 = vmatprep.subr.mxu0 %v8513_v0  ;;  %272 = vst [vmem:[#allocation2] sm:$0xff] %v8513_v0  ;;  %v928_v2 = vld [vmem:[#allocation6 + $0x2f8] sm:$0xff]  ;;  %v927_v4 = vld [vmem:[#allocation6 + $0x2f0] sm:$0xff]  ;;  %s8325_s6 = scalar_lea.vmem [#allocation9], %s4882_s8 }
  0x58   : > { %286 = vst [vmem:[#allocation2 + $0x30] sm:$0x1] %v8513_v0  ;;  %287 = vst [vmem:[#allocation2 + $0x60] sm:$0x1] %v8513_v0  ;;  %930 = vmatpush1.msra.mxu0 %v896_v1  ;;  %5183 = vmatprep.subr.mxu1 %v928_v2  ;;  %v926_v6 = vld [vmem:[#allocation6 + $0x2e8] sm:$0xff]  ;;  %v893_v7 = vld [vmem:[#allocation6 + $0x1e0] sm:$0xff] }
  0x59   : > { %288 = vst [vmem:[#allocation2 + $0x90] sm:$0x1] %v8513_v0  ;;  %289 = vst [vmem:[#allocation2 + $0xc0] sm:$0x1] %v8513_v0  ;;  %931 = vmatprep.subr.mxu0 %v8513_v0  ;;  %5184 = vmatpush3.msra.mxu1 %v928_v2  ;;  %v925_v8 = vld [vmem:[#allocation6 + $0x2e0] sm:$0xff]  ;;  %v892_v9 = vld [vmem:[#allocation6 + $0x1d8] sm:$0xff] }
  0x5a   : > { %290 = vst [vmem:[#allocation2 + $0xf0] sm:$0x1] %v8513_v0  ;;  %291 = vst [vmem:[#allocation2 + $0x120] sm:$0x1] %v8513_v0  ;;  %932 = vmatpush1.msra.mxu0 %v895_v3  ;;  %5185 = vmatprep.subr.mxu1 %v927_v4  ;;  %v924_v10 = vld [vmem:[#allocation6 + $0x2d8] sm:$0xff]  ;;  %v891_v11 = vld [vmem:[#allocation6 + $0x1d0] sm:$0xff] }
  0x5b   : > { %292 = vst [vmem:[#allocation2 + $0x150] sm:$0x1] %v8513_v0  ;;  %293 = vst [vmem:[#allocation2 + $0x180] sm:$0x1] %v8513_v0  ;;  %933 = vmatprep.subr.mxu0 %v8513_v0  ;;  %5186 = vmatpush3.msra.mxu1 %v927_v4  ;;  %v923_v12 = vld [vmem:[#allocation6 + $0x2d0] sm:$0xff]  ;;  %v890_v13 = vld [vmem:[#allocation6 + $0x1c8] sm:$0xff] }
  0x5c   : > { %294 = vst [vmem:[#allocation2 + $0x1b0] sm:$0x1] %v8513_v0  ;;  %295 = vst [vmem:[#allocation2 + $0x1e0] sm:$0x1] %v8513_v0  ;;  %934 = vmatpush1.msra.mxu0 %v894_v5  ;;  %5187 = vmatprep.subr.mxu1 %v926_v6  ;;  %v922_v14 = vld [vmem:[#allocation6 + $0x2c8] sm:$0xff]  ;;  %v6157_v15 = vld [vmem:[%s6107_s13] sm:$0xff] }
  0x5d   : > { %296 = vst [vmem:[#allocation2 + $0x210] sm:$0x1] %v8513_v0  ;;  %297 = vst [vmem:[#allocation2 + $0x240] sm:$0x1] %v8513_v0  ;;  %935 = vmatprep.subr.mxu0 %v8513_v0  ;;  %5188 = vmatpush3.msra.mxu1 %v926_v6  ;;  %v889_v16 = vld [vmem:[#allocation6 + $0x1c0] sm:$0xff]  ;;  %v6160_v17 = vld [vmem:[%s6107_s13 + $0x8] sm:$0xff] }
  0x5e   : > { %298 = vst [vmem:[#allocation2 + $0x270] sm:$0x1] %v8513_v0  ;;  %299 = vst [vmem:[#allocation2 + $0x2a0] sm:$0x1] %v8513_v0  ;;  %936 = vmatpush1.msra.mxu0 %v893_v7  ;;  %5189 = vmatprep.subr.mxu1 %v925_v8  ;;  %v528_v18 = vrot.slane %v6157_v15, 1  ;;  %v8510_v19 = vrot.slane %v6157_v15, 7 }
  0x5f   : > { %300 = vst [vmem:[#allocation2 + $0x2d0] sm:$0x1] %v8513_v0  ;;  %301 = vst [vmem:[#allocation2 + $0x300] sm:$0x1] %v8513_v0  ;;  %937 = vmatprep.subr.mxu0 %v8513_v0  ;;  %5190 = vmatpush3.msra.mxu1 %v925_v8  ;;  %v921_v20 = vld [vmem:[#allocation6 + $0x2c0] sm:$0xff]  ;;  %v529_v21 = vrot.slane %v6160_v17, 1 }
  0x60   : > { %302 = vst [vmem:[#allocation2 + $0x5f] sm:$0x1] %v8513_v0  ;;  %303 = vst [vmem:[#allocation2 + $0x8f] sm:$0x1] %v8513_v0  ;;  %938 = vmatpush1.msra.mxu0 %v892_v9  ;;  %5191 = vmatprep.subr.mxu1 %v924_v10  ;;  %v6167_v22 = vld [vmem:[%s6107_s13 + $0x10] sm:$0xff]  ;;  %v6170_v23 = vld [vmem:[%s6107_s13 + $0x18] sm:$0xff] }
  0x61   : > { %304 = vst [vmem:[#allocation2 + $0xbf] sm:$0x1] %v8513_v0  ;;  %305 = vst [vmem:[#allocation2 + $0xef] sm:$0x1] %v8513_v0  ;;  %939 = vmatprep.subr.mxu0 %v8513_v0  ;;  %5192 = vmatpush3.msra.mxu1 %v924_v10  ;;  %v888_v24 = vld [vmem:[#allocation6 + $0x1b8] sm:$0xff]  ;;  %v531_v25 = vrot.slane %v6167_v22, 1  ;;  %v6181_v29 = vsel %vm527_vm0, %v528_v18, %v529_v21 }
  0x62   : > { %306 = vst [vmem:[#allocation2 + $0x11f] sm:$0x1] %v8513_v0  ;;  %307 = vst [vmem:[#allocation2 + $0x14f] sm:$0x1] %v8513_v0  ;;  %940 = vmatpush1.msra.mxu0 %v891_v11  ;;  %5193 = vmatprep.subr.mxu1 %v923_v12  ;;  %v532_v26 = vrot.slane %v6170_v23, 1  ;;  %v418_v27 = vrot.slane %v6167_v22, 7 }
  0x63   : > { %308 = vst [vmem:[#allocation2 + $0x17f] sm:$0x1] %v8513_v0  ;;  %309 = vst [vmem:[#allocation2 + $0x1af] sm:$0x1] %v8513_v0  ;;  %941 = vmatprep.subr.mxu0 %v8513_v0  ;;  %5194 = vmatpush3.msra.mxu1 %v923_v12  ;;  %v920_v28 = vld [vmem:[#allocation6 + $0x2b8] sm:$0xff]  ;;  %v6184_v30 = vld [vmem:[%s6107_s13 + $0x20] sm:$0xff] }
  0x64   : > { %310 = vst [vmem:[#allocation2 + $0x1df] sm:$0x1] %v8513_v0  ;;  %311 = vst [vmem:[#allocation2 + $0x20f] sm:$0x1] %v8513_v0  ;;  %942 = vmatpush1.msra.mxu0 %v890_v13  ;;  %5195 = vmatprep.subr.mxu1 %v922_v14  ;;  %v6187_v31 = vld [vmem:[%s6107_s13 + $0x28] sm:$0xff]  ;;  %v419_v32 = vrot.slane %v6170_v23, 7  ;;  %v6192_v34 = vsel %vm527_vm0, %v531_v25, %v532_v26 }
  0x65   : > { %312 = vst [vmem:[#allocation2 + $0x23f] sm:$0x1] %v8513_v0  ;;  %313 = vst [vmem:[#allocation2 + $0x26f] sm:$0x1] %v8513_v0  ;;  %943 = vmatprep.subr.mxu0 %v8513_v0  ;;  %5196 = vmatpush3.msra.mxu1 %v922_v14  ;;  %v887_v33 = vld [vmem:[#allocation6 + $0x1b0] sm:$0xff]  ;;  %v534_v35 = vrot.slane %v6184_v30, 1 }
  0x66   : > { %314 = vst [vmem:[#allocation2 + $0x29f] sm:$0x1] %v8513_v0  ;;  %315 = vst [vmem:[#allocation2 + $0x2cf] sm:$0x1] %v8513_v0  ;;  %944 = vmatpush1.msra.mxu0 %v889_v16  ;;  %5197 = vmatprep.subr.mxu1 %v921_v20  ;;  %v535_v36 = vrot.slane %v6187_v31, 1  ;;  %v421_v37 = vrot.slane %v6184_v30, 7  ;;  %v6208_v41 = vsel %vm414_vm1, %v418_v27, %v419_v32 }
  0x67   : > { %316 = vst [vmem:[#allocation2 + $0x2ff] sm:$0x1] %v8513_v0  ;;  %317 = vst [vmem:[#allocation2 + $0x32f] sm:$0x1] %v8513_v0  ;;  %945 = vmatprep.subr.mxu0 %v8513_v0  ;;  %5198 = vmatpush3.msra.mxu1 %v921_v20  ;;  %v919_v38 = vld [vmem:[#allocation6 + $0x2b0] sm:$0xff]  ;;  %v6205_v40 = vld [vmem:[%s6107_s13 + $0x38] sm:$0xff] }
  0x68   : > { %352 = vst [vmem:[#allocation2 + $0x68] sm:$0xff] %v6167_v22  ;;  %353 = vst [vmem:[#allocation2 + $0x80] sm:$0xff] %v6170_v23  ;;  %v6202_v39 = vld [vmem:[%s6107_s13 + $0x30] sm:$0xff]  ;;  %v422_v42 = vrot.slane %v6187_v31, 7  ;;  %946 = vmatpush1.msra.mxu0 %v888_v24  ;;  %5199 = vmatprep.subr.mxu1 %v920_v28  ;;  %v886_v43 = vld [vmem:[#allocation6 + $0x1a8] sm:$0xff]  ;;  %v6212_v44 = vsel %vm527_vm0, %v534_v35, %v535_v36  ;;  %v538_v46 = vrot.slane %v6205_v40, 1 }
  0x69   : > { %495 = vst [vmem:[#allocation2 + $0x30] sm:$0xfe] %v8510_v19  ;;  %609 = vst [vmem:[#allocation2 + $0x58] sm:$0x7f] %v529_v21  ;;  %v537_v45 = vrot.slane %v6202_v39, 1  ;;  %v424_v47 = vrot.slane %v6202_v39, 7  ;;  %947 = vmatprep.subr.mxu0 %v8513_v0  ;;  %5200 = vmatpush3.msra.mxu1 %v920_v28 }
  0x6a   : > { %608 = vst [vmem:[#allocation2 + $0x40] sm:$0xff] %v6181_v29  ;;  %611 = vst [vmem:[#allocation2 + $0x88] sm:$0x7f] %v532_v26  ;;  %v918_v48 = vld [vmem:[#allocation6 + $0x2a8] sm:$0xff]  ;;  %v6223_v49 = vld [vmem:[%s6107_s13 + $0x40] sm:$0xff]  ;;  %v6229_v51 = vsel %vm414_vm1, %v421_v37, %v422_v42  ;;  %v425_v52 = vrot.slane %v6205_v40, 7  ;;  %948 = vmatpush1.msra.mxu0 %v887_v33  ;;  %5201 = vmatprep.subr.mxu1 %v919_v38 }
  0x6b   : > { %354 = vst [vmem:[#allocation2 + $0x98] sm:$0xff] %v6184_v30  ;;  %355 = vst [vmem:[#allocation2 + $0xb0] sm:$0xff] %v6187_v31  ;;  %v6226_v50 = vld [vmem:[%s6107_s13 + $0x48] sm:$0xff]  ;;  %v885_v53 = vld [vmem:[#allocation6 + $0x1a0] sm:$0xff]  ;;  %v6233_v54 = vsel %vm527_vm0, %v537_v45, %v538_v46  ;;  %v540_v55 = vrot.slane %v6223_v49, 1  ;;  %v427_v57 = vrot.slane %v6223_v49, 7  ;;  %949 = vmatprep.subr.mxu0 %v8513_v0  ;;  %5202 = vmatpush3.msra.mxu1 %v919_v38 }
  0x6c   : > { %497 = vst [vmem:[#allocation2 + $0x60] sm:$0xfe] %v418_v27  ;;  %610 = vst [vmem:[#allocation2 + $0x70] sm:$0xff] %v6192_v34  ;;  %v541_v56 = vrot.slane %v6226_v50, 1  ;;  %v917_v58 = vld [vmem:[#allocation6 + $0x2a0] sm:$0xff]  ;;  %v6244_v59 = vld [vmem:[%s6107_s13 + $0x50] sm:$0xff]  ;;  %v6250_v61 = vsel %vm414_vm1, %v424_v47, %v425_v52  ;;  %950 = vmatpush1.msra.mxu0 %v886_v43  ;;  %5203 = vmatprep.subr.mxu1 %v918_v48 }
  0x6d   : > { %613 = vst [vmem:[#allocation2 + $0xb8] sm:$0x7f] %v535_v36  ;;  %356 = vst [vmem:[#allocation2 + $0xc8] sm:$0xff] %v6202_v39  ;;  %v6247_v60 = vld [vmem:[%s6107_s13 + $0x58] sm:$0xff]  ;;  %v428_v62 = vrot.slane %v6226_v50, 7  ;;  %v543_v1 = vrot.slane %v6244_v59, 1  ;;  %951 = vmatprep.subr.mxu0 %v8513_v0  ;;  %5204 = vmatpush3.msra.mxu1 %v918_v48 }
  0x6e   : > { %357 = vst [vmem:[#allocation2 + $0xe0] sm:$0xff] %v6205_v40  ;;  %498 = vst [vmem:[#allocation2 + $0x78] sm:$0xff] %v6208_v41  ;;  %v6254_v63 = vsel %vm527_vm0, %v540_v55, %v541_v56  ;;  %v544_v2 = vrot.slane %v6247_v60, 1  ;;  %v430_v3 = vrot.slane %v6244_v59, 7  ;;  %v884_v4 = vld [vmem:[#allocation6 + $0x198] sm:$0xff]  ;;  %v431_v7 = vrot.slane %v6247_v60, 7  ;;  %952 = vmatpush1.msra.mxu0 %v885_v53  ;;  %5205 = vmatprep.subr.mxu1 %v917_v58 }
  0x6f   : > { %499 = vst [vmem:[#allocation2 + $0x90] sm:$0xfe] %v421_v37  ;;  %612 = vst [vmem:[#allocation2 + $0xa0] sm:$0xff] %v6212_v44  ;;  %v916_v5 = vld [vmem:[#allocation6 + $0x298] sm:$0xff]  ;;  %v6265_v6 = vsel %vm414_vm1, %v427_v57, %v428_v62  ;;  %v6272_v9 = vld [vmem:[%s6107_s13 + $0x60] sm:$0xff]  ;;  %953 = vmatprep.subr.mxu0 %v8513_v0  ;;  %5206 = vmatpush3.msra.mxu1 %v917_v58  ;;  %s4894_s7 = sshll.u32 %s5986_s22, 12 }
  0x70   : > { %615 = vst [vmem:[#allocation2 + $0xe8] sm:$0x7f] %v538_v46  ;;  %358 = vst [vmem:[#allocation2 + $0xf8] sm:$0xff] %v6223_v49  ;;  %v6269_v8 = vsel %vm527_vm0, %v543_v1, %v544_v2  ;;  %v6275_v10 = vld [vmem:[%s6107_s13 + $0x68] sm:$0xff]  ;;  %v883_v11 = vld [vmem:[#allocation6 + $0x190] sm:$0xff]  ;;  %v546_v13 = vrot.slane %v6272_v9, 1  ;;  %v6285_v16 = vsel %vm414_vm1, %v430_v3, %v431_v7  ;;  %954 = vmatpush1.msra.mxu0 %v884_v4  ;;  %5207 = vmatprep.subr.mxu1 %v916_v5  ;;  %s8453_s16 = scalar_lea.hbm %s8504_s5, %s4894_s7 }
  0x71   : > { %359 = vst [vmem:[#allocation2 + $0x110] sm:$0xff] %v6226_v50  ;;  %500 = vst [vmem:[#allocation2 + $0xa8] sm:$0xff] %v6229_v51  ;;  %v915_v12 = vld [vmem:[#allocation6 + $0x290] sm:$0xff]  ;;  %v547_v14 = vrot.slane %v6275_v10, 1  ;;  %v433_v18 = vrot.slane %v6272_v9, 7  ;;  %v6292_v21 = vld [vmem:[%s6107_s13 + $0x78] sm:$0xff]  ;;  %955 = vmatprep.subr.mxu0 %v8513_v0  ;;  %5208 = vmatpush3.msra.mxu1 %v916_v5 }
  0x72   : > { %501 = vst [vmem:[#allocation2 + $0xc0] sm:$0xfe] %v424_v47  ;;  %614 = vst [vmem:[#allocation2 + $0xd0] sm:$0xff] %v6233_v54  ;;  %v6289_v20 = vld [vmem:[%s6107_s13 + $0x70] sm:$0xff]  ;;  %v434_v24 = vrot.slane %v6275_v10, 7  ;;  %v882_v25 = vld [vmem:[#allocation6 + $0x188] sm:$0xff]  ;;  %956 = vmatpush1.msra.mxu0 %v883_v11  ;;  %5209 = vmatprep.subr.mxu1 %v915_v12 }
  0x73   : > { %617 = vst [vmem:[#allocation2 + $0x118] sm:$0x7f] %v541_v56  ;;  %360 = vst [vmem:[#allocation2 + $0x128] sm:$0xff] %v6244_v59  ;;  %v914_v26 = vld [vmem:[#allocation6 + $0x288] sm:$0xff]  ;;  %v6298_v27 = vsel %vm527_vm0, %v546_v13, %v547_v14  ;;  %v549_v28 = vrot.slane %v6289_v20, 1  ;;  %v550_v32 = vrot.slane %v6292_v21, 1  ;;  %957 = vmatprep.subr.mxu0 %v8513_v0  ;;  %5210 = vmatpush3.msra.mxu1 %v915_v12 }
  0x74   : > { %361 = vst [vmem:[#allocation2 + $0x140] sm:$0xff] %v6247_v60  ;;  %502 = vst [vmem:[#allocation2 + $0xd8] sm:$0xff] %v6250_v61  ;;  %v436_v33 = vrot.slane %v6289_v20, 7  ;;  %v881_v35 = vld [vmem:[#allocation6 + $0x180] sm:$0xff]  ;;  %v6307_v36 = vsel %vm414_vm1, %v433_v18, %v434_v24  ;;  %v437_v37 = vrot.slane %v6292_v21, 7  ;;  %v6318_v45 = vld [vmem:[%s6107_s13 + $0x88] sm:$0xff]  ;;  %958 = vmatpush1.msra.mxu0 %v882_v25  ;;  %5211 = vmatprep.subr.mxu1 %v914_v26 }
  0x75   : > { %503 = vst [vmem:[#allocation2 + $0xf0] sm:$0xfe] %v427_v57  ;;  %616 = vst [vmem:[#allocation2 + $0x100] sm:$0xff] %v6254_v63  ;;  %v913_v38 = vld [vmem:[#allocation6 + $0x280] sm:$0xff]  ;;  %v6312_v42 = vsel %vm527_vm0, %v549_v28, %v550_v32  ;;  %v553_v47 = vrot.slane %v6318_v45, 1  ;;  %959 = vmatprep.subr.mxu0 %v8513_v0  ;;  %5212 = vmatpush3.msra.mxu1 %v914_v26  ;;  %v912_v53 = vld [vmem:[#allocation6 + $0x278] sm:$0xff] }
  0x76   : > { %619 = vst [vmem:[#allocation2 + $0x148] sm:$0x7f] %v544_v2  ;;  %504 = vst [vmem:[#allocation2 + $0x108] sm:$0xff] %v6265_v6  ;;  %v6315_v43 = vld [vmem:[%s6107_s13 + $0x80] sm:$0xff]  ;;  %v6327_v48 = vsel %vm414_vm1, %v436_v33, %v437_v37  ;;  %v6332_v55 = vld [vmem:[%s6107_s13 + $0x90] sm:$0xff]  ;;  %v440_v57 = vrot.slane %v6318_v45, 7  ;;  %960 = vmatpush1.msra.mxu0 %v881_v35  ;;  %5213 = vmatprep.subr.mxu1 %v913_v38 }
  0x77   : > { %505 = vst [vmem:[#allocation2 + $0x120] sm:$0xfe] %v430_v3  ;;  %618 = vst [vmem:[#allocation2 + $0x130] sm:$0xff] %v6269_v8  ;;  %v552_v46 = vrot.slane %v6315_v43, 1  ;;  %v439_v52 = vrot.slane %v6315_v43, 7  ;;  %v6335_v56 = vld [vmem:[%s6107_s13 + $0x98] sm:$0xff]  ;;  %961 = vmatprep.subr.mxu0 %v8513_v0  ;;  %5214 = vmatpush3.msra.mxu1 %v913_v38 }
  0x78   : > { %362 = vst [vmem:[#allocation2 + $0x158] sm:$0xff] %v6272_v9  ;;  %363 = vst [vmem:[#allocation2 + $0x170] sm:$0xff] %v6275_v10  ;;  %v789_v58 = vld [vmem:[#allocation2 + $0x58] sm:$0xff]  ;;  %v555_v1 = vrot.slane %v6332_v55, 1  ;;  %v556_v2 = vrot.slane %v6335_v56, 1  ;;  %v442_v3 = vrot.slane %v6332_v55, 7  ;;  %5215 = vmatprep.mubr.f32.mxu1 %v6181_v29  ;;  %962 = vmatpush2.msra.mxu0 %v912_v53 }
  0x79   : > { %506 = vst [vmem:[#allocation2 + $0x138] sm:$0xff] %v6285_v16  ;;  %621 = vst [vmem:[#allocation2 + $0x178] sm:$0x7f] %v547_v14  ;;  %v6340_v62 = vsel %vm527_vm0, %v552_v46, %v553_v47  ;;  %v751_v4 = vld [vmem:[#allocation6 + $0x78] sm:$0xff]  ;;  %v6350_v5 = vld [vmem:[%s6107_s13 + $0xa0] sm:$0xff]  ;;  %v6356_v11 = vsel %vm414_vm1, %v439_v52, %v440_v57  ;;  %v443_v12 = vrot.slane %v6335_v56, 7  ;;  %5216 = vmatmul.mubr.f32.vlgmr.msra.gmra.mxu1 %v789_v58  ;;  %1379 = vmatprep.subr.mxu1 %v8513_v0 }
  0x7a   : > { %364 = vst [vmem:[#allocation2 + $0x188] sm:$0xff] %v6289_v20  ;;  %365 = vst [vmem:[#allocation2 + $0x1a0] sm:$0xff] %v6292_v21  ;;  %v6353_v7 = vld [vmem:[%s6107_s13 + $0xa8] sm:$0xff]  ;;  %v911_v13 = vld [vmem:[#allocation6 + $0x270] sm:$0xff]  ;;  %v6361_v14 = vsel %vm527_vm0, %v555_v1, %v556_v2  ;;  %v445_v29 = vrot.slane %v6350_v5, 7  ;;  %963 = vmatprep.subr.mxu0 %v8513_v0  ;;  %1380 = vmatpush1.msra.mxu1 %v751_v4  ;;  %s4781_s28 = sshll.u32 %s8325_s6, 4  ;;  %s8455_s28 = int_to_ptr.vmem [resolvable:$true] %s4781_s28 }
  0x7b   : > { %507 = vst [vmem:[#allocation2 + $0x150] sm:$0xfe] %v433_v18  ;;  %620 = vst [vmem:[#allocation2 + $0x160] sm:$0xff] %v6298_v27  ;;  %v558_v18 = vrot.slane %v6350_v5, 1  ;;  %v559_v24 = vrot.slane %v6353_v7, 1  ;;  %v6372_v25 = vld [vmem:[%s6107_s13 + $0xb0] sm:$0xff]  ;;  %v6378_v28 = vsel %vm414_vm1, %v442_v3, %v443_v12  ;;  %964 = vmatpush2.msra.mxu0 %v911_v13  ;;  %1381 = vmatprep.subr.mxu1 %v8513_v0 }
  0x7c   : > { %623 = vst [vmem:[#allocation2 + $0x1a8] sm:$0x7f] %v550_v32  ;;  %508 = vst [vmem:[#allocation2 + $0x168] sm:$0xff] %v6307_v36  ;;  %v6375_v26 = vld [vmem:[%s6107_s13 + $0xb8] sm:$0xff]  ;;  %v446_v32 = vrot.slane %v6353_v7, 7  ;;  %v910_v35 = vld [vmem:[#allocation6 + $0x268] sm:$0xff]  ;;  %965 = vmatprep.subr.mxu0 %v8513_v0  ;;  %5218 = vmatprep.mubr.f32.mxu1 %v6192_v34 }
  0x7d   : > { %509 = vst [vmem:[#allocation2 + $0x180] sm:$0xfe] %v436_v33  ;;  %622 = vst [vmem:[#allocation2 + $0x190] sm:$0xff] %v6312_v42  ;;  %v750_v33 = vld [vmem:[#allocation6 + $0x70] sm:$0xff]  ;;  %v6383_v37 = vsel %vm527_vm0, %v558_v18, %v559_v24  ;;  %v561_v38 = vrot.slane %v6372_v25, 1  ;;  %v562_v46 = vrot.slane %v6375_v26, 1  ;;  %966 = vmatpush2.msra.mxu0 %v910_v35  ;;  %993 = vmatprep.mubr.f32.mxu0 %v6157_v15 }
  0x7e   : > { %366 = vst [vmem:[#allocation2 + $0x1b8] sm:$0xff] %v6315_v43  ;;  %367 = vst [vmem:[#allocation2 + $0x1d0] sm:$0xff] %v6318_v45  ;;  %v6394_v53 = vld [vmem:[%s6107_s13 + $0xc0] sm:$0xff]  ;;  %v6397_v57 = vld [vmem:[%s6107_s13 + $0xc8] sm:$0xff]  ;;  %v6400_v58 = vsel %vm414_vm1, %v445_v29, %v446_v32  ;;  %1382 = vmatpush1.msra.mxu1 %v750_v33  ;;  %967 = vmatprep.subr.mxu0 %v8513_v0  ;;  %s4768_s8 = scalar_lea.sflag [#allocation5], %s6101_s30  ;;  %s5856_s29 = scalar_lea.vmem %s8455_s28, 4096 }
  0x7f   : > { %510 = vst [vmem:[#allocation2 + $0x198] sm:$0xff] %v6327_v48  ;;  %625 = vst [vmem:[#allocation2 + $0x1d8] sm:$0x7f] %v553_v47  ;;  %v448_v47 = vrot.slane %v6372_v25, 7  ;;  %v749_v1 = vld [vmem:[#allocation6 + $0x68] sm:$0xff]  ;;  %v565_v4 = vrot.slane %v6397_v57, 1  ;;  %1383 = vmatprep.subr.mxu1 %v8513_v0  ;;  %p5857_p5 = scmp.ne.s32.totalorder %s8455_s28, %s5856_s29 }
  0x80   : > { %368 = vst [vmem:[#allocation2 + $0x1e8] sm:$0xff] %v6332_v55  ;;  %369 = vst [vmem:[#allocation2 + $0x200] sm:$0xff] %v6335_v56  ;;  %v6412_v12 = vld [vmem:[%s6107_s13 + $0xd0] sm:$0xff]  ;;  %v8511_v34 = vrot.slane %v6394_v53, 7  ;;  %v909_v13 = vld [vmem:[#allocation6 + $0x260] sm:$0xff]  ;;  %1384 = vmatpush1.msra.mxu1 %v749_v1  ;;  %p8683_p2 = scmp.ne.s32.totalorder %s8557_s23, 0 }
  0x81   : > { %511 = vst [vmem:[#allocation2 + $0x1b0] sm:$0xfe] %v439_v52  ;;  %624 = vst [vmem:[#allocation2 + $0x1c0] sm:$0xff] %v6340_v62  ;;  %v795_v52 = vld [vmem:[#allocation2 + $0x88] sm:$0xff]  ;;  %v6418_v18 = vld [vmem:[%s6107_s13 + $0xd8] sm:$0xff]  ;;  %968 = vmatpush2.msra.mxu0 %v909_v13  ;;  %1385 = vmatprep.subr.mxu1 %v8513_v0  ;;  %s5932_s22 = smov [#allocation9]  }
  0x82   : > { %627 = vst [vmem:[#allocation2 + $0x208] sm:$0x7f] %v556_v2  ;;  %370 = vst [vmem:[#allocation2 + $0x218] sm:$0xff] %v6350_v5  ;;  %v6405_v2 = vsel %vm527_vm0, %v561_v38, %v562_v46  ;;  %5219 = vmatmul.mubr.f32.gmra.mxu1 %v795_v52  ;;  %v568_v33 = vrot.slane %v6418_v18, 1  ;;  %v6430_v35 = vld [vmem:[%s6107_s13 + $0xe0] sm:$0xff]  ;;  %v6437_v52 = vld [vmem:[%s6107_s13 + $0xe8] sm:$0xff]  ;;  %969 = vmatprep.subr.mxu0 %v8513_v0  ;;  %p5858_p7 = pnand %p5857_p5, %p8683_p2 }
  0x83   : > { %371 = vst [vmem:[#allocation2 + $0x230] sm:$0xff] %v6353_v7  ;;  %512 = vst [vmem:[#allocation2 + $0x1c8] sm:$0xff] %v6356_v11  ;;  %v748_v38 = vld [vmem:[#allocation6 + $0x60] sm:$0xff]  ;;  %v801_v19 = vld [vmem:[#allocation2 + $0xb8] sm:$0xff]  ;;  %5221 = vmatprep.mubr.f32.mxu1 %v6212_v44  ;;  %v454_v44 = vrot.slane %v6412_v12, 7 }
  0x84   : > { %513 = vst [vmem:[#allocation2 + $0x1e0] sm:$0xfe] %v442_v3  ;;  %626 = vst [vmem:[#allocation2 + $0x1f0] sm:$0xff] %v6361_v14  ;;  %v564_v3 = vrot.slane %v6394_v53, 1  ;;  %v6458_v13 = vld [vmem:[%s6107_s13 + $0xf8] sm:$0xff]  ;;  %1386 = vmatpush1.msra.mxu1 %v748_v38  ;;  %v746_v38 = vld [vmem:[#allocation6 + $0x50] sm:$0xff]  ;;  %p5859_p12 = pneg %p5858_p7 }
  0x85   : > { %8564 = vst [vmem:[#allocation13_spill] sm:$0xff] %v6375_v26  ;;  %629 = vst [vmem:[#allocation2 + $0x238] sm:$0x7f] %v559_v24  ;;  %v567_v24 = vrot.slane %v6412_v12, 1  ;;  %v574_v0 = vrot.slane %v6458_v13, 1 }
  0x86   : > { %372 = vst [vmem:[#allocation2 + $0x248] sm:$0xff] %v6372_v25  ;;  %373 = vst [vmem:[#allocation2 + $0x260] sm:$0xff] %v6375_v26  ;;  %v6425_v32 = vsel %vm527_vm0, %v564_v3, %v565_v4  ;;  %v570_v3 = vrot.slane %v6430_v35, 1  ;;  %5222 = vmatmul.mubr.f32.gmra.mxu1 %v801_v19  ;;  %v452_v19 = vrot.slane %v6397_v57, 7 }
  0x87   : > { %514 = vst [vmem:[#allocation2 + $0x1f8] sm:$0xff] %v6378_v28  ;;  %515 = vst [vmem:[#allocation2 + $0x210] sm:$0xfe] %v445_v29  ;;  %v449_v29 = vrot.slane %v6375_v26, 7  ;;  %v6446_v1 = vsel %vm527_vm0, %v567_v24, %v568_v33  ;;  %v6451_v26 = vld [vmem:[%s6107_s13 + $0xf0] sm:$0xff]  ;;  %5224 = vmatprep.mubr.f32.mxu1 %v6233_v54  ;;  %v813_v54 = vld [vmem:[#allocation2 + $0x118] sm:$0xff] }
  0x88   : > { %628 = vst [vmem:[#allocation2 + $0x220] sm:$0xff] %v6383_v37  ;;  %8565 = vst [vmem:[#allocation14_spill] sm:$0xff] %v6397_v57  ;;  %v573_v24 = vrot.slane %v6451_v26, 1 }
  0x89   : > { %631 = vst [vmem:[#allocation2 + $0x268] sm:$0x7f] %v562_v46  ;;  %374 = vst [vmem:[#allocation2 + $0x278] sm:$0xff] %v6394_v53  ;;  %v908_v46 = vld [vmem:[#allocation6 + $0x258] sm:$0xff] }
  0x8a   : > { %375 = vst [vmem:[#allocation2 + $0x290] sm:$0xff] %v6397_v57  ;;  %8566 = vst [vmem:[#allocation15_spill] sm:$0xff] %v6412_v12  ;;  %970 = vmatpush2.msra.mxu0 %v908_v46  ;;  %v906_v46 = vld [vmem:[#allocation6 + $0x248] sm:$0xff]  ;;  %v904_v57 = vld [vmem:[#allocation6 + $0x238] sm:$0xff] }
  0x8b   : > { %516 = vst [vmem:[#allocation2 + $0x228] sm:$0xff] %v6400_v58  ;;  %517 = vst [vmem:[#allocation2 + $0x240] sm:$0xfe] %v448_v47 }
  0x8c   : > { %630 = vst [vmem:[#allocation2 + $0x250] sm:$0xff] %v6405_v2  ;;  %376 = vst [vmem:[#allocation2 + $0x2a8] sm:$0xff] %v6412_v12  ;;  %v905_v12 = vld [vmem:[#allocation6 + $0x240] sm:$0xff] }
  0x8d   : > { %633 = vst [vmem:[#allocation2 + $0x298] sm:$0x7f] %v565_v4  ;;  %377 = vst [vmem:[#allocation2 + $0x2c0] sm:$0xff] %v6418_v18  ;;  %v6442_v4 = vsel %vm414_vm1, %v448_v47, %v449_v29  ;;  %v747_v47 = vld [vmem:[#allocation6 + $0x58] sm:$0xff]  ;;  %v907_v29 = vld [vmem:[#allocation6 + $0x250] sm:$0xff] }
  0x8e   : > { %519 = vst [vmem:[#allocation2 + $0x270] sm:$0xfe] %v8511_v34  ;;  %632 = vst [vmem:[#allocation2 + $0x280] sm:$0xff] %v6425_v32  ;;  %v571_v34 = vrot.slane %v6437_v52, 1 }
  0x8f   : > { %378 = vst [vmem:[#allocation2 + $0x2d8] sm:$0xff] %v6430_v35  ;;  %8567 = vst [vmem:[#allocation16_spill] sm:$0xff] %v6442_v4 }
  0x90   : > { %635 = vst [vmem:[#allocation2 + $0x2c8] sm:$0x7f] %v568_v33  ;;  %379 = vst [vmem:[#allocation2 + $0x2f0] sm:$0xff] %v6437_v52  ;;  %v6463_v33 = vsel %vm527_vm0, %v570_v3, %v571_v34  ;;  %v6472_v3 = vsel %vm527_vm0, %v573_v24, %v574_v0  ;;  %v8571_v24 = vrot.slane %v6394_v53, 7 }
  0x91   : > { %8568 = vst [vmem:[#allocation17_spill] sm:$0xff] %v6451_v26  ;;  %518 = vst [vmem:[#allocation2 + $0x258] sm:$0xff] %v6442_v4  ;;  %v8570_v4 = vmov 0.0  }
  0x92   : > { %634 = vst [vmem:[#allocation2 + $0x2b0] sm:$0xff] %v6446_v1  ;;  %8569 = vst [vmem:[#allocation18_spill] sm:$0xff] %v6458_v13  ;;  %1387 = vmatprep.subr.mxu1 %v8570_v4  ;;  %971 = vmatprep.subr.mxu0 %v8570_v4 }
  0x93   : > { %380 = vst [vmem:[#allocation2 + $0x308] sm:$0xff] %v6451_v26  ;;  %637 = vst [vmem:[#allocation2 + $0x2f8] sm:$0x7f] %v571_v34  ;;  %1388 = vmatpush1.msra.mxu1 %v747_v47  ;;  %972 = vmatpush2.msra.mxu0 %v907_v29  ;;  %v807_v34 = vld [vmem:[#allocation2 + $0xe8] sm:$0xff]  ;;  %v744_v29 = vld [vmem:[#allocation6 + $0x40] sm:$0xff] }
  0x94   : > { %381 = vst [vmem:[#allocation2 + $0x320] sm:$0xff] %v6458_v13  ;;  %636 = vst [vmem:[#allocation2 + $0x2e0] sm:$0xff] %v6463_v33  ;;  %1389 = vmatprep.subr.mxu1 %v8570_v4  ;;  %973 = vmatprep.subr.mxu0 %v8570_v4  ;;  %v745_v47 = vld [vmem:[#allocation6 + $0x48] sm:$0xff] }
  0x95   : > { %639 = vst [vmem:[#allocation2 + $0x328] sm:$0x7f] %v574_v0  ;;  %521 = vst [vmem:[#allocation2 + $0x2a0] sm:$0xfe] %v454_v44  ;;  %1390 = vmatpush1.msra.mxu1 %v746_v38  ;;  %974 = vmatpush2.msra.mxu0 %v906_v46  ;;  %v6482_v0 = vsel %vm414_vm1, %v8571_v24, %v452_v19  ;;  %v457_v38 = vrot.slane %v6430_v35, 7  ;;  %v743_v46 = vld [vmem:[#allocation6 + $0x38] sm:$0xff] }
  0x96   : > { %638 = vst [vmem:[#allocation2 + $0x310] sm:$0xff] %v6472_v3  ;;  %5225 = vmatmul.mubr.f32.gmra.mxu1 %v807_v34  ;;  %1391 = vmatprep.subr.mxu1 %v8570_v4  ;;  %520 = vst [vmem:[#allocation2 + $0x288] sm:$0xff] %v6482_v0  ;;  %v903_v34 = vld [vmem:[#allocation6 + $0x230] sm:$0xff]  ;;  %v455_v19 = vrot.slane %v6418_v18, 7  ;;  %v819_v24 = vld [vmem:[#allocation2 + $0x148] sm:$0xff] }
  0x97   : > { %975 = vmatprep.subr.mxu0 %v8570_v4  ;;  %1392 = vmatpush1.msra.mxu1 %v745_v47  ;;  %523 = vst [vmem:[#allocation2 + $0x2d0] sm:$0xfe] %v457_v38  ;;  %v902_v47 = vld [vmem:[#allocation6 + $0x228] sm:$0xff] }
  0x98   : > { %976 = vmatpush2.msra.mxu0 %v905_v12  ;;  %1393 = vmatprep.subr.mxu1 %v8570_v4  ;;  %v742_v12 = vld [vmem:[#allocation6 + $0x30] sm:$0xff] }
  0x99   : > { %977 = vmatprep.subr.mxu0 %v8570_v4  ;;  %5227 = vmatprep.mubr.f32.mxu1 %v6254_v63  ;;  %v6496_v63 = vsel %vm414_vm1, %v454_v44, %v455_v19  ;;  %v740_v44 = vld [vmem:[#allocation6 + $0x20] sm:$0xff]  ;;  %v458_v19 = vrot.slane %v6437_v52, 7 }
  0x9a   : > { %1394 = vmatpush1.msra.mxu1 %v744_v29  ;;  %978 = vmatpush2.msra.mxu0 %v904_v57  ;;  %v741_v57 = vld [vmem:[#allocation6 + $0x28] sm:$0xff]  ;;  %522 = vst [vmem:[#allocation2 + $0x2b8] sm:$0xff] %v6496_v63  ;;  %v901_v29 = vld [vmem:[#allocation6 + $0x220] sm:$0xff] }
  0x9b   : > { %5228 = vmatmul.mubr.f32.gmra.mxu1 %v813_v54  ;;  %1395 = vmatprep.subr.mxu1 %v8570_v4  ;;  %v460_v54 = vrot.slane %v6451_v26, 7 }
  0x9c   : > { %979 = vmatprep.subr.mxu0 %v8570_v4  ;;  %1396 = vmatpush1.msra.mxu1 %v743_v46  ;;  %v900_v46 = vld [vmem:[#allocation6 + $0x218] sm:$0xff] }
  0x9d   : > { %980 = vmatpush2.msra.mxu0 %v903_v34  ;;  %1397 = vmatprep.subr.mxu1 %v8570_v4  ;;  %525 = vst [vmem:[#allocation2 + $0x300] sm:$0xfe] %v460_v54  ;;  %v739_v34 = vld [vmem:[#allocation6 + $0x18] sm:$0xff] }
  0x9e   : > { %981 = vmatprep.subr.mxu0 %v8570_v4  ;;  %5230 = vmatprep.mubr.f32.mxu1 %v6269_v8  ;;  %v825_v8 = vld [vmem:[#allocation2 + $0x178] sm:$0xff] }
  0x9f   : > { %1398 = vmatpush1.msra.mxu1 %v742_v12  ;;  %982 = vmatpush2.msra.mxu0 %v902_v47  ;;  %v899_v12 = vld [vmem:[#allocation6 + $0x210] sm:$0xff]  ;;  %v6510_v47 = vsel %vm414_vm1, %v457_v38, %v458_v19  ;;  %v897_v38 = vld [vmem:[#allocation6 + $0x200] sm:$0xff]  ;;  %v837_v19 = vld [vmem:[#allocation2 + $0x1d8] sm:$0xff] }
  0xa0   : > { %5231 = vmatmul.mubr.f32.gmra.mxu1 %v819_v24  ;;  %1399 = vmatprep.subr.mxu1 %v8570_v4  ;;  %v738_v24 = vld [vmem:[#allocation6 + $0x10] sm:$0xff]  ;;  %524 = vst [vmem:[#allocation2 + $0x2e8] sm:$0xff] %v6510_v47 }
  0xa1   : > { %983 = vmatprep.subr.mxu0 %v8570_v4  ;;  %1400 = vmatpush1.msra.mxu1 %v741_v57  ;;  %v898_v57 = vld [vmem:[#allocation6 + $0x208] sm:$0xff] }
  0xa2   : > { %984 = vmatpush2.msra.mxu0 %v901_v29  ;;  %1401 = vmatprep.subr.mxu1 %v8570_v4  ;;  %v737_v29 = vld [vmem:[#allocation6 + $0x8] sm:$0xff] }
  0xa3   : > { %985 = vmatprep.subr.mxu0 %v8570_v4  ;;  %5233 = vmatprep.mubr.f32.mxu1 %v6298_v27  ;;  %v831_v27 = vld [vmem:[#allocation2 + $0x1a8] sm:$0xff] }
  0xa4   : > { %1402 = vmatpush1.msra.mxu1 %v740_v44  ;;  %986 = vmatpush2.msra.mxu0 %v900_v46  ;;  %v6518_v44 = vld [vmem:[#allocation2 + $0x30] sm:$0xff]  ;;  %v736_v46 = vld [vmem:[#allocation6] sm:$0xff] }
  0xa5   : > { %5234 = vmatmul.mubr.f32.gmra.mxu1 %v825_v8  ;;  %1403 = vmatprep.subr.mxu1 %v8570_v4  ;;  %v416_v8 = vrot.slane %v6160_v17, 7 }
  0xa6   : > { %987 = vmatprep.subr.mxu0 %v8570_v4  ;;  %1404 = vmatpush1.msra.mxu1 %v739_v34  ;;  %v461_v34 = vrot.slane %v6458_v13, 7 }
  0xa7   : > { %988 = vmatpush2.msra.mxu0 %v899_v12  ;;  %1405 = vmatprep.subr.mxu1 %v8570_v4 }
  0xa8   : > { %989 = vmatprep.subr.mxu0 %v8570_v4  ;;  %5236 = vmatprep.mubr.f32.mxu1 %v6312_v42  ;;  %v783_v42 = vld [vmem:[#allocation6 + $0x178] sm:$0xff]  ;;  %v6527_v12 = vsel %vm414_vm1, %v460_v54, %v461_v34  ;;  %v843_v54 = vld [vmem:[#allocation2 + $0x208] sm:$0xff]  ;;  %v762_v34 = vld [vmem:[#allocation6 + $0xd0] sm:$0xff] }
  0xa9   : > { %1406 = vmatpush1.msra.mxu1 %v738_v24  ;;  %990 = vmatpush2.msra.mxu0 %v898_v57  ;;  %v767_v24 = vld [vmem:[#allocation6 + $0xf8] sm:$0xff]  ;;  %526 = vst [vmem:[#allocation2 + $0x318] sm:$0xff] %v6527_v12  ;;  %v8572_v57 = vrot.slane %v6157_v15, 7  ;;  %v6541_v15 = vld [vmem:[#allocation2 + $0x60] sm:$0xff] }
  0xaa   : > { %5237 = vmatmul.mubr.f32.gmra.mxu1 %v831_v27  ;;  %1407 = vmatprep.subr.mxu1 %v8570_v4 }
  0xab   : > { %991 = vmatprep.subr.mxu0 %v8570_v4  ;;  %1408 = vmatpush1.msra.mxu1 %v737_v29  ;;  %v6534_v27 = vsel %vm414_vm1, %v8572_v57, %v416_v8  ;;  %v766_v29 = vld [vmem:[#allocation6 + $0xf0] sm:$0xff]  ;;  %v6548_v8 = vld [vmem:[#allocation2] sm:$0xff]  ;;  %v757_v57 = vld [vmem:[#allocation6 + $0xa8] sm:$0xff] }
  0xac   : > { %992 = vmatpush2.msra.mxu0 %v897_v38  ;;  %1409 = vmatprep.subr.mxu1 %v8570_v4  ;;  %v764_v38 = vld [vmem:[#allocation6 + $0xe0] sm:$0xff] }
  0xad   : > { %994 = vmatmul.mubr.f32.vlgmr.msra.gmra.mxu0 %v6518_v44  ;;  %5239 = vmatprep.mubr.f32.mxu1 %v6340_v62  ;;  %v765_v62 = vld [vmem:[#allocation6 + $0xe8] sm:$0xff] }
  0xae   : > { %1410 = vmatpush1.msra.mxu1 %v736_v46  ;;  %5263 = vmatprep.subr.mxu0 %v783_v42  ;;  %v782_v46 = vld [vmem:[#allocation6 + $0x170] sm:$0xff] }
  0xaf   : > { %5240 = vmatmul.mubr.f32.gmra.mxu1 %v837_v19  ;;  %1411 = vmatprep.subr.mxu1 %v8570_v4  ;;  %v781_v19 = vld [vmem:[#allocation6 + $0x168] sm:$0xff] }
  0xb0   : > { %5264 = vmatpush3.msra.mxu0 %v783_v42  ;;  %1412 = vmatpush2.msra.mxu1 %v767_v24  ;;  %v760_v42 = vld [vmem:[#allocation6 + $0xc0] sm:$0xff]  ;;  %v758_v24 = vld [vmem:[#allocation6 + $0xb0] sm:$0xff] }
  0xb1   : > { %998 = vmatprep.mubr.f32.mxu0 %v6160_v17  ;;  %1413 = vmatprep.subr.mxu1 %v8570_v4  ;;  %v849_v17 = vld [vmem:[#allocation2 + $0x238] sm:$0xff] }
  0xb2   : > { %999 = vmatmul.mubr.f32.gmra.mxu0 %v6534_v27  ;;  %5242 = vmatprep.mubr.f32.mxu1 %v6361_v14  ;;  %v763_v14 = vld [vmem:[#allocation6 + $0xd8] sm:$0xff] }
  0xb3   : > { %1414 = vmatpush2.msra.mxu1 %v766_v29  ;;  %1003 = vmatprep.mubr.f32.mxu0 %v6167_v22  ;;  %v855_v22 = vld [vmem:[#allocation2 + $0x268] sm:$0xff]  ;;  %v756_v29 = vld [vmem:[#allocation6 + $0xa0] sm:$0xff] }
  0xb4   : > { %5243 = vmatmul.mubr.f32.gmra.mxu1 %v843_v54  ;;  %1415 = vmatprep.subr.mxu1 %v8570_v4  ;;  %v780_v54 = vld [vmem:[#allocation6 + $0x160] sm:$0xff] }
  0xb5   : > { %1416 = vmatpush2.msra.mxu1 %v765_v62  ;;  %5245 = vmatprep.mubr.f32.mxu1 %v6383_v37  ;;  %v6555_v37 = vld [vmem:[#allocation2 + $0x90] sm:$0xff] }
  0xb6   : > { %1417 = vmatprep.subr.mxu1 %v8570_v4  ;;  %1004 = vmatmul.mubr.f32.gmra.mxu0 %v6541_v15  ;;  %v761_v4 = vld [vmem:[#allocation6 + $0xc8] sm:$0xff]  ;;  %v754_v62 = vld [vmem:[#allocation6 + $0x90] sm:$0xff] }
  0xb7   : > { %1418 = vmatpush2.msra.mxu1 %v764_v38  ;;  %5265 = vmatprep.subr.mxu0 %v782_v46  ;;  %v753_v38 = vld [vmem:[#allocation6 + $0x88] sm:$0xff] }
  0xb8   : > { %5246 = vmatmul.mubr.f32.gmra.mxu1 %v849_v17  ;;  %1419 = vmatprep.subr.mxu1 %v6548_v8  ;;  %v779_v17 = vld [vmem:[#allocation6 + $0x158] sm:$0xff] }
  0xb9   : > { %5266 = vmatpush3.msra.mxu0 %v782_v46  ;;  %1420 = vmatpush2.msra.mxu1 %v763_v14  ;;  %v752_v46 = vld [vmem:[#allocation6 + $0x80] sm:$0xff] }
  0xba   : > { %1008 = vmatprep.mubr.f32.mxu0 %v6170_v23  ;;  %1421 = vmatprep.subr.mxu1 %v6548_v8  ;;  %v861_v23 = vld [vmem:[#allocation2 + $0x298] sm:$0xff]  ;;  %v5736_v14 = vld [vmem:[%s6107_s13] sm:$0xff] }
  0xbb   : > { %1009 = vmatmul.mubr.f32.gmra.mxu0 %v6208_v41  ;;  %5248 = vmatprep.mubr.f32.mxu1 %v6405_v2  ;;  %v759_v2 = vld [vmem:[#allocation6 + $0xb8] sm:$0xff] }
  0xbc   : > { %1422 = vmatpush2.msra.mxu1 %v762_v34  ;;  %1013 = vmatprep.mubr.f32.mxu0 %v6184_v30  ;;  %v867_v30 = vld [vmem:[#allocation2 + $0x2c8] sm:$0xff]  ;;  %v776_v34 = vld [vmem:[#allocation6 + $0x140] sm:$0xff] }
  0xbd   : > { %5249 = vmatmul.mubr.f32.gmra.mxu1 %v855_v22  ;;  %1423 = vmatprep.subr.mxu1 %v6548_v8  ;;  %v6602_v22 = vld [vmem:[#allocation2 + $0x150] sm:$0xff] }
  0xbe   : > { %1424 = vmatpush2.msra.mxu1 %v761_v4  ;;  %5251 = vmatprep.mubr.f32.mxu1 %v6425_v32  ;;  %v6567_v32 = vld [vmem:[#allocation2 + $0xc0] sm:$0xff]  ;;  %v1941_v4 = vld [vmem:[#allocation6 + $0x370] sm:$0xff] }
  0xbf   : > { %1425 = vmatprep.subr.mxu1 %v6548_v8  ;;  %1014 = vmatmul.mubr.f32.gmra.mxu0 %v6555_v37 }
  0xc0   : > { %1426 = vmatpush2.msra.mxu1 %v760_v42  ;;  %5267 = vmatprep.subr.mxu0 %v781_v19  ;;  %v1939_v42 = vld [vmem:[#allocation6 + $0x360] sm:$0xff] }
  0xc1   : > { %5252 = vmatmul.mubr.f32.gmra.mxu1 %v861_v23  ;;  %1427 = vmatprep.subr.mxu1 %v6548_v8  ;;  %v6629_v23 = vld [vmem:[#allocation2 + $0xb0] sm:$0xff] }
  0xc2   : > { %5268 = vmatpush3.msra.mxu0 %v781_v19  ;;  %1428 = vmatpush2.msra.mxu1 %v759_v2  ;;  %v6619_v19 = vld [vmem:[#allocation2 + $0x180] sm:$0xff]  ;;  %8576 = vst [vmem:[#allocation22_spill] sm:$0xff] %v6629_v23  ;;  %v1936_v2 = vld [vmem:[#allocation6 + $0x348] sm:$0xff] }
  0xc3   : > { %1018 = vmatprep.mubr.f32.mxu0 %v6187_v31  ;;  %1429 = vmatprep.subr.mxu1 %v6548_v8  ;;  %v873_v31 = vld [vmem:[#allocation2 + $0x2f8] sm:$0xff] }
  0xc4   : > { %1019 = vmatmul.mubr.f32.gmra.mxu0 %v6229_v51  ;;  %5254 = vmatprep.mubr.f32.mxu1 %v6446_v1  ;;  %v755_v1 = vld [vmem:[#allocation6 + $0x98] sm:$0xff] }
  0xc5   : > { %1430 = vmatpush2.msra.mxu1 %v758_v24  ;;  %1023 = vmatprep.mubr.f32.mxu0 %v6202_v39  ;;  %v879_v39 = vld [vmem:[#allocation2 + $0x328] sm:$0xff]  ;;  %v6635_v24 = vld [vmem:[#allocation2 + $0x1b0] sm:$0xff] }
  0xc6   : > { %5255 = vmatmul.mubr.f32.gmra.mxu1 %v867_v30  ;;  %1431 = vmatprep.subr.mxu1 %v6548_v8  ;;  %v6652_v30 = vld [vmem:[#allocation2 + $0x1e0] sm:$0xff] }
  0xc7   : > { %1432 = vmatpush2.msra.mxu1 %v757_v57  ;;  %5257 = vmatprep.mubr.f32.mxu1 %v6463_v33  ;;  %v6579_v33 = vld [vmem:[#allocation2 + $0xf0] sm:$0xff]  ;;  %v6655_v57 = vld [vmem:[#allocation2 + $0xf8] sm:$0xff] }
  0xc8   : > { %1433 = vmatprep.subr.mxu1 %v6548_v8  ;;  %1024 = vmatmul.mubr.f32.gmra.mxu0 %v6567_v32  ;;  %8579 = vst [vmem:[#allocation25_spill] sm:$0xff] %v6655_v57 }
  0xc9   : > { %1434 = vmatpush2.msra.mxu1 %v756_v29  ;;  %5269 = vmatprep.subr.mxu0 %v780_v54  ;;  %v1932_v29 = vld [vmem:[#allocation6 + $0x328] sm:$0xff] }
  0xca   : > { %5258 = vmatmul.mubr.f32.gmra.mxu1 %v873_v31  ;;  %1435 = vmatprep.subr.mxu1 %v6548_v8  ;;  %v6669_v31 = vld [vmem:[#allocation2 + $0x210] sm:$0xff] }
  0xcb   : > { %5270 = vmatpush3.msra.mxu0 %v780_v54  ;;  %1436 = vmatpush2.msra.mxu1 %v755_v1  ;;  %v1931_v54 = vld [vmem:[#allocation6 + $0x320] sm:$0xff]  ;;  %v1930_v1 = vld [vmem:[#allocation6 + $0x318] sm:$0xff] }
  0xcc   : > { %1028 = vmatprep.mubr.f32.mxu0 %v6205_v40  ;;  %1437 = vmatprep.subr.mxu1 %v6548_v8  ;;  %v778_v40 = vld [vmem:[#allocation6 + $0x150] sm:$0xff] }
  0xcd   : > { %1029 = vmatmul.mubr.f32.gmra.mxu0 %v6250_v61  ;;  %5260 = vmatprep.mubr.f32.mxu1 %v6472_v3  ;;  %v6591_v3 = vld [vmem:[#allocation2 + $0x120] sm:$0xff] }
  0xce   : > { %1438 = vmatpush2.msra.mxu1 %v754_v62  ;;  %1033 = vmatprep.mubr.f32.mxu0 %v6223_v49  ;;  %v777_v49 = vld [vmem:[#allocation6 + $0x148] sm:$0xff] }
  0xcf   : > { %5261 = vmatmul.mubr.f32.gmra.mxu1 %v879_v39  ;;  %1439 = vmatprep.subr.mxu1 %v6548_v8  ;;  %v6671_v62 = vld [vmem:[#allocation2 + $0x128] sm:$0xff]  ;;  %v6678_v39 = vld [vmem:[#allocation2 + $0x140] sm:$0xff] }
  0xd0   : > { %1440 = vmatpush2.msra.mxu1 %v753_v38  ;;  %1443 = vmatprep.mubr.f32.mxu1 %v6548_v8  ;;  %8581 = vst [vmem:[#allocation27_spill] sm:$0xff] %v6671_v62  ;;  %8582 = vst [vmem:[#allocation28_spill] sm:$0xff] %v6678_v39  ;;  %v768_v38 = vld [vmem:[#allocation6 + $0x100] sm:$0xff] }
  0xd1   : > { %1441 = vmatprep.subr.mxu1 %v6548_v8  ;;  %1034 = vmatmul.mubr.f32.gmra.mxu0 %v6579_v33 }
  0xd2   : > { %1442 = vmatpush2.msra.mxu1 %v752_v46  ;;  %5271 = vmatprep.subr.mxu0 %v779_v17  ;;  %v6684_v46 = vld [vmem:[#allocation2 + $0x240] sm:$0xff] }
  0xd3   : > { %1444 = vmatmul.mubr.f32.vlgmr.msra.gmra.mxu1 %v6548_v8  ;;  %5272 = vmatpush3.msra.mxu0 %v779_v17  ;;  %v6687_v17 = vld [vmem:[#allocation2 + $0x158] sm:$0xff] }
  0xd4   : > { %1038 = vmatprep.mubr.f32.mxu0 %v6226_v50  ;;  %1448 = vmatprep.mubr.f32.mxu1 %v6548_v8  ;;  %v1942_v50 = vld [vmem:[#allocation6 + $0x378] sm:$0xff]  ;;  %8583 = vst [vmem:[#allocation29_spill] sm:$0xff] %v6687_v17 }
  0xd5   : > { %1039 = vmatmul.mubr.f32.gmra.mxu0 %v6265_v6  ;;  %5273 = vmatprep.subr.mxu0 %v778_v40  ;;  %v5737_v6 = vld [vmem:[%s6107_s13 + $0x8] sm:$0xff] }
  0xd6   : > { %1043 = vmatprep.mubr.f32.mxu0 %v6244_v59  ;;  %5274 = vmatpush3.msra.mxu0 %v778_v40  ;;  %v775_v59 = vld [vmem:[#allocation6 + $0x138] sm:$0xff] }
  0xd7   : > { %1449 = vmatmul.mubr.f32.gmra.mxu1 %v6548_v8  ;;  %5275 = vmatprep.subr.mxu0 %v777_v49  ;;  %v6690_v40 = vld [vmem:[#allocation6 + $0x478] sm:$0xff] }
  0xd8   : > { %1453 = vmatprep.mubr.f32.mxu1 %v5736_v14  ;;  %1975 = vmatprep.subr.mxu1 %v6548_v8  ;;  %v6697_v14 = vld [vmem:[#allocation2 + $0x170] sm:$0xff] }
  0xd9   : > { %1044 = vmatmul.mubr.f32.gmra.mxu0 %v6591_v3  ;;  %1976 = vmatpush1.msra.mxu1 %v1942_v50  ;;  %v1957_v50 = vld [vmem:[#allocation6 + $0x3f0] sm:$0xff] }
  0xda   : > { %1048 = vmatprep.mubr.f32.mxu0 %v6247_v60  ;;  %5276 = vmatpush3.msra.mxu0 %v777_v49  ;;  %v6605_v60 = vld [vmem:[#allocation2 + $0x68] sm:$0xff]  ;;  %v1927_v49 = vld [vmem:[#allocation6 + $0x300] sm:$0xff] }
  0xdb   : > { %1454 = vmatmul.mubr.f32.gmra.mxu1 %v6518_v44  ;;  %5277 = vmatprep.subr.mxu0 %v776_v34  ;;  %8573 = vst [vmem:[#allocation19_spill] sm:$0xff] %v6605_v60  ;;  %v774_v44 = vld [vmem:[#allocation6 + $0x130] sm:$0xff] }
  0xdc   : > { %1458 = vmatprep.mubr.f32.mxu1 %v5737_v6  ;;  %5278 = vmatpush3.msra.mxu0 %v776_v34  ;;  %v8586_v34 = vld [vmem:[#allocation16_spill] sm:$0xff]  ;;  %v1956_v6 = vld [vmem:[#allocation6 + $0x3e8] sm:$0xff] }
  0xdd   : > { %1049 = vmatmul.mubr.f32.gmra.mxu0 %v6285_v16  ;;  %5279 = vmatprep.subr.mxu0 %v775_v59  ;;  %v1940_v16 = vld [vmem:[#allocation6 + $0x368] sm:$0xff] }
  0xde   : > { %1053 = vmatprep.mubr.f32.mxu0 %v6272_v9  ;;  %5280 = vmatpush3.msra.mxu0 %v775_v59  ;;  %v6613_v9 = vld [vmem:[#allocation2 + $0x80] sm:$0xff]  ;;  %v6703_v59 = vld [vmem:[#allocation2 + $0x270] sm:$0xff] }
  0xdf   : > { %1459 = vmatmul.mubr.f32.gmra.mxu1 %v6534_v27  ;;  %1977 = vmatprep.subr.mxu1 %v6548_v8  ;;  %8574 = vst [vmem:[#allocation20_spill] sm:$0xff] %v6613_v9  ;;  %v773_v27 = vld [vmem:[#allocation6 + $0x128] sm:$0xff] }
  0xe0   : > { %1463 = vmatprep.mubr.f32.mxu1 %v6605_v60  ;;  %1978 = vmatpush1.msra.mxu1 %v1941_v4  ;;  %v1955_v4 = vld [vmem:[#allocation6 + $0x3e0] sm:$0xff] }
  0xe1   : > { %1054 = vmatmul.mubr.f32.gmra.mxu0 %v6602_v22  ;;  %1979 = vmatprep.subr.mxu1 %v6548_v8 }
  0xe2   : > { %1058 = vmatprep.mubr.f32.mxu0 %v6275_v10  ;;  %5281 = vmatprep.subr.mxu0 %v774_v44  ;;  %v1938_v10 = vld [vmem:[#allocation6 + $0x358] sm:$0xff] }
  0xe3   : > { %1464 = vmatmul.mubr.f32.gmra.mxu1 %v6541_v15  ;;  %5282 = vmatpush3.msra.mxu0 %v774_v44  ;;  %v6622_v15 = vld [vmem:[#allocation2 + $0x98] sm:$0xff]  ;;  %v8588_v44 = vld [vmem:[#allocation14_spill] sm:$0xff] }
  0xe4   : > { %1468 = vmatprep.mubr.f32.mxu1 %v6613_v9  ;;  %1980 = vmatpush1.msra.mxu1 %v1940_v16  ;;  %8575 = vst [vmem:[#allocation21_spill] sm:$0xff] %v6622_v15  ;;  %v1953_v16 = vld [vmem:[#allocation6 + $0x3d0] sm:$0xff] }
  0xe5   : > { %1059 = vmatmul.mubr.f32.gmra.mxu0 %v6307_v36  ;;  %1981 = vmatprep.subr.mxu1 %v6548_v8 }
  0xe6   : > { %1063 = vmatprep.mubr.f32.mxu0 %v6289_v20  ;;  %5283 = vmatprep.subr.mxu0 %v773_v27  ;;  %v1937_v20 = vld [vmem:[#allocation6 + $0x350] sm:$0xff] }
  0xe7   : > { %1469 = vmatmul.mubr.f32.gmra.mxu1 %v6208_v41  ;;  %5284 = vmatpush3.msra.mxu0 %v773_v27  ;;  %v772_v41 = vld [vmem:[#allocation6 + $0x120] sm:$0xff]  ;;  %v8590_v27 = vld [vmem:[#allocation15_spill] sm:$0xff] }
  0xe8   : > { %1473 = vmatprep.mubr.f32.mxu1 %v6622_v15  ;;  %1982 = vmatpush1.msra.mxu1 %v1939_v42  ;;  %v6721_v42 = vld [vmem:[#allocation2 + $0x2a0] sm:$0xff] }
  0xe9   : > { %1064 = vmatmul.mubr.f32.gmra.mxu0 %v6619_v19  ;;  %1983 = vmatprep.subr.mxu1 %v6548_v8 }
  0xea   : > { %1068 = vmatprep.mubr.f32.mxu0 %v6292_v21  ;;  %1984 = vmatpush1.msra.mxu1 %v1938_v10  ;;  %v6639_v21 = vld [vmem:[#allocation2 + $0xc8] sm:$0xff]  ;;  %v5754_v10 = vld [vmem:[#allocation2 + $0x198] sm:$0xff] }
  0xeb   : > { %1474 = vmatmul.mubr.f32.gmra.mxu1 %v6555_v37  ;;  %1985 = vmatprep.subr.mxu1 %v6548_v8  ;;  %8577 = vst [vmem:[#allocation23_spill] sm:$0xff] %v6639_v21  ;;  %v771_v37 = vld [vmem:[#allocation6 + $0x118] sm:$0xff] }
  0xec   : > { %1478 = vmatprep.mubr.f32.mxu1 %v6629_v23  ;;  %1986 = vmatpush1.msra.mxu1 %v1937_v20  ;;  %v6724_v20 = vld [vmem:[#allocation2 + $0x1b8] sm:$0xff] }
  0xed   : > { %1069 = vmatmul.mubr.f32.gmra.mxu0 %v6327_v48  ;;  %1987 = vmatprep.subr.mxu1 %v6548_v8  ;;  %v1935_v48 = vld [vmem:[#allocation6 + $0x340] sm:$0xff]  ;;  %8591 = vst [vmem:[#allocation15_spill] sm:$0xff] %v6724_v20 }
  0xee   : > { %1073 = vmatprep.mubr.f32.mxu0 %v6315_v43  ;;  %5285 = vmatprep.subr.mxu0 %v772_v41  ;;  %v1934_v43 = vld [vmem:[#allocation6 + $0x338] sm:$0xff] }
  0xef   : > { %1479 = vmatmul.mubr.f32.gmra.mxu1 %v6229_v51  ;;  %5286 = vmatpush3.msra.mxu0 %v772_v41  ;;  %v6646_v51 = vld [vmem:[#allocation2 + $0xe0] sm:$0xff] }
  0xf0   : > { %1483 = vmatprep.mubr.f32.mxu1 %v6639_v21  ;;  %1988 = vmatpush1.msra.mxu1 %v1936_v2  ;;  %8578 = vst [vmem:[#allocation24_spill] sm:$0xff] %v6646_v51  ;;  %v1951_v41 = vld [vmem:[#allocation6 + $0x3c0] sm:$0xff]  ;;  %v1950_v2 = vld [vmem:[#allocation6 + $0x3b8] sm:$0xff] }
  0xf1   : > { %1074 = vmatmul.mubr.f32.gmra.mxu0 %v6635_v24  ;;  %1989 = vmatprep.subr.mxu1 %v6548_v8 }
  0xf2   : > { %1078 = vmatprep.mubr.f32.mxu0 %v6318_v45  ;;  %5287 = vmatprep.subr.mxu0 %v771_v37  ;;  %v1933_v45 = vld [vmem:[#allocation6 + $0x330] sm:$0xff] }
  0xf3   : > { %1484 = vmatmul.mubr.f32.gmra.mxu1 %v6567_v32  ;;  %5288 = vmatpush3.msra.mxu0 %v771_v37  ;;  %v770_v32 = vld [vmem:[#allocation6 + $0x110] sm:$0xff] }
  0xf4   : > { %1488 = vmatprep.mubr.f32.mxu1 %v6646_v51  ;;  %1990 = vmatpush1.msra.mxu1 %v1935_v48  ;;  %v6732_v37 = vld [vmem:[#allocation2 + $0x1d0] sm:$0xff] }
  0xf5   : > { %1079 = vmatmul.mubr.f32.gmra.mxu0 %v6356_v11  ;;  %1991 = vmatprep.subr.mxu1 %v6548_v8  ;;  %8592 = vst [vmem:[#allocation30_spill] sm:$0xff] %v6732_v37  ;;  %v1949_v48 = vld [vmem:[#allocation6 + $0x3b0] sm:$0xff] }
  0xf6   : > { %1083 = vmatprep.mubr.f32.mxu0 %v6332_v55  ;;  %1992 = vmatpush1.msra.mxu1 %v1934_v43  ;;  %v769_v55 = vld [vmem:[#allocation6 + $0x108] sm:$0xff]  ;;  %v6738_v43 = vld [vmem:[#allocation2 + $0x2d0] sm:$0xff] }
  0xf7   : > { %1489 = vmatmul.mubr.f32.gmra.mxu1 %v6250_v61  ;;  %1993 = vmatprep.subr.mxu1 %v6548_v8  ;;  %v6663_v61 = vld [vmem:[#allocation2 + $0x110] sm:$0xff] }
  0xf8   : > { %1493 = vmatprep.mubr.f32.mxu1 %v6655_v57  ;;  %1994 = vmatpush1.msra.mxu1 %v1933_v45  ;;  %8580 = vst [vmem:[#allocation26_spill] sm:$0xff] %v6663_v61  ;;  %v1947_v45 = vld [vmem:[#allocation6 + $0x3a0] sm:$0xff] }
  0xf9   : > { %1084 = vmatmul.mubr.f32.gmra.mxu0 %v6652_v30  ;;  %1995 = vmatprep.subr.mxu1 %v6548_v8 }
  0xfa   : > { %1088 = vmatprep.mubr.f32.mxu0 %v6335_v56  ;;  %5289 = vmatprep.subr.mxu0 %v770_v32  ;;  %v5746_v56 = vld [vmem:[#allocation2 + $0x108] sm:$0xff] }
  0xfb   : > { %1494 = vmatmul.mubr.f32.gmra.mxu1 %v6579_v33  ;;  %5290 = vmatpush3.msra.mxu0 %v770_v32  ;;  %v1928_v33 = vld [vmem:[#allocation6 + $0x308] sm:$0xff]  ;;  %v1945_v32 = vld [vmem:[#allocation6 + $0x390] sm:$0xff] }
  0xfc   : > { %1498 = vmatprep.mubr.f32.mxu1 %v6663_v61  ;;  %1996 = vmatpush1.msra.mxu1 %v1932_v29  ;;  %v874_v29 = vld [vmem:[#allocation2 + $0x300] sm:$0xff] }
  0xfd   : > { %1089 = vmatmul.mubr.f32.gmra.mxu0 %v6378_v28  ;;  %1997 = vmatprep.subr.mxu1 %v6548_v8 }
  0xfe   : > { %1093 = vmatprep.mubr.f32.mxu0 %v6350_v5  ;;  %5291 = vmatprep.subr.mxu0 %v769_v55  ;;  %v1929_v5 = vld [vmem:[#allocation6 + $0x310] sm:$0xff] }
  0xff   : > { %1499 = vmatmul.mubr.f32.gmra.mxu1 %v5746_v56  ;;  %5292 = vmatpush3.msra.mxu0 %v769_v55  ;;  %v1943_v55 = vld [vmem:[#allocation6 + $0x380] sm:$0xff]  ;;  %v6771_v56 = vld [vmem:[#allocation2 + $0x248] sm:$0xff] }
 0x100   : > { %1503 = vmatprep.mubr.f32.mxu1 %v6671_v62  ;;  %1998 = vmatpush1.msra.mxu1 %v1931_v54  ;;  %v648_v54 = vld [vmem:[#allocation2 + $0x40] sm:$0xff]  ;;  %8597 = vst [vmem:[#allocation35_spill] sm:$0xff] %v6771_v56 }
 0x101   : > { %1094 = vmatmul.mubr.f32.gmra.mxu0 %v6669_v31  ;;  %1999 = vmatprep.subr.mxu1 %v6548_v8 }
 0x102   : > { %1098 = vmatprep.mubr.f32.mxu0 %v6353_v7  ;;  %2000 = vmatpush1.msra.mxu1 %v1930_v1  ;;  %v5749_v7 = vld [vmem:[#allocation2 + $0x138] sm:$0xff]  ;;  %v1973_v1 = vld [vmem:[#allocation6 + $0x470] sm:$0xff] }
 0x103   : > { %1504 = vmatmul.mubr.f32.gmra.mxu1 %v6591_v3  ;;  %2001 = vmatprep.subr.mxu1 %v6548_v8  ;;  %v1958_v3 = vld [vmem:[#allocation6 + $0x3f8] sm:$0xff] }
 0x104   : > { %1508 = vmatprep.mubr.f32.mxu1 %v6678_v39  ;;  %2002 = vmatpush1.msra.mxu1 %v1929_v5  ;;  %v1972_v5 = vld [vmem:[#allocation6 + $0x468] sm:$0xff] }
 0x105   : > { %1099 = vmatmul.mubr.f32.gmra.mxu0 %v6400_v58  ;;  %2003 = vmatprep.subr.mxu1 %v6548_v8 }
 0x106   : > { %1103 = vmatprep.mubr.f32.mxu0 %v6372_v25  ;;  %5293 = vmatprep.subr.mxu0 %v768_v38  ;;  %v8584_v25 = vld [vmem:[#allocation13_spill] sm:$0xff] }
 0x107   : > { %1509 = vmatmul.mubr.f32.gmra.mxu1 %v5749_v7  ;;  %5294 = vmatpush3.msra.mxu0 %v768_v38  ;;  %8585 = vst [vmem:[#allocation13_spill] sm:$0xff] %v6697_v14  ;;  %v6779_v38 = vld [vmem:[#allocation2 + $0x260] sm:$0xff]  ;;  %v1970_v7 = vld [vmem:[#allocation6 + $0x458] sm:$0xff] }
 0x108   : > { %1513 = vmatprep.mubr.f32.mxu1 %v6687_v17  ;;  %2004 = vmatpush1.msra.mxu1 %v1928_v33  ;;  %8598 = vst [vmem:[#allocation36_spill] sm:$0xff] %v6779_v38  ;;  %v6783_v33 = vld [vmem:[#allocation2 + $0x88] sm:$0xff]  ;;  %v1854_v17 = vld [vmem:[#allocation2 + $0x120] sm:$0xff] }
 0x109   : > { %1104 = vmatmul.mubr.f32.gmra.mxu0 %v6684_v46  ;;  %2005 = vmatprep.subr.mxu1 %v6548_v8 }
 0x10a   : > { %1108 = vmatprep.mubr.f32.mxu0 %v8584_v25  ;;  %5343 = vmatprep.subr.mxu0 %v6690_v40  ;;  %v6793_v25 = vld [vmem:[#allocation2 + $0xb8] sm:$0xff] }
 0x10b   : > { %1514 = vmatmul.mubr.f32.gmra.mxu1 %v6602_v22  ;;  %v6707_v22 = vld [vmem:[#allocation2 + $0x188] sm:$0xff] }
 0x10c   : > { %1518 = vmatprep.mubr.f32.mxu1 %v6697_v14  ;;  %2006 = vmatpush1.msra.mxu1 %v1927_v49  ;;  %8587 = vst [vmem:[#allocation16_spill] sm:$0xff] %v6707_v22  ;;  %v1969_v49 = vld [vmem:[#allocation6 + $0x450] sm:$0xff] }
 0x10d   : > { %1109 = vmatmul.mubr.f32.gmra.mxu0 %v8586_v34  ;;  %2007 = vmatprep.subr.mxu1 %v6548_v8 }
 0x10e   : > { %1113 = vmatprep.mubr.f32.mxu0 %v6394_v53  ;;  %2008 = vmatpush2.msra.mxu1 %v1958_v3  ;;  %v6715_v53 = vld [vmem:[#allocation2 + $0x1a0] sm:$0xff]  ;;  %v1968_v3 = vld [vmem:[#allocation6 + $0x448] sm:$0xff] }
 0x10f   : > { %1519 = vmatmul.mubr.f32.gmra.mxu1 %v6307_v36  ;;  %2009 = vmatprep.subr.mxu1 %v6548_v8  ;;  %v1954_v36 = vld [vmem:[#allocation6 + $0x3d8] sm:$0xff]  ;;  %8589 = vst [vmem:[#allocation14_spill] sm:$0xff] %v6715_v53 }
 0x110   : > { %1523 = vmatprep.mubr.f32.mxu1 %v6707_v22  ;;  %2010 = vmatpush2.msra.mxu1 %v1957_v50  ;;  %v6798_v50 = vld [vmem:[#allocation2 + $0x290] sm:$0xff] }
 0x111   : > { %1114 = vmatmul.mubr.f32.gmra.mxu0 %v6703_v59  ;;  %2011 = vmatprep.subr.mxu1 %v6548_v8  ;;  %8600 = vst [vmem:[#allocation38_spill] sm:$0xff] %v6798_v50 }
 0x112   : > { %1118 = vmatprep.mubr.f32.mxu0 %v8588_v44  ;;  %2012 = vmatpush2.msra.mxu1 %v1956_v6  ;;  %v1967_v6 = vld [vmem:[#allocation6 + $0x440] sm:$0xff]  ;;  %v1966_v44 = vld [vmem:[#allocation6 + $0x438] sm:$0xff] }
 0x113   : > { %1524 = vmatmul.mubr.f32.gmra.mxu1 %v6619_v19  ;;  %2013 = vmatprep.subr.mxu1 %v6548_v8  ;;  %v1952_v19 = vld [vmem:[#allocation6 + $0x3c8] sm:$0xff] }
 0x114   : > { %1528 = vmatprep.mubr.f32.mxu1 %v6715_v53  ;;  %2014 = vmatpush2.msra.mxu1 %v1955_v4  ;;  %v6803_v4 = vld [vmem:[#allocation2 + $0xe8] sm:$0xff] }
 0x115   : > { %1119 = vmatmul.mubr.f32.gmra.mxu0 %v6482_v0  ;;  %2015 = vmatprep.subr.mxu1 %v6548_v8 }
 0x116   : > { %1123 = vmatprep.mubr.f32.mxu0 %v8590_v27  ;;  %2016 = vmatpush2.msra.mxu1 %v1954_v36  ;;  %v6808_v36 = vld [vmem:[#allocation2 + $0x2a8] sm:$0xff]  ;;  %v6813_v27 = vld [vmem:[#allocation2 + $0x118] sm:$0xff] }
 0x117   : > { %1529 = vmatmul.mubr.f32.gmra.mxu1 %v5754_v10  ;;  %2017 = vmatprep.subr.mxu1 %v6548_v8  ;;  %8601 = vst [vmem:[#allocation39_spill] sm:$0xff] %v6808_v36  ;;  %v1964_v10 = vld [vmem:[#allocation6 + $0x428] sm:$0xff] }
 0x118   : > { %1533 = vmatprep.mubr.f32.mxu1 %v6724_v20  ;;  %2018 = vmatpush2.msra.mxu1 %v1953_v16  ;;  %v1965_v16 = vld [vmem:[#allocation6 + $0x430] sm:$0xff]  ;;  %v1855_v20 = vld [vmem:[#allocation2 + $0x128] sm:$0xff] }
 0x119   : > { %1124 = vmatmul.mubr.f32.gmra.mxu0 %v6721_v42  ;;  %2019 = vmatprep.subr.mxu1 %v6548_v8 }
 0x11a   : > { %1128 = vmatprep.mubr.f32.mxu0 %v6418_v18  ;;  %2020 = vmatpush2.msra.mxu1 %v1952_v19  ;;  %v1948_v18 = vld [vmem:[#allocation6 + $0x3a8] sm:$0xff]  ;;  %v6818_v19 = vld [vmem:[#allocation2 + $0x2c0] sm:$0xff] }
 0x11b   : > { %1534 = vmatmul.mubr.f32.gmra.mxu1 %v6635_v24  ;;  %2021 = vmatprep.subr.mxu1 %v6548_v8  ;;  %v6742_v24 = vld [vmem:[#allocation2 + $0x1e8] sm:$0xff]  ;;  %8602 = vst [vmem:[#allocation40_spill] sm:$0xff] %v6818_v19 }
 0x11c   : > { %1538 = vmatprep.mubr.f32.mxu1 %v6732_v37  ;;  %2022 = vmatpush2.msra.mxu1 %v1951_v41  ;;  %8593 = vst [vmem:[#allocation31_spill] sm:$0xff] %v6742_v24  ;;  %v1963_v41 = vld [vmem:[#allocation6 + $0x420] sm:$0xff] }
 0x11d   : > { %1129 = vmatmul.mubr.f32.gmra.mxu0 %v6496_v63  ;;  %2023 = vmatprep.subr.mxu1 %v6548_v8 }
 0x11e   : > { %1133 = vmatprep.mubr.f32.mxu0 %v6430_v35  ;;  %2024 = vmatpush2.msra.mxu1 %v1950_v2  ;;  %v6750_v35 = vld [vmem:[#allocation2 + $0x200] sm:$0xff]  ;;  %v6823_v2 = vld [vmem:[#allocation2 + $0x148] sm:$0xff] }
 0x11f   : > { %1539 = vmatmul.mubr.f32.gmra.mxu1 %v6356_v11  ;;  %2025 = vmatprep.subr.mxu1 %v6548_v8  ;;  %v1946_v11 = vld [vmem:[#allocation6 + $0x398] sm:$0xff]  ;;  %8594 = vst [vmem:[#allocation32_spill] sm:$0xff] %v6750_v35 }
 0x120   : > { %1543 = vmatprep.mubr.f32.mxu1 %v6742_v24  ;;  %2026 = vmatpush2.msra.mxu1 %v1949_v48  ;;  %v1962_v48 = vld [vmem:[#allocation6 + $0x418] sm:$0xff]  ;;  %v1851_v24 = vld [vmem:[#allocation2 + $0x108] sm:$0xff] }
 0x121   : > { %1134 = vmatmul.mubr.f32.gmra.mxu0 %v6738_v43  ;;  %2027 = vmatprep.subr.mxu1 %v6548_v8 }
 0x122   : > { %1138 = vmatprep.mubr.f32.mxu0 %v6437_v52  ;;  %2028 = vmatpush2.msra.mxu1 %v1948_v18  ;;  %v1944_v52 = vld [vmem:[#allocation6 + $0x388] sm:$0xff] }
 0x123   : > { %1544 = vmatmul.mubr.f32.gmra.mxu1 %v6652_v30  ;;  %2029 = vmatprep.subr.mxu1 %v6548_v8  ;;  %v6758_v30 = vld [vmem:[#allocation2 + $0x218] sm:$0xff] }
 0x124   : > { %1548 = vmatprep.mubr.f32.mxu1 %v6750_v35  ;;  %2030 = vmatpush2.msra.mxu1 %v1947_v45  ;;  %8595 = vst [vmem:[#allocation33_spill] sm:$0xff] %v6758_v30  ;;  %v6830_v45 = vld [vmem:[#allocation2 + $0x2d8] sm:$0xff] }
 0x125   : > { %1139 = vmatmul.mubr.f32.gmra.mxu0 %v6510_v47  ;;  %2031 = vmatprep.subr.mxu1 %v6548_v8  ;;  %8603 = vst [vmem:[#allocation41_spill] sm:$0xff] %v6830_v45 }
 0x126   : > { %1143 = vmatprep.mubr.f32.mxu0 %v6451_v26  ;;  %2032 = vmatpush2.msra.mxu1 %v1946_v11  ;;  %v1961_v11 = vld [vmem:[#allocation6 + $0x410] sm:$0xff]  ;;  %v6889_v26 = vld [vmem:[#allocation2 + $0x268] sm:$0xff] }
 0x127   : > { %1549 = vmatmul.mubr.f32.gmra.mxu1 %v6378_v28  ;;  %2033 = vmatprep.subr.mxu1 %v6548_v8  ;;  %v6765_v28 = vld [vmem:[#allocation2 + $0x230] sm:$0xff] }
 0x128   : > { %1553 = vmatprep.mubr.f32.mxu1 %v6758_v30  ;;  %2034 = vmatpush2.msra.mxu1 %v1945_v32  ;;  %8596 = vst [vmem:[#allocation34_spill] sm:$0xff] %v6765_v28  ;;  %v6915_v30 = vld [vmem:[#allocation2 + $0x2f8] sm:$0xff] }
 0x129   : > { %1144 = vmatmul.mubr.f32.gmra.mxu0 %v874_v29  ;;  %2035 = vmatprep.subr.mxu1 %v6548_v8  ;;  %v6837_v29 = vld [vmem:[#allocation2 + $0x178] sm:$0xff] }
 0x12a   : > { %1148 = vmatprep.mubr.f32.mxu0 %v6458_v13  ;;  %2036 = vmatpush2.msra.mxu1 %v1944_v52  ;;  %v6840_v52 = vld [vmem:[#allocation2 + $0x190] sm:$0xff] }
 0x12b   : > { %1554 = vmatmul.mubr.f32.gmra.mxu1 %v6669_v31  ;;  %2037 = vmatprep.subr.mxu1 %v6548_v8  ;;  %v651_v31 = vld [vmem:[#allocation2 + $0x58] sm:$0xff] }
 0x12c   : > { %1558 = vmatprep.mubr.f32.mxu1 %v6765_v28  ;;  %2038 = vmatpush2.msra.mxu1 %v1943_v55  ;;  %v6842_v55 = vld [vmem:[#allocation2 + $0x2f0] sm:$0xff]  ;;  %v6911_v28 = vld [vmem:[#allocation2 + $0x2e0] sm:$0xff] }
 0x12d   : > { %1149 = vmatmul.mubr.f32.gmra.mxu0 %v6527_v12  ;;  %v6777_v12 = vld [vmem:[#allocation2 + $0x70] sm:$0xff]  ;;  %8604 = vst [vmem:[#allocation42_spill] sm:$0xff] %v6842_v55 }
 0x12e   : > { %5295 = vmatprep.mubr.f32.mxu0 %v6548_v8 }
 0x12f   : > { %1559 = vmatmul.mubr.f32.gmra.mxu1 %v6400_v58  ;;  %v1971_v58 = vld [vmem:[#allocation6 + $0x460] sm:$0xff] }
 0x130   : > { %1563 = vmatprep.mubr.f32.mxu1 %v6771_v56 }
 0x131   : > { %5296 = vmatmul.mubr.f32.vlgmr.msra.gmra.mxu0 %v6548_v8 }
 0x132   : > { %5344 = vmatpush3.msra.mxu0 %v6690_v40  ;;  %5298 = vmatprep.mubr.f32.mxu0 %v648_v54  ;;  %v6788_v40 = vld [vmem:[#allocation2 + $0x278] sm:$0xff] }
 0x133   : > { %1564 = vmatmul.mubr.f32.gmra.mxu1 %v6684_v46  ;;  %5345 = vmatprep.subr.mxu0 %v1973_v1  ;;  %v6786_v46 = vld [vmem:[#allocation2 + $0xa0] sm:$0xff]  ;;  %8599 = vst [vmem:[#allocation37_spill] sm:$0xff] %v6788_v40 }
 0x134   : > { %1568 = vmatprep.mubr.f32.mxu1 %v6779_v38  ;;  %5346 = vmatpush3.msra.mxu0 %v1973_v1  ;;  %v1959_v1 = vld [vmem:[#allocation6 + $0x400] sm:$0xff]  ;;  %v6907_v38 = vld [vmem:[#allocation2 + $0x2c8] sm:$0xff] }
 0x135   : > { %5299 = vmatmul.mubr.f32.gmra.mxu0 %v651_v31  ;;  %5347 = vmatprep.subr.mxu0 %v1972_v5  ;;  %v1831_v31 = vld [vmem:[#allocation2 + $0x68] sm:$0xff] }
 0x136   : > { %5301 = vmatprep.mubr.f32.mxu0 %v6777_v12  ;;  %5348 = vmatpush3.msra.mxu0 %v1972_v5  ;;  %v6849_v5 = vld [vmem:[#allocation2 + $0x1a8] sm:$0xff] }
 0x137   : > { %1569 = vmatmul.mubr.f32.gmra.mxu1 %v8586_v34  ;;  %5349 = vmatprep.subr.mxu0 %v1971_v58  ;;  %v6796_v34 = vld [vmem:[#allocation2 + $0xd0] sm:$0xff] }
 0x138   : > { %1573 = vmatprep.mubr.f32.mxu1 %v6788_v40  ;;  %5350 = vmatpush3.msra.mxu0 %v1971_v58  ;;  %v6854_v58 = vld [vmem:[#allocation2 + $0x1c0] sm:$0xff] }
 0x139   : > { %5302 = vmatmul.mubr.f32.gmra.mxu0 %v6783_v33  ;;  %5351 = vmatprep.subr.mxu0 %v1970_v7  ;;  %v6828_v18 = vpop.f32.mrf.mxu1 }
 0x13a   : > { %5304 = vmatprep.mubr.f32.mxu0 %v6786_v46  ;;  %5352 = vmatpush3.msra.mxu0 %v1970_v7  ;;  %v1830_v7 = vld [vmem:[#allocation2 + $0x60] sm:$0xff] }
 0x13b   : > { %1574 = vmatmul.mubr.f32.gmra.mxu1 %v6703_v59  ;;  %5353 = vmatprep.subr.mxu0 %v1969_v49  ;;  %v6806_v59 = vld [vmem:[#allocation2 + $0x100] sm:$0xff]  ;;  %v6834_v32 = vpop.f32.mrf.mxu1 }
 0x13c   : > { %1578 = vmatprep.mubr.f32.mxu1 %v6798_v50  ;;  %5354 = vmatpush3.msra.mxu0 %v1969_v49  ;;  %v1834_v49 = vld [vmem:[#allocation2 + $0x80] sm:$0xff]  ;;  %v6901_v50 = vld [vmem:[#allocation2 + $0x2b0] sm:$0xff] }
 0x13d   : > { %5305 = vmatmul.mubr.f32.gmra.mxu0 %v6793_v25  ;;  %5355 = vmatprep.subr.mxu0 %v1968_v3 }
 0x13e   : > { %5307 = vmatprep.mubr.f32.mxu0 %v6796_v34  ;;  %5356 = vmatpush3.msra.mxu0 %v1968_v3 }
 0x13f   : > { %1579 = vmatmul.mubr.f32.gmra.mxu1 %v6482_v0  ;;  %5357 = vmatprep.subr.mxu0 %v1967_v6  ;;  %v6816_v0 = vld [vmem:[#allocation2 + $0x130] sm:$0xff] }
 0x140   : > { %1583 = vmatprep.mubr.f32.mxu1 %v6808_v36  ;;  %5358 = vmatpush3.msra.mxu0 %v1967_v6  ;;  %v6861_v6 = vld [vmem:[#allocation2 + $0x1d8] sm:$0xff] }
 0x141   : > { %5308 = vmatmul.mubr.f32.gmra.mxu0 %v6803_v4  ;;  %5359 = vmatprep.subr.mxu0 %v1966_v44 }
 0x142   : > { %5310 = vmatprep.mubr.f32.mxu0 %v6806_v59  ;;  %5360 = vmatpush3.msra.mxu0 %v1966_v44  ;;  %v6845_v54 = vpop.f32.mrf.mxu1  ;;  %v6863_v44 = vld [vmem:[#allocation2 + $0x1f0] sm:$0xff] }
 0x143   : > { %1584 = vmatmul.mubr.f32.gmra.mxu1 %v6721_v42  ;;  %5361 = vmatprep.subr.mxu0 %v1965_v16  ;;  %v6826_v42 = vld [vmem:[#allocation2 + $0x160] sm:$0xff] }
 0x144   : > { %1588 = vmatprep.mubr.f32.mxu1 %v6818_v19  ;;  %5362 = vmatpush3.msra.mxu0 %v1965_v16  ;;  %v1833_v16 = vld [vmem:[#allocation2 + $0x78] sm:$0xff] }
 0x145   : > { %5311 = vmatmul.mubr.f32.gmra.mxu0 %v6813_v27  ;;  %5363 = vmatprep.subr.mxu0 %v1964_v10  ;;  %v6897_v19 = vld [vmem:[#allocation2 + $0x298] sm:$0xff] }
 0x146   : > { %5313 = vmatprep.mubr.f32.mxu0 %v6816_v0  ;;  %5364 = vmatpush3.msra.mxu0 %v1964_v10  ;;  %v1837_v10 = vld [vmem:[#allocation2 + $0x98] sm:$0xff] }
 0x147   : > { %1589 = vmatmul.mubr.f32.gmra.mxu1 %v6496_v63  ;;  %5365 = vmatprep.subr.mxu0 %v1963_v41  ;;  %v1960_v63 = vld [vmem:[#allocation6 + $0x408] sm:$0xff] }
 0x148   : > { %1593 = vmatprep.mubr.f32.mxu1 %v6830_v45  ;;  %5366 = vmatpush3.msra.mxu0 %v1963_v41  ;;  %v6869_v41 = vld [vmem:[#allocation2 + $0x208] sm:$0xff] }
 0x149   : > { %5314 = vmatmul.mubr.f32.gmra.mxu0 %v6823_v2  ;;  %5367 = vmatprep.subr.mxu0 %v1962_v48 }
 0x14a   : > { %5316 = vmatprep.mubr.f32.mxu0 %v6826_v42  ;;  %5368 = vmatpush3.msra.mxu0 %v1962_v48 }
 0x14b   : > { %1594 = vmatmul.mubr.f32.gmra.mxu1 %v6738_v43  ;;  %5369 = vmatprep.subr.mxu0 %v1961_v11  ;;  %v6851_v43 = vpop.f32.mrf.mxu1 }
 0x14c   : > { %1598 = vmatprep.mubr.f32.mxu1 %v6842_v55  ;;  %5370 = vmatpush3.msra.mxu0 %v1961_v11  ;;  %v1836_v11 = vld [vmem:[#allocation2 + $0x90] sm:$0xff]  ;;  %v6891_v55 = vld [vmem:[#allocation2 + $0x280] sm:$0xff] }
 0x14d   : > { %5317 = vmatmul.mubr.f32.gmra.mxu0 %v6837_v29  ;;  %5371 = vmatprep.subr.mxu0 %v1960_v63  ;;  %v6857_v3 = vpop.f32.mrf.mxu1 }
 0x14e   : > { %5319 = vmatprep.mubr.f32.mxu0 %v6840_v52  ;;  %5372 = vmatpush3.msra.mxu0 %v1960_v63 }
 0x14f   : > { %1599 = vmatmul.mubr.f32.gmra.mxu1 %v6510_v47  ;;  %5373 = vmatprep.subr.mxu0 %v1959_v1  ;;  %v6865_v47 = vpop.f32.mrf.mxu1 }
 0x150   : > { %2039 = vmatprep.mubr.f32.mxu1 %v1831_v31  ;;  %5374 = vmatpush3.msra.mxu0 %v1959_v1  ;;  %v1840_v1 = vld [vmem:[#allocation2 + $0xb0] sm:$0xff]  ;;  %v6879_v31 = vld [vmem:[#allocation2 + $0x238] sm:$0xff] }
 0x151   : > { %5320 = vmatmul.mubr.f32.gmra.mxu0 %v6849_v5  ;;  %3105 = vmatprep.subr.mxu0 %v6548_v8  ;;  %v6873_v8 = vld [vmem:[#allocation2 + $0x220] sm:$0xff] }
 0x152   : > { %5322 = vmatprep.mubr.f32.mxu0 %v6854_v58 }
 0x153   : > { %2040 = vmatmul.mubr.f32.vlgmr.msra.gmra.mxu1 %v1830_v7  ;;  %v6881_v7 = vld [vmem:[#allocation2 + $0x250] sm:$0xff] }
 0x154   : > { %2044 = vmatprep.mubr.f32.mxu1 %v1834_v49 }
 0x155   : > { %5323 = vmatmul.mubr.f32.gmra.mxu0 %v6861_v6 }
 0x156   : > { %5325 = vmatprep.mubr.f32.mxu0 %v6863_v44  ;;  %v6871_v48 = vpop.f32.mrf.mxu1 }
 0x157   : > { %2045 = vmatmul.mubr.f32.gmra.mxu1 %v1833_v16  ;;  %v1839_v16 = vld [vmem:[#allocation2 + $0xa8] sm:$0xff] }
 0x158   : > { %2049 = vmatprep.mubr.f32.mxu1 %v1837_v10  ;;  %v6875_v63 = vpop.f32.mrf.mxu1  ;;  %v1843_v10 = vld [vmem:[#allocation2 + $0xc8] sm:$0xff] }
 0x159   : > { %5326 = vmatmul.mubr.f32.gmra.mxu0 %v6869_v41 }
 0x15a   : > { %5328 = vmatprep.mubr.f32.mxu0 %v6873_v8 }
 0x15b   : > { %2050 = vmatmul.mubr.f32.gmra.mxu1 %v1836_v11  ;;  %v6883_v49 = vpop.f32.mrf.mxu1  ;;  %v1842_v11 = vld [vmem:[#allocation2 + $0xc0] sm:$0xff] }
 0x15c   : > { %2054 = vmatprep.mubr.f32.mxu1 %v1840_v1  ;;  %v1846_v1 = vld [vmem:[#allocation2 + $0xe0] sm:$0xff] }
 0x15d   : > { %5329 = vmatmul.mubr.f32.gmra.mxu0 %v6879_v31  ;;  %v6886_v13 = vpop.f32.mrf.mxu1 }
 0x15e   : > { %5331 = vmatprep.mubr.f32.mxu0 %v6881_v7 }
 0x15f   : > { %2055 = vmatmul.mubr.f32.gmra.mxu1 %v1839_v16  ;;  %v1845_v16 = vld [vmem:[#allocation2 + $0xd8] sm:$0xff] }
 0x160   : > { %2059 = vmatprep.mubr.f32.mxu1 %v1843_v10  ;;  %v6893_v45 = vpop.f32.mrf.mxu1  ;;  %v1849_v10 = vld [vmem:[#allocation2 + $0xf8] sm:$0xff] }
 0x161   : > { %5332 = vmatmul.mubr.f32.gmra.mxu0 %v6889_v26 }
 0x162   : > { %5334 = vmatprep.mubr.f32.mxu0 %v6891_v55  ;;  %v6899_v36 = vpop.f32.mrf.mxu1 }
 0x163   : > { %2060 = vmatmul.mubr.f32.gmra.mxu1 %v1842_v11  ;;  %v1848_v11 = vld [vmem:[#allocation2 + $0xf0] sm:$0xff] }
 0x164   : > { %2064 = vmatprep.mubr.f32.mxu1 %v1846_v1  ;;  %v1852_v1 = vld [vmem:[#allocation2 + $0x110] sm:$0xff] }
 0x165   : > { %5335 = vmatmul.mubr.f32.gmra.mxu0 %v6897_v19  ;;  %v6904_v40 = vpop.f32.mrf.mxu1 }
 0x166   : > { %5337 = vmatprep.mubr.f32.mxu0 %v6901_v50 }
 0x167   : > { %2065 = vmatmul.mubr.f32.gmra.mxu1 %v1845_v16  ;;  %v6909_v56 = vpop.f32.mrf.mxu1 }
 0x168   : > { %2069 = vmatprep.mubr.f32.mxu1 %v1849_v10 }
 0x169   : > { %5338 = vmatmul.mubr.f32.gmra.mxu0 %v6907_v38 }
 0x16a   : > { %5340 = vmatprep.mubr.f32.mxu0 %v6911_v28  ;;  %v6917_v35 = vpop.f32.mrf.mxu1 }
 0x16b   : > { %2070 = vmatmul.mubr.f32.gmra.mxu1 %v1848_v11 }
 0x16c   : > { %2074 = vmatprep.mubr.f32.mxu1 %v1852_v1  ;;  %v6919_v37 = vpop.f32.mrf.mxu1  ;;  %v1858_v1 = vld [vmem:[#allocation2 + $0x140] sm:$0xff] }
 0x16d   : > { %5341 = vmatmul.mubr.f32.gmra.mxu0 %v6915_v30  ;;  %v995_v16 = vpop.f32.mrf.mxu0 }
 0x16e   : > { %5375 = vmatprep.mubr.f32.mxu0 %v6777_v12  ;;  %v6924_v10 = vadd.f32 %v6834_v32, %v995_v16 }
 0x16f   : > { %2075 = vmatmul.mubr.f32.gmra.mxu1 %v1851_v24  ;;  %v6926_v22 = vpop.f32.mrf.mxu1  ;;  %v997_v53 = vpop.f32.mrf.mxu0  ;;  %v1857_v24 = vld [vmem:[#allocation2 + $0x138] sm:$0xff] }
 0x170   : > { %2079 = vmatprep.mubr.f32.mxu1 %v1855_v20  ;;  %v1861_v53 = vld [vmem:[#allocation2 + $0x158] sm:$0xff] }
 0x171   : > { %5376 = vmatmul.mubr.f32.vlgmr.msra.gmra.mxu0 %v6783_v33  ;;  %v6929_v11 = vpop.f32.mrf.mxu1 }
 0x172   : > { %5378 = vmatprep.mubr.f32.mxu0 %v6786_v46  ;;  %v1000_v14 = vpop.f32.mrf.mxu0 }
 0x173   : > { %2080 = vmatmul.mubr.f32.gmra.mxu1 %v1854_v17  ;;  %v6933_v12 = vadd.f32 %v6828_v18, %v1000_v14  ;;  %v1860_v14 = vld [vmem:[#allocation2 + $0x150] sm:$0xff] }
 0x174   : > { %2084 = vmatprep.mubr.f32.mxu1 %v1858_v1  ;;  %v6935_v32 = vpop.f32.mrf.mxu1  ;;  %v1002_v16 = vpop.f32.mrf.mxu0  ;;  %v1864_v1 = vld [vmem:[#allocation2 + $0x170] sm:$0xff] }
 0x175   : > { %5379 = vmatmul.mubr.f32.gmra.mxu0 %v6793_v25 }
 0x176   : > { %v6938_v20 = vpop.f32.mrf.mxu1  ;;  %5381 = vmatprep.mubr.f32.mxu0 %v6796_v34  ;;  %v1005_v33 = vpop.f32.mrf.mxu0 }
 0x177   : > { %2085 = vmatmul.mubr.f32.gmra.mxu1 %v1857_v24  ;;  %v6942_v46 = vadd.f32 %v6851_v43, %v1005_v33  ;;  %v1863_v43 = vld [vmem:[#allocation2 + $0x168] sm:$0xff] }
 0x178   : > { %2089 = vmatprep.mubr.f32.mxu1 %v1861_v53  ;;  %v6944_v17 = vpop.f32.mrf.mxu1  ;;  %v1007_v18 = vpop.f32.mrf.mxu0  ;;  %v1867_v33 = vld [vmem:[#allocation2 + $0x188] sm:$0xff] }
 0x179   : > { %5382 = vmatmul.mubr.f32.gmra.mxu0 %v6803_v4 }
 0x17a   : > { %v6947_v16 = vpop.f32.mrf.mxu1  ;;  %5384 = vmatprep.mubr.f32.mxu0 %v6806_v59 }
 0x17b   : > { %2090 = vmatmul.mubr.f32.gmra.mxu1 %v1860_v14  ;;  %v1010_v25 = vpop.f32.mrf.mxu0 }
 0x17c   : > { %v6951_v34 = vadd.f32 %v6845_v54, %v1010_v25  ;;  %2094 = vmatprep.mubr.f32.mxu1 %v1864_v1  ;;  %v1866_v54 = vld [vmem:[#allocation2 + $0x180] sm:$0xff] }
 0x17d   : > { %5385 = vmatmul.mubr.f32.gmra.mxu0 %v6813_v27  ;;  %v6954_v24 = vpop.f32.mrf.mxu1  ;;  %v1012_v53 = vpop.f32.mrf.mxu0  ;;  %v1870_v1 = vld [vmem:[#allocation2 + $0x1a0] sm:$0xff] }
 0x17e   : > { %5387 = vmatprep.mubr.f32.mxu0 %v6816_v0 }
 0x17f   : > { %2095 = vmatmul.mubr.f32.gmra.mxu1 %v1863_v43  ;;  %v6957_v4 = vpop.f32.mrf.mxu1  ;;  %v1015_v18 = vpop.f32.mrf.mxu0  ;;  %v1869_v43 = vld [vmem:[#allocation2 + $0x198] sm:$0xff] }
 0x180   : > { %v6960_v59 = vadd.f32 %v6865_v47, %v1015_v18  ;;  %2099 = vmatprep.mubr.f32.mxu1 %v1867_v33  ;;  %v1873_v47 = vld [vmem:[#allocation2 + $0x1b8] sm:$0xff] }
 0x181   : > { %5388 = vmatmul.mubr.f32.gmra.mxu0 %v6823_v2  ;;  %v6963_v14 = vpop.f32.mrf.mxu1  ;;  %v1017_v27 = vpop.f32.mrf.mxu0  ;;  %v3104_v33 = vld [vmem:[#allocation8 + $0x2f8] sm:$0xff] }
 0x182   : > { %5390 = vmatprep.mubr.f32.mxu0 %v6826_v42  ;;  %5423 = vmatprep.subr.mxu1 %v3104_v33  ;;  %v3072_v42 = vld [vmem:[#allocation8 + $0x1f8] sm:$0xff] }
 0x183   : > { %2100 = vmatmul.mubr.f32.gmra.mxu1 %v1866_v54  ;;  %v6966_v25 = vpop.f32.mrf.mxu1  ;;  %3106 = vmatpush1.msra.mxu0 %v3072_v42 }
 0x184   : > { %v1020_v0 = vpop.f32.mrf.mxu0  ;;  %2104 = vmatprep.mubr.f32.mxu1 %v1870_v1  ;;  %v1872_v1 = vld [vmem:[#allocation2 + $0x1b0] sm:$0xff]  ;;  %5424 = vmatpush3.msra.mxu1 %v3104_v33  ;;  %v1879_v33 = vld [vmem:[#allocation2 + $0x1e8] sm:$0xff] }
 0x185   : > { %v6969_v53 = vadd.f32 %v6857_v3, %v1020_v0  ;;  %5391 = vmatmul.mubr.f32.gmra.mxu0 %v6837_v29  ;;  %v1876_v29 = vld [vmem:[#allocation2 + $0x1d0] sm:$0xff] }
 0x186   : > { %v6972_v2 = vpop.f32.mrf.mxu1  ;;  %v1022_v18 = vpop.f32.mrf.mxu0  ;;  %5393 = vmatprep.mubr.f32.mxu0 %v6840_v52  ;;  %v3071_v0 = vld [vmem:[#allocation8 + $0x1f0] sm:$0xff]  ;;  %v6984_v52 = vld [vmem:[#allocation2] sm:$0xff] }
 0x187   : > { %2105 = vmatmul.mubr.f32.gmra.mxu1 %v1869_v43  ;;  %3107 = vmatprep.subr.mxu0 %v6984_v52  ;;  %v3070_v43 = vld [vmem:[#allocation8 + $0x1e8] sm:$0xff] }
 0x188   : > { %v6975_v54 = vpop.f32.mrf.mxu1  ;;  %v1025_v27 = vpop.f32.mrf.mxu0  ;;  %2109 = vmatprep.mubr.f32.mxu1 %v1873_v47  ;;  %3108 = vmatpush1.msra.mxu0 %v3071_v0  ;;  %v1878_v0 = vld [vmem:[#allocation2 + $0x1e0] sm:$0xff] }
 0x189   : > { %v6978_v3 = vadd.f32 %v6875_v63, %v1025_v27  ;;  %5394 = vmatmul.mubr.f32.gmra.mxu0 %v6849_v5  ;;  %v1875_v63 = vld [vmem:[#allocation2 + $0x1c8] sm:$0xff]  ;;  %3109 = vmatprep.subr.mxu0 %v6984_v52  ;;  %v3103_v27 = vld [vmem:[#allocation8 + $0x2f0] sm:$0xff] }
 0x18a   : > { %v6981_v62 = vpop.f32.mrf.mxu1  ;;  %v1027_v18 = vpop.f32.mrf.mxu0  ;;  %5396 = vmatprep.mubr.f32.mxu0 %v6854_v58  ;;  %3110 = vmatpush1.msra.mxu0 %v3070_v43 }
 0x18b   : > { %2110 = vmatmul.mubr.f32.gmra.mxu1 %v1872_v1  ;;  %3111 = vmatprep.subr.mxu0 %v6984_v52 }
 0x18c   : > { %v6987_v47 = vpop.f32.mrf.mxu1  ;;  %2114 = vmatprep.mubr.f32.mxu1 %v1876_v29  ;;  %v3069_v29 = vld [vmem:[#allocation8 + $0x1e0] sm:$0xff]  ;;  %5425 = vmatprep.subr.mxu1 %v3103_v27 }
 0x18d   : > { %v1030_v5 = vpop.f32.mrf.mxu0  ;;  %5397 = vmatmul.mubr.f32.gmra.mxu0 %v6861_v6  ;;  %5426 = vmatpush3.msra.mxu1 %v3103_v27 }
 0x18e   : > { %v6992_v58 = vadd.f32 %v6871_v48, %v1030_v5  ;;  %5399 = vmatprep.mubr.f32.mxu0 %v6863_v44  ;;  %v1882_v48 = vld [vmem:[#allocation2 + $0x200] sm:$0xff]  ;;  %v3068_v5 = vld [vmem:[#allocation8 + $0x1d8] sm:$0xff]  ;;  %3112 = vmatpush1.msra.mxu0 %v3069_v29 }
 0x18f   : > { %v6995_v42 = vpop.f32.mrf.mxu1  ;;  %2115 = vmatmul.mubr.f32.gmra.mxu1 %v1875_v63  ;;  %v1032_v1 = vpop.f32.mrf.mxu0  ;;  %3113 = vmatprep.subr.mxu0 %v6984_v52 }
 0x190   : > { %2119 = vmatprep.mubr.f32.mxu1 %v1879_v33  ;;  %v3067_v33 = vld [vmem:[#allocation8 + $0x1d0] sm:$0xff]  ;;  %3114 = vmatpush1.msra.mxu0 %v3068_v5  ;;  %v3065_v5 = vld [vmem:[#allocation8 + $0x1c0] sm:$0xff] }
 0x191   : > { %v6998_v6 = vpop.f32.mrf.mxu1  ;;  %v1035_v18 = vpop.f32.mrf.mxu0  ;;  %5400 = vmatmul.mubr.f32.gmra.mxu0 %v6869_v41  ;;  %v1881_v41 = vld [vmem:[#allocation2 + $0x1f8] sm:$0xff]  ;;  %3115 = vmatprep.subr.mxu0 %v6984_v52 }
 0x192   : > { %v7002_v44 = vadd.f32 %v6886_v13, %v1035_v18  ;;  %5402 = vmatprep.mubr.f32.mxu0 %v6873_v8  ;;  %v1885_v13 = vld [vmem:[#allocation2 + $0x218] sm:$0xff]  ;;  %v3066_v8 = vld [vmem:[#allocation8 + $0x1c8] sm:$0xff]  ;;  %3116 = vmatpush1.msra.mxu0 %v3067_v33 }
 0x193   : > { %v1445_v43 = vpop.f32.mrf.mxu1  ;;  %2120 = vmatmul.mubr.f32.gmra.mxu1 %v1878_v0  ;;  %v1037_v63 = vpop.f32.mrf.mxu0  ;;  %3117 = vmatprep.subr.mxu0 %v6984_v52  ;;  %v3102_v18 = vld [vmem:[#allocation8 + $0x2e8] sm:$0xff]  ;;  %v3064_v33 = vld [vmem:[#allocation8 + $0x1b8] sm:$0xff] }
 0x194   : > { %v7007_v1 = vadd.f32 %v1445_v43, %v6924_v10  ;;  %2124 = vmatprep.mubr.f32.mxu1 %v1882_v48  ;;  %3118 = vmatpush1.msra.mxu0 %v3066_v8  ;;  %v1891_v8 = vld [vmem:[#allocation2 + $0x248] sm:$0xff] }
 0x195   : > { %v1447_v27 = vpop.f32.mrf.mxu1  ;;  %v1040_v39 = vpop.f32.mrf.mxu0  ;;  %5403 = vmatmul.mubr.f32.gmra.mxu0 %v6879_v31  ;;  %v1884_v31 = vld [vmem:[#allocation2 + $0x210] sm:$0xff]  ;;  %3119 = vmatprep.subr.mxu0 %v6984_v52 }
 0x196   : > { %v7012_v29 = vadd.f32 %v6883_v49, %v1040_v39  ;;  %5405 = vmatprep.mubr.f32.mxu0 %v6881_v7  ;;  %v1888_v39 = vld [vmem:[#allocation2 + $0x230] sm:$0xff]  ;;  %5427 = vmatprep.subr.mxu1 %v3102_v18  ;;  %v1887_v27 = vld [vmem:[#allocation2 + $0x228] sm:$0xff] }
 0x197   : > { %v1450_v0 = vpop.f32.mrf.mxu1  ;;  %2125 = vmatmul.mubr.f32.gmra.mxu1 %v1881_v41  ;;  %v1042_v10 = vpop.f32.mrf.mxu0  ;;  %3120 = vmatpush1.msra.mxu0 %v3065_v5 }
 0x198   : > { %v7017_v48 = vadd.f32 %v1450_v0, %v6933_v12  ;;  %2129 = vmatprep.mubr.f32.mxu1 %v1885_v13  ;;  %5428 = vmatpush3.msra.mxu1 %v3102_v18  ;;  %v3062_v10 = vld [vmem:[#allocation8 + $0x1a8] sm:$0xff] }
 0x199   : > { %v1452_v43 = vpop.f32.mrf.mxu1  ;;  %v1045_v63 = vpop.f32.mrf.mxu0  ;;  %5406 = vmatmul.mubr.f32.gmra.mxu0 %v6889_v26  ;;  %3121 = vmatprep.subr.mxu0 %v6984_v52 }
 0x19a   : > { %v7022_v7 = vadd.f32 %v6899_v36, %v1045_v63  ;;  %5408 = vmatprep.mubr.f32.mxu0 %v6891_v55  ;;  %v3063_v36 = vld [vmem:[#allocation8 + $0x1b0] sm:$0xff]  ;;  %3122 = vmatpush1.msra.mxu0 %v3064_v33  ;;  %v1894_v43 = vld [vmem:[#allocation2 + $0x260] sm:$0xff] }
 0x19b   : > { %v1455_v49 = vpop.f32.mrf.mxu1  ;;  %2130 = vmatmul.mubr.f32.gmra.mxu1 %v1884_v31  ;;  %v1047_v12 = vpop.f32.mrf.mxu0  ;;  %3123 = vmatprep.subr.mxu0 %v6984_v52 }
 0x19c   : > { %v7026_v41 = vadd.f32 %v1455_v49, %v6942_v46  ;;  %2134 = vmatprep.mubr.f32.mxu1 %v1888_v39  ;;  %3124 = vmatpush1.msra.mxu0 %v3063_v36  ;;  %v1916_v39 = vld [vmem:[#allocation2 + $0x310] sm:$0xff]  ;;  %v3061_v49 = vld [vmem:[#allocation8 + $0x1a0] sm:$0xff] }
 0x19d   : > { %v1457_v26 = vpop.f32.mrf.mxu1  ;;  %v1050_v13 = vpop.f32.mrf.mxu0  ;;  %5409 = vmatmul.mubr.f32.gmra.mxu0 %v6897_v19  ;;  %v1890_v19 = vld [vmem:[#allocation2 + $0x240] sm:$0xff]  ;;  %3125 = vmatprep.subr.mxu0 %v6984_v52  ;;  %v3059_v36 = vld [vmem:[#allocation8 + $0x190] sm:$0xff] }
 0x19e   : > { %v7031_v55 = vadd.f32 %v6893_v45, %v1050_v13  ;;  %5411 = vmatprep.mubr.f32.mxu0 %v6901_v50  ;;  %v3101_v50 = vld [vmem:[#allocation8 + $0x2e0] sm:$0xff]  ;;  %3126 = vmatpush1.msra.mxu0 %v3062_v10  ;;  %v1919_v13 = vld [vmem:[#allocation2 + $0x328] sm:$0xff] }
 0x19f   : > { %v1460_v0 = vpop.f32.mrf.mxu1  ;;  %2135 = vmatmul.mubr.f32.gmra.mxu1 %v1887_v27  ;;  %v1052_v46 = vpop.f32.mrf.mxu0  ;;  %3127 = vmatprep.subr.mxu0 %v6984_v52 }
 0x1a0   : > { %v7036_v18 = vadd.f32 %v1460_v0, %v6951_v34  ;;  %2139 = vmatprep.mubr.f32.mxu1 %v1891_v8  ;;  %5429 = vmatprep.subr.mxu1 %v3101_v50  ;;  %v1896_v46 = vld [vmem:[#allocation2 + $0x270] sm:$0xff] }
 0x1a1   : > { %v1462_v31 = vpop.f32.mrf.mxu1  ;;  %v1055_v5 = vpop.f32.mrf.mxu0  ;;  %5412 = vmatmul.mubr.f32.gmra.mxu0 %v6907_v38  ;;  %v1893_v38 = vld [vmem:[#allocation2 + $0x258] sm:$0xff]  ;;  %5430 = vmatpush3.msra.mxu1 %v3101_v50  ;;  %v3057_v50 = vld [vmem:[#allocation8 + $0x180] sm:$0xff] }
 0x1a2   : > { %v7041_v45 = vadd.f32 %v6909_v56, %v1055_v5  ;;  %5414 = vmatprep.mubr.f32.mxu0 %v6911_v28  ;;  %v1897_v56 = vld [vmem:[#allocation2 + $0x278] sm:$0xff]  ;;  %3128 = vmatpush1.msra.mxu0 %v3061_v49 }
 0x1a3   : > { %v1465_v63 = vpop.f32.mrf.mxu1  ;;  %2140 = vmatmul.mubr.f32.gmra.mxu1 %v1890_v19  ;;  %v1057_v34 = vpop.f32.mrf.mxu0  ;;  %v3060_v28 = vld [vmem:[#allocation8 + $0x198] sm:$0xff]  ;;  %3129 = vmatprep.subr.mxu0 %v6984_v52  ;;  %v1900_v19 = vld [vmem:[#allocation2 + $0x290] sm:$0xff] }
 0x1a4   : > { %v7046_v12 = vadd.f32 %v1465_v63, %v6960_v59  ;;  %2144 = vmatprep.mubr.f32.mxu1 %v1894_v43  ;;  %3130 = vmatpush1.msra.mxu0 %v3060_v28  ;;  %v3100_v43 = vld [vmem:[#allocation8 + $0x2d8] sm:$0xff]  ;;  %v1899_v34 = vld [vmem:[#allocation2 + $0x288] sm:$0xff]  ;;  %v1902_v28 = vld [vmem:[#allocation2 + $0x2a0] sm:$0xff] }
 0x1a5   : > { %v1467_v33 = vpop.f32.mrf.mxu1  ;;  %v1060_v27 = vpop.f32.mrf.mxu0  ;;  %5415 = vmatmul.mubr.f32.gmra.mxu0 %v6915_v30  ;;  %3131 = vmatprep.subr.mxu0 %v6984_v52 }
 0x1a6   : > { %v7050_v26 = vadd.f32 %v6904_v40, %v1060_v27  ;;  %5417 = vmatprep.mubr.f32.mxu0 %v1916_v39  ;;  %v3058_v40 = vld [vmem:[#allocation8 + $0x188] sm:$0xff]  ;;  %3132 = vmatpush1.msra.mxu0 %v3059_v36  ;;  %v3099_v33 = vld [vmem:[#allocation8 + $0x2d0] sm:$0xff]  ;;  %v1906_v36 = vld [vmem:[#allocation2 + $0x2c0] sm:$0xff] }
 0x1a7   : > { %v1470_v8 = vpop.f32.mrf.mxu1  ;;  %2145 = vmatmul.mubr.f32.gmra.mxu1 %v1893_v38  ;;  %v1062_v59 = vpop.f32.mrf.mxu0  ;;  %3133 = vmatprep.subr.mxu0 %v6984_v52  ;;  %v3088_v38 = vld [vmem:[#allocation8 + $0x278] sm:$0xff] }
 0x1a8   : > { %v7054_v0 = vadd.f32 %v1470_v8, %v6969_v53  ;;  %2149 = vmatprep.mubr.f32.mxu1 %v1897_v56  ;;  %3134 = vmatpush1.msra.mxu0 %v3058_v40 }
 0x1a9   : > { %v1472_v30 = vpop.f32.mrf.mxu1  ;;  %v1065_v10 = vpop.f32.mrf.mxu0  ;;  %5418 = vmatmul.mubr.f32.gmra.mxu0 %v1919_v13  ;;  %3135 = vmatprep.subr.mxu0 %v6984_v52  ;;  %v3087_v13 = vld [vmem:[#allocation8 + $0x270] sm:$0xff] }
 0x1aa   : > { %v7058_v31 = vadd.f32 %v6919_v37, %v1065_v10  ;;  %5420 = vmatprep.mubr.f32.mxu0 %v6984_v52  ;;  %v1903_v37 = vld [vmem:[#allocation2 + $0x2a8] sm:$0xff]  ;;  %5431 = vmatprep.subr.mxu1 %v3100_v43 }
 0x1ab   : > { %v1475_v5 = vpop.f32.mrf.mxu1  ;;  %2150 = vmatmul.mubr.f32.gmra.mxu1 %v1896_v46  ;;  %v1067_v53 = vpop.f32.mrf.mxu0  ;;  %3136 = vmatpush1.msra.mxu0 %v3057_v50  ;;  %v3086_v30 = vld [vmem:[#allocation8 + $0x268] sm:$0xff]  ;;  %v1909_v50 = vld [vmem:[#allocation2 + $0x2d8] sm:$0xff] }
 0x1ac   : > { %v7063_v63 = vadd.f32 %v1475_v5, %v6978_v3  ;;  %2154 = vmatprep.mubr.f32.mxu1 %v1900_v19  ;;  %3137 = vmatprep.subr.mxu0 %v6984_v52  ;;  %v3098_v10 = vld [vmem:[#allocation8 + $0x2c8] sm:$0xff]  ;;  %v1905_v5 = vld [vmem:[#allocation2 + $0x2b8] sm:$0xff]  ;;  %v3085_v53 = vld [vmem:[#allocation8 + $0x260] sm:$0xff] }
 0x1ad   : > { %v1477_v39 = vpop.f32.mrf.mxu1  ;;  %v7065_v49 = vpop.f32.mrf.mxu0  ;;  %5421 = vmatmul.mubr.f32.gmra.mxu0 %v6984_v52  ;;  %5432 = vmatpush3.msra.mxu1 %v3100_v43 }
 0x1ae   : > { %3138 = vmatpush2.msra.mxu0 %v3088_v38  ;;  %5433 = vmatprep.subr.mxu1 %v3099_v33  ;;  %v3097_v39 = vld [vmem:[#allocation8 + $0x2c0] sm:$0xff] }
 0x1af   : > { %v1480_v27 = vpop.f32.mrf.mxu1  ;;  %2155 = vmatmul.mubr.f32.gmra.mxu1 %v1899_v34  ;;  %v1072_v56 = vpop.f32.mrf.mxu0  ;;  %3139 = vmatprep.subr.mxu0 %v6984_v52  ;;  %v3084_v34 = vld [vmem:[#allocation8 + $0x258] sm:$0xff] }
 0x1b0   : > { %v7071_v3 = vadd.f32 %v1480_v27, %v6992_v58  ;;  %2159 = vmatprep.mubr.f32.mxu1 %v1903_v37  ;;  %5434 = vmatpush3.msra.mxu1 %v3099_v33  ;;  %v1908_v33 = vld [vmem:[#allocation2 + $0x2d0] sm:$0xff] }
 0x1b1   : > { %v1482_v8 = vpop.f32.mrf.mxu1  ;;  %v1075_v59 = vpop.f32.mrf.mxu0  ;;  %3140 = vmatpush2.msra.mxu0 %v3087_v13  ;;  %5435 = vmatprep.subr.mxu1 %v3098_v10  ;;  %v3083_v27 = vld [vmem:[#allocation8 + $0x250] sm:$0xff] }
 0x1b2   : > { %v7074_v46 = vadd.f32 %v6929_v11, %v1075_v59  ;;  %3141 = vmatprep.subr.mxu0 %v6984_v52  ;;  %5436 = vmatpush3.msra.mxu1 %v3098_v10  ;;  %v1912_v13 = vld [vmem:[#allocation2 + $0x2f0] sm:$0xff]  ;;  %v3082_v8 = vld [vmem:[#allocation8 + $0x248] sm:$0xff]  ;;  %v3096_v59 = vld [vmem:[#allocation8 + $0x2b8] sm:$0xff] }
 0x1b3   : > { %v1485_v19 = vpop.f32.mrf.mxu1  ;;  %2160 = vmatmul.mubr.f32.gmra.mxu1 %v1902_v28  ;;  %v1077_v58 = vpop.f32.mrf.mxu0  ;;  %3142 = vmatpush2.msra.mxu0 %v3086_v30  ;;  %v1911_v10 = vld [vmem:[#allocation2 + $0x2e8] sm:$0xff] }
 0x1b4   : > { %v7078_v40 = vadd.f32 %v1485_v19, %v7002_v44  ;;  %2164 = vmatprep.mubr.f32.mxu1 %v1906_v36  ;;  %3143 = vmatprep.subr.mxu0 %v6984_v52  ;;  %v3081_v19 = vld [vmem:[#allocation8 + $0x240] sm:$0xff] }
 0x1b5   : > { %v1487_v43 = vpop.f32.mrf.mxu1  ;;  %v7081_v11 = vpop.f32.mrf.mxu0  ;;  %3144 = vmatpush2.msra.mxu0 %v3085_v53  ;;  %5437 = vmatprep.subr.mxu1 %v3097_v39  ;;  %v1915_v53 = vld [vmem:[#allocation2 + $0x308] sm:$0xff] }
 0x1b6   : > { %3145 = vmatprep.subr.mxu0 %v6984_v52  ;;  %5438 = vmatpush3.msra.mxu1 %v3097_v39  ;;  %v3080_v43 = vld [vmem:[#allocation8 + $0x238] sm:$0xff] }
 0x1b7   : > { %v1490_v37 = vpop.f32.mrf.mxu1  ;;  %2165 = vmatmul.mubr.f32.gmra.mxu1 %v1905_v5  ;;  %v1082_v44 = vpop.f32.mrf.mxu0  ;;  %3146 = vmatpush2.msra.mxu0 %v3084_v34 }
 0x1b8   : > { %v7085_v38 = vadd.f32 %v1490_v37, %v7012_v29  ;;  %2169 = vmatprep.mubr.f32.mxu1 %v1909_v50  ;;  %3147 = vmatprep.subr.mxu0 %v6984_v52  ;;  %v3095_v50 = vld [vmem:[#allocation8 + $0x2b0] sm:$0xff]  ;;  %v1914_v37 = vld [vmem:[#allocation2 + $0x300] sm:$0xff] }
 0x1b9   : > { %v1492_v56 = vpop.f32.mrf.mxu1  ;;  %v7088_v28 = vpop.f32.mrf.mxu0  ;;  %3148 = vmatpush2.msra.mxu0 %v3083_v27  ;;  %5439 = vmatprep.subr.mxu1 %v3096_v59  ;;  %v3079_v44 = vld [vmem:[#allocation8 + $0x230] sm:$0xff] }
 0x1ba   : > { %3149 = vmatprep.subr.mxu0 %v6984_v52  ;;  %5440 = vmatpush3.msra.mxu1 %v3096_v59  ;;  %v1918_v56 = vld [vmem:[#allocation2 + $0x320] sm:$0xff] }
 0x1bb   : > { %v1495_v36 = vpop.f32.mrf.mxu1  ;;  %2170 = vmatmul.mubr.f32.gmra.mxu1 %v1908_v33  ;;  %v1087_v29 = vpop.f32.mrf.mxu0  ;;  %3150 = vmatpush2.msra.mxu0 %v3082_v8  ;;  %v3094_v8 = vld [vmem:[#allocation8 + $0x2a8] sm:$0xff] }
 0x1bc   : > { %v7092_v30 = vadd.f32 %v1495_v36, %v7022_v7  ;;  %2174 = vmatprep.mubr.f32.mxu1 %v1912_v13  ;;  %3151 = vmatprep.subr.mxu0 %v6984_v52  ;;  %v3078_v13 = vld [vmem:[#allocation8 + $0x228] sm:$0xff]  ;;  %v1917_v29 = vld [vmem:[#allocation2 + $0x318] sm:$0xff] }
 0x1bd   : > { %v1497_v58 = vpop.f32.mrf.mxu1  ;;  %v7095_v5 = vpop.f32.mrf.mxu0  ;;  %3152 = vmatpush2.msra.mxu0 %v3081_v19  ;;  %5441 = vmatprep.subr.mxu1 %v3095_v50 }
 0x1be   : > { %3153 = vmatprep.subr.mxu0 %v6984_v52  ;;  %5442 = vmatpush3.msra.mxu1 %v3095_v50 }
 0x1bf   : > { %v1500_v34 = vpop.f32.mrf.mxu1  ;;  %2175 = vmatmul.mubr.f32.gmra.mxu1 %v1911_v10  ;;  %v1092_v7 = vpop.f32.mrf.mxu0  ;;  %3154 = vmatpush2.msra.mxu0 %v3080_v43  ;;  %v3077_v10 = vld [vmem:[#allocation8 + $0x220] sm:$0xff]  ;;  %v3076_v43 = vld [vmem:[#allocation8 + $0x218] sm:$0xff] }
 0x1c0   : > { %v7099_v39 = vadd.f32 %v1500_v34, %v7031_v55  ;;  %2179 = vmatprep.mubr.f32.mxu1 %v1915_v53  ;;  %3155 = vmatprep.subr.mxu0 %v6984_v52  ;;  %v3093_v53 = vld [vmem:[#allocation8 + $0x2a0] sm:$0xff]  ;;  %v3092_v7 = vld [vmem:[#allocation8 + $0x298] sm:$0xff] }
 0x1c1   : > { %v1502_v33 = vpop.f32.mrf.mxu1  ;;  %v7102_v27 = vpop.f32.mrf.mxu0  ;;  %3156 = vmatpush2.msra.mxu0 %v3079_v44  ;;  %5443 = vmatprep.subr.mxu1 %v3094_v8 }
 0x1c2   : > { %3157 = vmatprep.subr.mxu0 %v6984_v52  ;;  %5444 = vmatpush3.msra.mxu1 %v3094_v8  ;;  %v3075_v33 = vld [vmem:[#allocation8 + $0x210] sm:$0xff]  ;;  %v3074_v8 = vld [vmem:[#allocation8 + $0x208] sm:$0xff] }
 0x1c3   : > { %v1505_v59 = vpop.f32.mrf.mxu1  ;;  %2180 = vmatmul.mubr.f32.gmra.mxu1 %v1914_v37  ;;  %v1097_v55 = vpop.f32.mrf.mxu0  ;;  %3158 = vmatpush2.msra.mxu0 %v3078_v13 }
 0x1c4   : > { %v7106_v36 = vadd.f32 %v1505_v59, %v7041_v45  ;;  %2184 = vmatprep.mubr.f32.mxu1 %v1918_v56  ;;  %3159 = vmatprep.subr.mxu0 %v6984_v52 }
 0x1c5   : > { %v1507_v19 = vpop.f32.mrf.mxu1  ;;  %v7109_v58 = vpop.f32.mrf.mxu0  ;;  %3160 = vmatpush2.msra.mxu0 %v3077_v10  ;;  %5445 = vmatprep.subr.mxu1 %v3093_v53  ;;  %v3073_v10 = vld [vmem:[#allocation8 + $0x200] sm:$0xff] }
 0x1c6   : > { %3161 = vmatprep.subr.mxu0 %v6984_v52  ;;  %5446 = vmatpush3.msra.mxu1 %v3093_v53  ;;  %v1296_v19 = vadd.f32 %v6917_v35, %v7065_v49  ;;  %v3090_v53 = vld [vmem:[#allocation8 + $0x288] sm:$0xff] }
 0x1c7   : > { %v1510_v50 = vpop.f32.mrf.mxu1  ;;  %2185 = vmatmul.mubr.f32.gmra.mxu1 %v1917_v29  ;;  %v1102_v34 = vpop.f32.mrf.mxu0  ;;  %3162 = vmatpush2.msra.mxu0 %v3076_v43 }
 0x1c8   : > { %v7113_v45 = vadd.f32 %v1510_v50, %v7050_v26  ;;  %2189 = vmatprep.mubr.f32.mxu1 %v6984_v52  ;;  %3163 = vmatprep.subr.mxu0 %v6984_v52  ;;  %v3091_v26 = vld [vmem:[#allocation8 + $0x290] sm:$0xff]  ;;  %v3089_v34 = vld [vmem:[#allocation8 + $0x280] sm:$0xff] }
 0x1c9   : > { %v1512_v37 = vpop.f32.mrf.mxu1  ;;  %v7117_v44 = vpop.f32.mrf.mxu0  ;;  %5447 = vmatprep.subr.mxu1 %v3092_v7  ;;  %3164 = vmatpush2.msra.mxu0 %v3075_v33  ;;  %v7134_v33 = vld [vmem:[#allocation8 + $0x178] sm:$0xff] }
 0x1ca   : > { %5448 = vmatpush3.msra.mxu1 %v3092_v7  ;;  %3165 = vmatprep.subr.mxu0 %v6984_v52 }
 0x1cb   : > { %v1515_v56 = vpop.f32.mrf.mxu1  ;;  %2190 = vmatmul.mubr.f32.gmra.mxu1 %v6984_v52  ;;  %v1107_v13 = vpop.f32.mrf.mxu0  ;;  %5449 = vmatprep.subr.mxu1 %v3091_v26 }
 0x1cc   : > { %v7122_v59 = vadd.f32 %v1515_v56, %v7058_v31  ;;  %2194 = vmatprep.mubr.f32.mxu1 %v6984_v52  ;;  %3166 = vmatpush2.msra.mxu0 %v3074_v8 }
 0x1cd   : > { %v1517_v55 = vpop.f32.mrf.mxu1  ;;  %v7125_v29 = vpop.f32.mrf.mxu0  ;;  %3167 = vmatprep.subr.mxu0 %v6984_v52  ;;  %5450 = vmatpush3.msra.mxu1 %v3091_v26  ;;  %v1306_v26 = vadd.f32 %v6926_v22, %v7081_v11 }
 0x1ce   : > { %3168 = vmatpush2.msra.mxu0 %v3073_v10  ;;  %5451 = vmatprep.subr.mxu1 %v3090_v53 }
 0x1cf   : > { %v1520_v43 = vpop.f32.mrf.mxu1  ;;  %2195 = vmatmul.mubr.f32.gmra.mxu1 %v6984_v52  ;;  %v1112_v31 = vpop.f32.mrf.mxu0  ;;  %5503 = vmatprep.subr.mxu0 %v7134_v33 }
 0x1d0   : > { %v7132_v50 = vadd.f32 %v1520_v43, %v1296_v19  ;;  %5452 = vmatpush3.msra.mxu1 %v3090_v53  ;;  %v1311_v31 = vadd.f32 %v6938_v20, %v7088_v28 }
 0x1d1   : > { %v1522_v7 = vpop.f32.mrf.mxu1  ;;  %v1115_v37 = vpop.f32.mrf.mxu0  ;;  %5453 = vmatprep.subr.mxu1 %v3089_v34 }
 0x1d2   : > { %5454 = vmatpush3.msra.mxu1 %v3089_v34 }
 0x1d3   : > { %v1525_v35 = vpop.f32.mrf.mxu1  ;;  %v1117_v49 = vpop.f32.mrf.mxu0  ;;  %3555 = vmatprep.subr.mxu1 %v6984_v52  ;;  %v1316_v52 = vadd.f32 %v6935_v32, %v7095_v5 }
 0x1d4   : > { %v7138_v56 = vadd.f32 %v1525_v35, %v7074_v46 }
 0x1d5   : > { %v1527_v13 = vpop.f32.mrf.mxu1  ;;  %v1120_v8 = vpop.f32.mrf.mxu0 }
 0x1d7   : > { %v1530_v55 = vpop.f32.mrf.mxu1  ;;  %v1122_v10 = vpop.f32.mrf.mxu0 }
 0x1d8   : > { %v7143_v19 = vadd.f32 %v1530_v55, %v1306_v26  ;;  %v1321_v10 = vadd.f32 %v6947_v16, %v7102_v27 }
 0x1d9   : > { %v1532_v53 = vpop.f32.mrf.mxu1  ;;  %v1125_v43 = vpop.f32.mrf.mxu0 }
 0x1db   : > { %v1535_v7 = vpop.f32.mrf.mxu1  ;;  %v1127_v46 = vpop.f32.mrf.mxu0 }
 0x1dc   : > { %v7147_v35 = vadd.f32 %v1535_v7, %v1311_v31  ;;  %v1326_v46 = vadd.f32 %v6944_v17, %v7109_v58 }
 0x1dd   : > { %v1537_v34 = vpop.f32.mrf.mxu1  ;;  %v1130_v49 = vpop.f32.mrf.mxu0 }
 0x1df   : > { %v1540_v13 = vpop.f32.mrf.mxu1  ;;  %v1132_v22 = vpop.f32.mrf.mxu0 }
 0x1e0   : > { %v7151_v11 = vadd.f32 %v1540_v13, %v1316_v52  ;;  %v1331_v22 = vadd.f32 %v6957_v4, %v7117_v44 }
 0x1e1   : > { %v1542_v26 = vpop.f32.mrf.mxu1  ;;  %v1135_v55 = vpop.f32.mrf.mxu0 }
 0x1e3   : > { %v1545_v53 = vpop.f32.mrf.mxu1  ;;  %v1137_v20 = vpop.f32.mrf.mxu0 }
 0x1e4   : > { %v7155_v28 = vadd.f32 %v1545_v53, %v1321_v10  ;;  %v1336_v20 = vadd.f32 %v6954_v24, %v7125_v29  ;;  %v1346_v24 = vadd.f32 %v6963_v14, %v1120_v8  ;;  %v1356_v8 = vadd.f32 %v6972_v2, %v1130_v49 }
 0x1e5   : > { %v1547_v31 = vpop.f32.mrf.mxu1  ;;  %v1140_v7 = vpop.f32.mrf.mxu0 }
 0x1e7   : > { %v1550_v34 = vpop.f32.mrf.mxu1  ;;  %v1142_v32 = vpop.f32.mrf.mxu0 }
 0x1e8   : > { %v7159_v5 = vadd.f32 %v1550_v34, %v1326_v46  ;;  %v1341_v32 = vadd.f32 %v6966_v25, %v1115_v37  ;;  %v1351_v37 = vadd.f32 %v6975_v54, %v1125_v43 }
 0x1e9   : > { %v1552_v52 = vpop.f32.mrf.mxu1  ;;  %v1145_v13 = vpop.f32.mrf.mxu0 }
 0x1eb   : > { %v1555_v26 = vpop.f32.mrf.mxu1  ;;  %v1147_v16 = vpop.f32.mrf.mxu0 }
 0x1ec   : > { %v7163_v27 = vadd.f32 %v1555_v26, %v1331_v22 }
 0x1ed   : > { %v1557_v10 = vpop.f32.mrf.mxu1  ;;  %v1150_v53 = vpop.f32.mrf.mxu0 }
 0x1ef   : > { %v1560_v31 = vpop.f32.mrf.mxu1  ;;  %v1152_v17 = vpop.f32.mrf.mxu0 }
 0x1f0   : > { %v7167_v58 = vadd.f32 %v1560_v31, %v1336_v20 }
 0x1f1   : > { %v1562_v46 = vpop.f32.mrf.mxu1  ;;  %v5297_v34 = vpop.f32.mrf.mxu0 }
 0x1f2   : > { %v7171_v52 = vadd.f32 %v5297_v34, %v7017_v48 }
 0x1f3   : > { %v1565_v4 = vpop.f32.mrf.mxu1  ;;  %v7173_v44 = vpop.f32.mrf.mxu0 }
 0x1f4   : > { %v7175_v22 = vadd.f32 %v1565_v4, %v1341_v32 }
 0x1f5   : > { %v1567_v26 = vpop.f32.mrf.mxu1  ;;  %v5300_v16 = vpop.f32.mrf.mxu0 }
 0x1f6   : > { %v7179_v29 = vadd.f32 %v5300_v16, %v7036_v18 }
 0x1f7   : > { %v1570_v10 = vpop.f32.mrf.mxu1  ;;  %v7181_v20 = vpop.f32.mrf.mxu0 }
 0x1f8   : > { %v7183_v31 = vadd.f32 %v1570_v10, %v1346_v24 }
 0x1f9   : > { %v1572_v25 = vpop.f32.mrf.mxu1  ;;  %v5303_v48 = vpop.f32.mrf.mxu0 }
 0x1fa   : > { %v7187_v17 = vadd.f32 %v5303_v48, %v7054_v0  ;;  %v1361_v0 = vadd.f32 %v6987_v47, %v1135_v55 }
 0x1fb   : > { %v1575_v46 = vpop.f32.mrf.mxu1  ;;  %v7189_v34 = vpop.f32.mrf.mxu0 }
 0x1fc   : > { %v7191_v32 = vadd.f32 %v1575_v46, %v1351_v37 }
 0x1fd   : > { %v1577_v14 = vpop.f32.mrf.mxu1  ;;  %v5306_v18 = vpop.f32.mrf.mxu0 }
 0x1fe   : > { %8605 = vst [vmem:[#allocation43_spill] sm:$0xff] %v7191_v32  ;;  %v7195_v4 = vadd.f32 %v5306_v18, %v7071_v3  ;;  %v1366_v3 = vadd.f32 %v6981_v62, %v1140_v7 }
 0x1ff   : > { %v1580_v26 = vpop.f32.mrf.mxu1  ;;  %v7197_v16 = vpop.f32.mrf.mxu0 }
 0x200   : > { %v1581_v24 = vadd.f32 %v1580_v26, %v1356_v8 }
 0x201   : > { %v1582_v54 = vpop.f32.mrf.mxu1  ;;  %v5309_v43 = vpop.f32.mrf.mxu0 }
 0x202   : > { %v7201_v10 = vadd.f32 %v5309_v43, %v7085_v38  ;;  %v1371_v38 = vadd.f32 %v6998_v6, %v1145_v13 }
 0x203   : > { %v1585_v25 = vpop.f32.mrf.mxu1  ;;  %v7203_v48 = vpop.f32.mrf.mxu0 }
 0x204   : > { %v7205_v37 = vadd.f32 %v1585_v25, %v1361_v0 }
 0x205   : > { %v1587_v2 = vpop.f32.mrf.mxu1  ;;  %v5312_v49 = vpop.f32.mrf.mxu0 }
 0x206   : > { %8606 = vst [vmem:[#allocation44_spill] sm:$0xff] %v7205_v37  ;;  %v7209_v46 = vadd.f32 %v5312_v49, %v7099_v39  ;;  %v1376_v39 = vadd.f32 %v6995_v42, %v1150_v53 }
 0x207   : > { %v1590_v14 = vpop.f32.mrf.mxu1  ;;  %v7211_v18 = vpop.f32.mrf.mxu0 }
 0x208   : > { %v1591_v8 = vadd.f32 %v1590_v14, %v1366_v3 }
 0x209   : > { %v1592_v47 = vpop.f32.mrf.mxu1  ;;  %v5315_v55 = vpop.f32.mrf.mxu0 }
 0x20a   : > { %v7215_v26 = vadd.f32 %v5315_v55, %v7113_v45 }
 0x20b   : > { %v1595_v54 = vpop.f32.mrf.mxu1  ;;  %v7217_v43 = vpop.f32.mrf.mxu0 }
 0x20c   : > { %v7219_v0 = vadd.f32 %v1595_v54, %v1371_v38 }
 0x20d   : > { %v1597_v62 = vpop.f32.mrf.mxu1  ;;  %v5318_v7 = vpop.f32.mrf.mxu0 }
 0x20e   : > { %8607 = vst [vmem:[#allocation45_spill] sm:$0xff] %v7219_v0  ;;  %v7223_v25 = vadd.f32 %v5318_v7, %v7132_v50 }
 0x20f   : > { %v1600_v2 = vpop.f32.mrf.mxu1  ;;  %v7225_v49 = vpop.f32.mrf.mxu0 }
 0x210   : > { %v1601_v3 = vadd.f32 %v1600_v2, %v1376_v39 }
 0x211   : > { %v1602_v6 = vpop.f32.mrf.mxu1  ;;  %v5321_v13 = vpop.f32.mrf.mxu0 }
 0x212   : > { %v7228_v45 = vadd.f32 %v5321_v13, %v7143_v19 }
 0x213   : > { %v2041_v14 = vpop.f32.mrf.mxu1  ;;  %v7230_v47 = vpop.f32.mrf.mxu0 }
 0x215   : > { %v2043_v55 = vpop.f32.mrf.mxu1  ;;  %v5324_v38 = vpop.f32.mrf.mxu0 }
 0x216   : > { %v7233_v54 = vadd.f32 %v5324_v38, %v7151_v11 }
 0x217   : > { %v2046_v42 = vpop.f32.mrf.mxu1  ;;  %v7235_v50 = vpop.f32.mrf.mxu0 }
 0x219   : > { %v2048_v53 = vpop.f32.mrf.mxu1  ;;  %v5327_v62 = vpop.f32.mrf.mxu0 }
 0x21a   : > { %v7238_v7 = vadd.f32 %v5327_v62, %v7159_v5 }
 0x21b   : > { %v2051_v39 = vpop.f32.mrf.mxu1  ;;  %v7240_v2 = vpop.f32.mrf.mxu0 }
 0x21d   : > { %v2053_v19 = vpop.f32.mrf.mxu1  ;;  %v5330_v6 = vpop.f32.mrf.mxu0 }
 0x21e   : > { %v7243_v13 = vadd.f32 %v5330_v6, %v7167_v58 }
 0x21f   : > { %v2056_v55 = vpop.f32.mrf.mxu1  ;;  %v7245_v57 = vpop.f32.mrf.mxu0 }
 0x221   : > { %v2058_v11 = vpop.f32.mrf.mxu1  ;;  %v5333_v38 = vpop.f32.mrf.mxu0 }
 0x222   : > { %v7248_v61 = vadd.f32 %v5333_v38, %v7183_v31 }
 0x223   : > { %v2061_v53 = vpop.f32.mrf.mxu1  ;;  %v7250_v21 = vpop.f32.mrf.mxu0 }
 0x224   : > { %8608 = vst [vmem:[#allocation46_spill] sm:$0xff] %v7248_v61 }
 0x225   : > { %v2063_v5 = vpop.f32.mrf.mxu1  ;;  %v5336_v62 = vpop.f32.mrf.mxu0 }
 0x226   : > { %v7252_v51 = vadd.f32 %v5336_v62, %v1581_v24 }
 0x227   : > { %v2066_v19 = vpop.f32.mrf.mxu1  ;;  %v7254_v15 = vpop.f32.mrf.mxu0 }
 0x228   : > { %8609 = vst [vmem:[#allocation47_spill] sm:$0xff] %v7252_v51  ;;  %8610 = vst [vmem:[#allocation48_spill] sm:$0xff] %v7254_v15 }
 0x229   : > { %v2068_v58 = vpop.f32.mrf.mxu1  ;;  %v5339_v6 = vpop.f32.mrf.mxu0 }
 0x22a   : > { %v7256_v23 = vadd.f32 %v5339_v6, %v1591_v8  ;;  %v7269_v58 = vld [vmem:[%s8501_s2] ss:$0 sm:$0xff] }
 0x22b   : > { %v7258_v60 = vpop.f32.mrf.mxu1  ;;  %v7260_v11 = vpop.f32.mrf.mxu0 }
 0x22c   : > { %8611 = vst [vmem:[#allocation49_spill] sm:$0xff] %v7256_v23  ;;  %8612 = vst [vmem:[#allocation50_spill] sm:$0xff] %v7260_v11 }
 0x22d   : > { %v2073_v31 = vpop.f32.mrf.mxu1  ;;  %v5342_v38 = vpop.f32.mrf.mxu0 }
 0x22e   : > { %v7262_v9 = vadd.f32 %v5342_v38, %v1601_v3  ;;  %v1671_v31 = vadd.f32 %v7173_v44, %v7007_v1  ;;  %v1681_v1 = vadd.f32 %v7181_v20, %v7026_v41 }
 0x22f   : > { %v2076_v0 = vpop.f32.mrf.mxu1  ;;  %v7264_v5 = vpop.f32.mrf.mxu0 }
 0x230   : > { %8613 = vst [vmem:[#allocation51_spill] sm:$0xff] %v7262_v9  ;;  %8614 = vst [vmem:[#allocation52_spill] sm:$0xff] %v7264_v5 }
 0x231   : > { %v2078_v24 = vpop.f32.mrf.mxu1  ;;  %v5377_v62 = vpop.f32.mrf.mxu0 }
 0x232   : > { %v2272_v37 = vadd.f32 %v5377_v62, %v2046_v42 }
 0x233   : > { %v7271_v8 = vpop.f32.mrf.mxu1  ;;  %v2266_v6 = vpop.f32.mrf.mxu0 }
 0x234   : > { %v2426_v3 = vadd.f32 %v2272_v37, %v7171_v52  ;;  %v2267_v38 = vadd.f32 %v2266_v6, %v2041_v14 }
 0x235   : > { %v2083_v9 = vpop.f32.mrf.mxu1  ;;  %v5380_v23 = vpop.f32.mrf.mxu0 }
 0x236   : > { %v2465_v24 = vadd.f32 %v7269_v58, %v2426_v3  ;;  %v2425_v5 = vadd.f32 %v2267_v38, %v1671_v31  ;;  %v2282_v42 = vadd.f32 %v5380_v23, %v2056_v55 }
 0x237   : > { %v2086_v62 = vpop.f32.mrf.mxu1  ;;  %v2276_v11 = vpop.f32.mrf.mxu0 }
 0x238   : > { %v7277_v51 = vmax.f32 %v2465_v24, 0.0  ;;  %v2464_v15 = vadd.f32 %v7269_v58, %v2425_v5  ;;  %v2428_v32 = vadd.f32 %v2282_v42, %v7179_v29  ;;  %v2277_v61 = vadd.f32 %v2276_v11, %v2051_v39 }
 0x239   : > { %v2088_v52 = vpop.f32.mrf.mxu1  ;;  %v5383_v44 = vpop.f32.mrf.mxu0 }
 0x23a   : > { %2529 = vst [vmem:[#allocation2 + $0x50] sm:$0xff] %v7277_v51  ;;  %v2705_v9 = vrot.slane %v7277_v51, 1  ;;  %v2496_v37 = vmax.f32 %v2464_v15, 0.0  ;;  %v2467_v23 = vadd.f32 %v7269_v58, %v2428_v32  ;;  %v2593_v14 = vrot.slane %v7277_v51, 7 }
 0x23b   : > { %v2427_v55 = vadd.f32 %v2277_v61, %v1681_v1  ;;  %v2292_v6 = vadd.f32 %v5383_v44, %v2066_v19  ;;  %v7287_v5 = vpop.f32.mrf.mxu1  ;;  %v2286_v29 = vpop.f32.mrf.mxu0  ;;  %v1691_v15 = vadd.f32 %v7189_v34, %v7046_v12  ;;  %v1701_v52 = vadd.f32 %v7197_v16, %v7063_v63 }
 0x23c   : > { %2785 = vst [vmem:[#allocation2 + $0x58] sm:$0x7f] %v2705_v9  ;;  %2528 = vst [vmem:[#allocation2 + $0x38] sm:$0xff] %v2496_v37  ;;  %v2592_v39 = vrot.slane %v2496_v37, 7  ;;  %v2704_v41 = vrot.slane %v2496_v37, 1  ;;  %v7289_v20 = vmax.f32 %v2467_v23, 0.0  ;;  %v2287_v11 = vadd.f32 %v2286_v29, %v2061_v53  ;;  %3169 = vmatprep.mubr.f32.mxu0 %v2496_v37 }
 0x23d   : > { %v2466_v32 = vadd.f32 %v7269_v58, %v2427_v55  ;;  %v2430_v31 = vadd.f32 %v2292_v6, %v7187_v17  ;;  %v2093_v61 = vpop.f32.mrf.mxu1  ;;  %v5386_v19 = vpop.f32.mrf.mxu0 }
 0x23e   : > { %v7296_v3 = vsel %vm414_vm1, %v2592_v39, %v2593_v14  ;;  %2672 = vst [vmem:[#allocation2 + $0x30] sm:$0xfe] %v2592_v39  ;;  %v2706_v38 = vsel %vm527_vm0, %v2704_v41, %v2705_v9  ;;  %2531 = vst [vmem:[#allocation2 + $0x80] sm:$0xff] %v7289_v20  ;;  %v2708_v53 = vrot.slane %v7289_v20, 1  ;;  %v2429_v17 = vadd.f32 %v2287_v11, %v1691_v15  ;;  %v2927_v39 = vld [vmem:[#allocation8 + $0x78] sm:$0xff] }
 0x23f   : > { %2673 = vst [vmem:[#allocation2 + $0x48] sm:$0xff] %v7296_v3  ;;  %2784 = vst [vmem:[#allocation2 + $0x40] sm:$0xff] %v2706_v38  ;;  %v7302_v12 = vmax.f32 %v2466_v32, 0.0  ;;  %v2469_v34 = vadd.f32 %v7269_v58, %v2430_v31  ;;  %v2302_v24 = vadd.f32 %v5386_v19, %v2076_v0  ;;  %v2096_v42 = vpop.f32.mrf.mxu1  ;;  %v2296_v1 = vpop.f32.mrf.mxu0  ;;  %5455 = vmatprep.mubr.f32.mxu1 %v2706_v38  ;;  %v2596_v44 = vrot.slane %v7289_v20, 7 }
 0x240   : > { %2787 = vst [vmem:[#allocation2 + $0x88] sm:$0x7f] %v2708_v53  ;;  %v2297_v9 = vadd.f32 %v2296_v1, %v7258_v60  ;;  %v2468_v0 = vadd.f32 %v7269_v58, %v2429_v17  ;;  %v1711_v38 = vadd.f32 %v7203_v48, %v7078_v40 }
 0x241   : > { %2530 = vst [vmem:[#allocation2 + $0x68] sm:$0xff] %v7302_v12  ;;  %v2595_v37 = vrot.slane %v7302_v12, 7  ;;  %v2707_v23 = vrot.slane %v7302_v12, 1  ;;  %v7312_v14 = vmax.f32 %v2469_v34, 0.0  ;;  %v2098_v55 = vpop.f32.mrf.mxu1  ;;  %v5389_v6 = vpop.f32.mrf.mxu0  ;;  %v2432_v29 = vadd.f32 %v2302_v24, %v7195_v4 }
 0x242   : > { %v2431_v63 = vadd.f32 %v2297_v9, %v1701_v52  ;;  %v2312_v16 = vadd.f32 %v5389_v6, %v2086_v62  ;;  %v7325_v4 = vmax.f32 %v2468_v0, 0.0  ;;  %v2957_v6 = vld [vmem:[#allocation8 + $0x168] sm:$0xff] }
 0x243   : > { %v7317_v41 = vsel %vm414_vm1, %v2595_v37, %v2596_v44  ;;  %2674 = vst [vmem:[#allocation2 + $0x60] sm:$0xfe] %v2595_v37  ;;  %v2709_v60 = vsel %vm527_vm0, %v2707_v23, %v2708_v53  ;;  %2533 = vst [vmem:[#allocation2 + $0xb0] sm:$0xff] %v7312_v14  ;;  %v2711_v11 = vrot.slane %v7312_v14, 1  ;;  %v7322_v15 = vpop.f32.mrf.mxu1  ;;  %v2306_v32 = vpop.f32.mrf.mxu0  ;;  %v2965_v31 = vld [vmem:[#allocation2 + $0x58] sm:$0xff]  ;;  %v2471_v62 = vadd.f32 %v7269_v58, %v2432_v29  ;;  %v2958_v44 = vld [vmem:[#allocation8 + $0x170] sm:$0xff] }
 0x244   : > { %2675 = vst [vmem:[#allocation2 + $0x78] sm:$0xff] %v7317_v41  ;;  %2786 = vst [vmem:[#allocation2 + $0x70] sm:$0xff] %v2709_v60  ;;  %v2470_v61 = vadd.f32 %v7269_v58, %v2431_v63  ;;  %v2434_v19 = vadd.f32 %v2312_v16, %v7201_v10  ;;  %5456 = vmatmul.mubr.f32.vlgmr.msra.gmra.mxu1 %v2965_v31  ;;  %v7334_v53 = vadd.f32 %v7211_v18, %v7092_v30  ;;  %v7345_v18 = vld [vmem:[#allocation2] sm:$0xff] }
 0x245   : > { %v2599_v34 = vrot.slane %v7312_v14, 7  ;;  %2789 = vst [vmem:[#allocation2 + $0xb8] sm:$0x7f] %v2711_v11  ;;  %v2307_v17 = vadd.f32 %v2306_v32, %v7271_v8  ;;  %v2103_v24 = vpop.f32.mrf.mxu1  ;;  %v5392_v1 = vpop.f32.mrf.mxu0  ;;  %v2960_v52 = vld [vmem:[#allocation2 + $0x30] sm:$0xff]  ;;  %5458 = vmatprep.mubr.f32.mxu1 %v2709_v60  ;;  %3556 = vmatpush1.msra.mxu1 %v2927_v39  ;;  %2532 = vst [vmem:[#allocation2 + $0x98] sm:$0xff] %v7325_v4  ;;  %v2598_v10 = vrot.slane %v7325_v4, 7 }
 0x246   : > { %v2710_v40 = vrot.slane %v7325_v4, 1  ;;  %v7341_v48 = vmax.f32 %v2471_v62, 0.0  ;;  %v7343_v30 = vmax.f32 %v2470_v61, 0.0  ;;  %3170 = vmatmul.mubr.f32.vlgmr.msra.gmra.mxu0 %v2960_v52  ;;  %3557 = vmatprep.subr.mxu1 %v7345_v18  ;;  %v2473_v8 = vadd.f32 %v7269_v58, %v2434_v19  ;;  %v2956_v31 = vld [vmem:[#allocation8 + $0x160] sm:$0xff]  ;;  %v2926_v62 = vld [vmem:[#allocation8 + $0x70] sm:$0xff] }
 0x247   : > { %v2433_v9 = vadd.f32 %v2307_v17, %v1711_v38  ;;  %v2322_v37 = vadd.f32 %v5392_v1, %v2096_v42  ;;  %v2106_v23 = vpop.f32.mrf.mxu1  ;;  %v2316_v0 = vpop.f32.mrf.mxu0  ;;  %3174 = vmatprep.mubr.f32.mxu0 %v7277_v51  ;;  %5504 = vmatpush3.msra.mxu0 %v7134_v33  ;;  %v2971_v55 = vld [vmem:[#allocation2 + $0x88] sm:$0xff]  ;;  %v7352_v29 = vsel %vm414_vm1, %v2598_v10, %v2599_v34 }
 0x248   : > { %2676 = vst [vmem:[#allocation2 + $0x90] sm:$0xfe] %v2598_v10  ;;  %v2712_v63 = vsel %vm527_vm0, %v2710_v40, %v2711_v11  ;;  %2535 = vst [vmem:[#allocation2 + $0xe0] sm:$0xff] %v7341_v48  ;;  %v2602_v16 = vrot.slane %v7341_v48, 7  ;;  %v2714_v42 = vrot.slane %v7341_v48, 1  ;;  %5459 = vmatmul.mubr.f32.gmra.mxu1 %v2971_v55  ;;  %5505 = vmatprep.subr.mxu0 %v2958_v44  ;;  %v2601_v51 = vrot.slane %v7343_v30, 7 }
 0x249   : > { %2534 = vst [vmem:[#allocation2 + $0xc8] sm:$0xff] %v7343_v30  ;;  %2677 = vst [vmem:[#allocation2 + $0xa8] sm:$0xff] %v7352_v29  ;;  %v2713_v33 = vrot.slane %v7343_v30, 1  ;;  %v7362_v39 = vmax.f32 %v2473_v8, 0.0  ;;  %v2472_v60 = vadd.f32 %v7269_v58, %v2433_v9  ;;  %v2108_v11 = vpop.f32.mrf.mxu1  ;;  %v5395_v32 = vpop.f32.mrf.mxu0  ;;  %5461 = vmatprep.mubr.f32.mxu1 %v2712_v63  ;;  %5506 = vmatpush3.msra.mxu0 %v2958_v44  ;;  %v2955_v40 = vld [vmem:[#allocation8 + $0x158] sm:$0xff] }
 0x24a   : > { %2788 = vst [vmem:[#allocation2 + $0xa0] sm:$0xff] %v2712_v63  ;;  %2791 = vst [vmem:[#allocation2 + $0xe8] sm:$0x7f] %v2714_v42  ;;  %v2436_v61 = vadd.f32 %v2322_v37, %v7209_v46  ;;  %v2317_v19 = vadd.f32 %v2316_v0, %v7287_v5  ;;  %v2332_v38 = vadd.f32 %v5395_v32, %v2106_v23  ;;  %3175 = vmatmul.mubr.f32.gmra.mxu0 %v7296_v3  ;;  %v2966_v0 = vld [vmem:[#allocation2 + $0x60] sm:$0xff] }
 0x24b   : > { %5507 = vmatprep.subr.mxu0 %v2957_v6  ;;  %v7369_v34 = vsel %vm414_vm1, %v2601_v51, %v2602_v16  ;;  %2678 = vst [vmem:[#allocation2 + $0xc0] sm:$0xfe] %v2601_v51  ;;  %v2715_v17 = vsel %vm527_vm0, %v2713_v33, %v2714_v42  ;;  %2537 = vst [vmem:[#allocation2 + $0x110] sm:$0xff] %v7362_v39  ;;  %v2717_v24 = vrot.slane %v7362_v39, 1  ;;  %v2111_v1 = vpop.f32.mrf.mxu1  ;;  %v2326_v52 = vpop.f32.mrf.mxu0  ;;  %3179 = vmatprep.mubr.f32.mxu0 %v7302_v12 }
 0x24c   : > { %5508 = vmatpush3.msra.mxu0 %v2957_v6  ;;  %2679 = vst [vmem:[#allocation2 + $0xd8] sm:$0xff] %v7369_v34  ;;  %2790 = vst [vmem:[#allocation2 + $0xd0] sm:$0xff] %v2715_v17  ;;  %v7376_v46 = vmax.f32 %v2472_v60, 0.0  ;;  %v2475_v5 = vadd.f32 %v7269_v58, %v2436_v61  ;;  %v2435_v3 = vadd.f32 %v2317_v19, %v7334_v53  ;;  %v2977_v10 = vld [vmem:[#allocation2 + $0xb8] sm:$0xff]  ;;  %3558 = vmatpush1.msra.mxu1 %v2926_v62  ;;  %v2954_v6 = vld [vmem:[#allocation8 + $0x150] sm:$0xff] }
 0x24d   : > { %v2438_v44 = vadd.f32 %v2332_v38, %v7215_v26  ;;  %5509 = vmatprep.subr.mxu0 %v2956_v31  ;;  %v1731_v8 = vadd.f32 %v7217_v43, %v7106_v36  ;;  %v2605_v12 = vrot.slane %v7362_v39, 7  ;;  %2793 = vst [vmem:[#allocation2 + $0x118] sm:$0x7f] %v2717_v24  ;;  %v2327_v9 = vadd.f32 %v2326_v52, %v7322_v15  ;;  %v2113_v37 = vpop.f32.mrf.mxu1  ;;  %v5398_v23 = vpop.f32.mrf.mxu0  ;;  %v2925_v43 = vld [vmem:[#allocation8 + $0x68] sm:$0xff] }
 0x24e   : > { %5462 = vmatmul.mubr.f32.gmra.mxu1 %v2977_v10  ;;  %5510 = vmatpush3.msra.mxu0 %v2956_v31  ;;  %2536 = vst [vmem:[#allocation2 + $0xf8] sm:$0xff] %v7376_v46  ;;  %v2604_v26 = vrot.slane %v7376_v46, 7  ;;  %v2716_v53 = vrot.slane %v7376_v46, 1  ;;  %v7388_v55 = vmax.f32 %v2475_v5, 0.0  ;;  %v2474_v36 = vadd.f32 %v7269_v58, %v2435_v3  ;;  %v2953_v52 = vld [vmem:[#allocation8 + $0x148] sm:$0xff] }
 0x24f   : > { %3180 = vmatmul.mubr.f32.gmra.mxu0 %v2966_v0  ;;  %5464 = vmatprep.mubr.f32.mxu1 %v2715_v17  ;;  %v2477_v15 = vadd.f32 %v7269_v58, %v2438_v44  ;;  %v2437_v63 = vadd.f32 %v2327_v9, %v1731_v8  ;;  %v2116_v16 = vpop.f32.mrf.mxu1  ;;  %v2336_v42 = vpop.f32.mrf.mxu0  ;;  %v1741_v38 = vadd.f32 %v7225_v49, %v7122_v59 }
 0x250   : > { %3184 = vmatprep.mubr.f32.mxu0 %v7289_v20  ;;  %5511 = vmatprep.subr.mxu0 %v2955_v40  ;;  %v7394_v51 = vsel %vm414_vm1, %v2604_v26, %v2605_v12  ;;  %2680 = vst [vmem:[#allocation2 + $0xf0] sm:$0xfe] %v2604_v26  ;;  %v2718_v33 = vsel %vm527_vm0, %v2716_v53, %v2717_v24  ;;  %2539 = vst [vmem:[#allocation2 + $0x140] sm:$0xff] %v7388_v55  ;;  %v2720_v60 = vrot.slane %v7388_v55, 1  ;;  %v2924_v24 = vld [vmem:[#allocation8 + $0x60] sm:$0xff] }
 0x251   : > { %5512 = vmatpush3.msra.mxu0 %v2955_v40  ;;  %3559 = vmatprep.subr.mxu1 %v7345_v18  ;;  %2681 = vst [vmem:[#allocation2 + $0x108] sm:$0xff] %v7394_v51  ;;  %2792 = vst [vmem:[#allocation2 + $0x100] sm:$0xff] %v2718_v33  ;;  %v7401_v11 = vmax.f32 %v2474_v36, 0.0  ;;  %v7403_v20 = vmax.f32 %v2477_v15, 0.0  ;;  %v2476_v32 = vadd.f32 %v7269_v58, %v2437_v63  ;;  %v2118_v62 = vpop.f32.mrf.mxu1  ;;  %v7406_v61 = vpop.f32.mrf.mxu0  ;;  %v2983_v19 = vld [vmem:[#allocation2 + $0xe8] sm:$0xff]  ;;  %v2608_v5 = vrot.slane %v7388_v55, 7 }
 0x252   : > { %v2342_v31 = vadd.f32 %v5398_v23, %v2116_v16  ;;  %3560 = vmatpush1.msra.mxu1 %v2925_v43  ;;  %5513 = vmatprep.subr.mxu0 %v2954_v6  ;;  %2795 = vst [vmem:[#allocation2 + $0x148] sm:$0x7f] %v2720_v60  ;;  %v2337_v17 = vadd.f32 %v2336_v42, %v2111_v1  ;;  %v2923_v43 = vld [vmem:[#allocation8 + $0x58] sm:$0xff] }
 0x253   : > { %3185 = vmatmul.mubr.f32.gmra.mxu0 %v7317_v41  ;;  %5465 = vmatmul.mubr.f32.gmra.mxu1 %v2983_v19  ;;  %2538 = vst [vmem:[#allocation2 + $0x128] sm:$0xff] %v7401_v11  ;;  %v2607_v3 = vrot.slane %v7401_v11, 7  ;;  %v2719_v44 = vrot.slane %v7401_v11, 1  ;;  %2541 = vst [vmem:[#allocation2 + $0x170] sm:$0xff] %v7403_v20  ;;  %v2723_v10 = vrot.slane %v7403_v20, 1  ;;  %v2121_v59 = vpop.f32.mrf.mxu1  ;;  %v2346_v49 = vpop.f32.mrf.mxu0  ;;  %v7418_v41 = vmax.f32 %v2476_v32, 0.0 }
 0x254   : > { %3189 = vmatprep.mubr.f32.mxu0 %v7325_v4  ;;  %5467 = vmatprep.mubr.f32.mxu1 %v2718_v33  ;;  %v2440_v1 = vadd.f32 %v2342_v31, %v7223_v25  ;;  %v2439_v40 = vadd.f32 %v2337_v17, %v1741_v38  ;;  %v2347_v8 = vadd.f32 %v2346_v49, %v2121_v59  ;;  %v2989_v12 = vld [vmem:[#allocation2 + $0x118] sm:$0xff]  ;;  %v2611_v23 = vrot.slane %v7403_v20, 7  ;;  %v7429_v25 = vld [vmem:[#allocation2 + $0x90] sm:$0xff] }
 0x255   : > { %3561 = vmatprep.subr.mxu1 %v7345_v18  ;;  %5514 = vmatpush3.msra.mxu0 %v2954_v6  ;;  %v1751_v9 = vadd.f32 %v7230_v47, %v7138_v56  ;;  %v7425_v37 = vsel %vm414_vm1, %v2607_v3, %v2608_v5  ;;  %2682 = vst [vmem:[#allocation2 + $0x120] sm:$0xfe] %v2607_v3  ;;  %2797 = vst [vmem:[#allocation2 + $0x178] sm:$0x7f] %v2723_v10  ;;  %v2123_v0 = vpop.f32.mrf.mxu1  ;;  %v7431_v26 = vpop.f32.mrf.mxu0  ;;  %v2610_v56 = vrot.slane %v7418_v41, 7  ;;  %v2952_v6 = vld [vmem:[#allocation8 + $0x140] sm:$0xff] }
 0x256   : > { %v2721_v4 = vsel %vm527_vm0, %v2719_v44, %v2720_v60  ;;  %3562 = vmatpush1.msra.mxu1 %v2924_v24  ;;  %5515 = vmatprep.subr.mxu0 %v2953_v52  ;;  %2683 = vst [vmem:[#allocation2 + $0x138] sm:$0xff] %v7425_v37  ;;  %2540 = vst [vmem:[#allocation2 + $0x158] sm:$0xff] %v7418_v41  ;;  %v2722_v47 = vrot.slane %v7418_v41, 1  ;;  %v2479_v53 = vadd.f32 %v7269_v58, %v2440_v1  ;;  %v2951_v5 = vld [vmem:[#allocation8 + $0x138] sm:$0xff] }
 0x257   : > { %2794 = vst [vmem:[#allocation2 + $0x130] sm:$0xff] %v2721_v4  ;;  %v2478_v36 = vadd.f32 %v7269_v58, %v2439_v40  ;;  %3190 = vmatmul.mubr.f32.gmra.mxu0 %v7429_v25  ;;  %5468 = vmatmul.mubr.f32.gmra.mxu1 %v2989_v12  ;;  %v2441_v15 = vadd.f32 %v2347_v8, %v1751_v9  ;;  %v2126_v63 = vpop.f32.mrf.mxu1  ;;  %2684 = vst [vmem:[#allocation2 + $0x150] sm:$0xfe] %v2610_v56  ;;  %v2356_v62 = vpop.f32.mrf.mxu0  ;;  %v2921_v9 = vld [vmem:[#allocation8 + $0x48] sm:$0xff] }
 0x258   : > { %3194 = vmatprep.mubr.f32.mxu0 %v7312_v14  ;;  %5470 = vmatprep.mubr.f32.mxu1 %v2721_v4  ;;  %v7442_v16 = vsel %vm414_vm1, %v2610_v56, %v2611_v23  ;;  %v2724_v42 = vsel %vm527_vm0, %v2722_v47, %v2723_v10  ;;  %v7445_v33 = vmax.f32 %v2479_v53, 0.0  ;;  %v2352_v14 = vadd.f32 %v7406_v61, %v2126_v63  ;;  %v2922_v61 = vld [vmem:[#allocation8 + $0x50] sm:$0xff]  ;;  %v2920_v53 = vld [vmem:[#allocation8 + $0x40] sm:$0xff] }
 0x259   : > { %v7447_v60 = vmax.f32 %v2478_v36, 0.0  ;;  %3563 = vmatprep.subr.mxu1 %v7345_v18  ;;  %5516 = vmatpush3.msra.mxu0 %v2953_v52  ;;  %2685 = vst [vmem:[#allocation2 + $0x168] sm:$0xff] %v7442_v16  ;;  %2796 = vst [vmem:[#allocation2 + $0x160] sm:$0xff] %v2724_v42  ;;  %v2480_v32 = vadd.f32 %v7269_v58, %v2441_v15  ;;  %v2128_v31 = vpop.f32.mrf.mxu1  ;;  %v2995_v19 = vld [vmem:[#allocation2 + $0x148] sm:$0xff]  ;;  %v1761_v3 = vadd.f32 %v7235_v50, %v7147_v35  ;;  %v7477_v8 = vpop.f32.mrf.mxu0  ;;  %v2950_v4 = vld [vmem:[#allocation8 + $0x130] sm:$0xff] }
 0x25a   : > { %3564 = vmatpush1.msra.mxu1 %v2923_v43  ;;  %5517 = vmatprep.subr.mxu0 %v2952_v6  ;;  %2543 = vst [vmem:[#allocation2 + $0x1a0] sm:$0xff] %v7445_v33  ;;  %v2614_v38 = vrot.slane %v7445_v33, 7  ;;  %v2726_v17 = vrot.slane %v7445_v33, 1  ;;  %v2442_v10 = vadd.f32 %v2352_v14, %v7228_v45 }
 0x25b   : > { %2542 = vst [vmem:[#allocation2 + $0x188] sm:$0xff] %v7447_v60  ;;  %v2613_v24 = vrot.slane %v7447_v60, 7  ;;  %v2725_v52 = vrot.slane %v7447_v60, 1  ;;  %3195 = vmatmul.mubr.f32.gmra.mxu0 %v7352_v29  ;;  %5471 = vmatmul.mubr.f32.gmra.mxu1 %v2995_v19  ;;  %v7462_v44 = vmax.f32 %v2480_v32, 0.0  ;;  %v2131_v59 = vpop.f32.mrf.mxu1  ;;  %v2366_v63 = vpop.f32.mrf.mxu0  ;;  %v1771_v19 = vadd.f32 %v7240_v2, %v7155_v28 }
 0x25c   : > { %3199 = vmatprep.mubr.f32.mxu0 %v7343_v30  ;;  %5473 = vmatprep.mubr.f32.mxu1 %v2724_v42  ;;  %2799 = vst [vmem:[#allocation2 + $0x1a8] sm:$0x7f] %v2726_v17  ;;  %v2357_v1 = vadd.f32 %v2356_v62, %v2131_v59  ;;  %v3001_v40 = vld [vmem:[#allocation2 + $0x178] sm:$0xff]  ;;  %v2481_v45 = vadd.f32 %v7269_v58, %v2442_v10  ;;  %v7475_v30 = vld [vmem:[#allocation2 + $0xc0] sm:$0xff] }
 0x25d   : > { %v7467_v49 = vsel %vm414_vm1, %v2613_v24, %v2614_v38  ;;  %2686 = vst [vmem:[#allocation2 + $0x180] sm:$0xfe] %v2613_v24  ;;  %v2727_v29 = vsel %vm527_vm0, %v2725_v52, %v2726_v17  ;;  %3565 = vmatprep.subr.mxu1 %v7345_v18  ;;  %5518 = vmatpush3.msra.mxu0 %v2952_v6  ;;  %2544 = vst [vmem:[#allocation2 + $0x1b8] sm:$0xff] %v7462_v44  ;;  %v2616_v35 = vrot.slane %v7462_v44, 7  ;;  %v2133_v50 = vpop.f32.mrf.mxu1  ;;  %v2919_v42 = vld [vmem:[#allocation8 + $0x38] sm:$0xff]  ;;  %v2918_v17 = vld [vmem:[#allocation8 + $0x30] sm:$0xff]  ;;  %v7509_v52 = vpop.f32.mrf.mxu0 }
 0x25e   : > { %2687 = vst [vmem:[#allocation2 + $0x198] sm:$0xff] %v7467_v49  ;;  %2798 = vst [vmem:[#allocation2 + $0x190] sm:$0xff] %v2727_v29  ;;  %3566 = vmatpush1.msra.mxu1 %v2922_v61  ;;  %5519 = vmatprep.subr.mxu0 %v2951_v5  ;;  %v2443_v12 = vadd.f32 %v2357_v1, %v1761_v3  ;;  %v7480_v23 = vmax.f32 %v2481_v45, 0.0  ;;  %v2728_v36 = vrot.slane %v7462_v44, 1  ;;  %v7507_v24 = vld [vmem:[#allocation2 + $0xf0] sm:$0xff]  ;;  %v2917_v61 = vld [vmem:[#allocation8 + $0x28] sm:$0xff] }
 0x25f   : > { %3200 = vmatmul.mubr.f32.gmra.mxu0 %v7475_v30  ;;  %5474 = vmatmul.mubr.f32.gmra.mxu1 %v3001_v40  ;;  %2688 = vst [vmem:[#allocation2 + $0x1b0] sm:$0xfe] %v2616_v35  ;;  %v2136_v0 = vpop.f32.mrf.mxu1  ;;  %v2376_v45 = vpop.f32.mrf.mxu0  ;;  %v2916_v50 = vld [vmem:[#allocation8 + $0x20] sm:$0xff] }
 0x260   : > { %3204 = vmatprep.mubr.f32.mxu0 %v7341_v48  ;;  %5476 = vmatprep.mubr.f32.mxu1 %v2727_v29  ;;  %v2482_v56 = vadd.f32 %v7269_v58, %v2443_v12  ;;  %v2362_v47 = vadd.f32 %v7431_v26, %v2136_v0  ;;  %2545 = vst [vmem:[#allocation2 + $0x1d0] sm:$0xff] %v7480_v23  ;;  %v2617_v43 = vrot.slane %v7480_v23, 7  ;;  %v2729_v6 = vrot.slane %v7480_v23, 1 }
 0x261   : > { %3567 = vmatprep.subr.mxu1 %v7345_v18  ;;  %5520 = vmatpush3.msra.mxu0 %v2951_v5  ;;  %v2138_v15 = vpop.f32.mrf.mxu1  ;;  %v2949_v5 = vld [vmem:[#allocation8 + $0x128] sm:$0xff] }
 0x262   : > { %3568 = vmatpush1.msra.mxu1 %v2921_v9  ;;  %5521 = vmatprep.subr.mxu0 %v2950_v4  ;;  %v7490_v48 = vmax.f32 %v2482_v56, 0.0  ;;  %v2444_v26 = vadd.f32 %v2362_v47, %v7233_v54  ;;  %v7496_v32 = vsel %vm414_vm1, %v2616_v35, %v2617_v43  ;;  %v2730_v14 = vsel %vm527_vm0, %v2728_v36, %v2729_v6  ;;  %v2915_v56 = vld [vmem:[#allocation8 + $0x18] sm:$0xff]  ;;  %v7539_v43 = vld [vmem:[#allocation2 + $0x120] sm:$0xff] }
 0x263   : > { %3205 = vmatmul.mubr.f32.gmra.mxu0 %v7369_v34  ;;  %3569 = vmatprep.subr.mxu1 %v7345_v18  ;;  %2801 = vst [vmem:[#allocation2 + $0x1d8] sm:$0x7f] %v2729_v6  ;;  %v2141_v31 = vpop.f32.mrf.mxu1  ;;  %v3007_v62 = vld [vmem:[#allocation2 + $0x1a8] sm:$0xff]  ;;  %2689 = vst [vmem:[#allocation2 + $0x1c8] sm:$0xff] %v7496_v32  ;;  %v1781_v47 = vadd.f32 %v7245_v57, %v7163_v27  ;;  %v7541_v6 = vpop.f32.mrf.mxu0  ;;  %v2948_v15 = vld [vmem:[#allocation8 + $0x120] sm:$0xff] }
 0x264   : > { %3209 = vmatprep.mubr.f32.mxu0 %v7376_v46  ;;  %3570 = vmatpush1.msra.mxu1 %v2920_v53  ;;  %2800 = vst [vmem:[#allocation2 + $0x1c0] sm:$0xff] %v2730_v14  ;;  %2546 = vst [vmem:[#allocation2 + $0x1e8] sm:$0xff] %v7490_v48  ;;  %v2619_v54 = vrot.slane %v7490_v48, 7  ;;  %v2483_v34 = vadd.f32 %v7269_v58, %v2444_v26  ;;  %v2367_v38 = vadd.f32 %v2366_v63, %v2141_v31 }
 0x265   : > { %5477 = vmatmul.mubr.f32.gmra.mxu1 %v3007_v62  ;;  %3571 = vmatprep.subr.mxu1 %v7345_v18  ;;  %v2143_v46 = vpop.f32.mrf.mxu1  ;;  %v2731_v3 = vrot.slane %v7490_v48, 1 }
 0x266   : > { %5479 = vmatprep.mubr.f32.mxu1 %v2730_v14  ;;  %3572 = vmatpush1.msra.mxu1 %v2919_v42  ;;  %2690 = vst [vmem:[#allocation2 + $0x1e0] sm:$0xfe] %v2619_v54  ;;  %v7511_v28 = vmax.f32 %v2483_v34, 0.0  ;;  %v2445_v2 = vadd.f32 %v2367_v38, %v1771_v19  ;;  %v2947_v38 = vld [vmem:[#allocation8 + $0x118] sm:$0xff] }
 0x267   : > { %3210 = vmatmul.mubr.f32.gmra.mxu0 %v7507_v24  ;;  %3573 = vmatprep.subr.mxu1 %v7345_v18  ;;  %v2146_v10 = vpop.f32.mrf.mxu1 }
 0x268   : > { %3214 = vmatprep.mubr.f32.mxu0 %v7362_v39  ;;  %3574 = vmatpush1.msra.mxu1 %v2918_v17  ;;  %2547 = vst [vmem:[#allocation2 + $0x200] sm:$0xff] %v7511_v28  ;;  %v2620_v59 = vrot.slane %v7511_v28, 7  ;;  %v2732_v29 = vrot.slane %v7511_v28, 1  ;;  %v2484_v1 = vadd.f32 %v7269_v58, %v2445_v2  ;;  %v2372_v40 = vadd.f32 %v7477_v8, %v2146_v10 }
 0x269   : > { %3575 = vmatprep.subr.mxu1 %v7345_v18  ;;  %5522 = vmatpush3.msra.mxu0 %v2950_v4  ;;  %v2148_v35 = vpop.f32.mrf.mxu1 }
 0x26a   : > { %3576 = vmatpush1.msra.mxu1 %v2917_v61  ;;  %5523 = vmatprep.subr.mxu0 %v2949_v5  ;;  %v7524_v39 = vsel %vm414_vm1, %v2619_v54, %v2620_v59  ;;  %v2733_v12 = vsel %vm527_vm0, %v2731_v3, %v2732_v29  ;;  %2803 = vst [vmem:[#allocation2 + $0x208] sm:$0x7f] %v2732_v29  ;;  %v7527_v9 = vmax.f32 %v2484_v1, 0.0  ;;  %v3013_v8 = vld [vmem:[#allocation2 + $0x1d8] sm:$0xff]  ;;  %v2386_v54 = vpop.f32.mrf.mxu0  ;;  %v7574_v29 = vld [vmem:[#allocation2 + $0x150] sm:$0xff] }
 0x26b   : > { %v2446_v0 = vadd.f32 %v2372_v40, %v7238_v7  ;;  %3215 = vmatmul.mubr.f32.gmra.mxu0 %v7394_v51  ;;  %3577 = vmatprep.subr.mxu1 %v7345_v18  ;;  %2691 = vst [vmem:[#allocation2 + $0x1f8] sm:$0xff] %v7524_v39  ;;  %2802 = vst [vmem:[#allocation2 + $0x1f0] sm:$0xff] %v2733_v12  ;;  %v2151_v4 = vpop.f32.mrf.mxu1  ;;  %v1791_v3 = vadd.f32 %v7250_v21, %v7175_v22  ;;  %v2946_v40 = vld [vmem:[#allocation8 + $0x110] sm:$0xff] }
 0x26c   : > { %3219 = vmatprep.mubr.f32.mxu0 %v7401_v11  ;;  %5480 = vmatmul.mubr.f32.gmra.mxu1 %v3013_v8  ;;  %2548 = vst [vmem:[#allocation2 + $0x218] sm:$0xff] %v7527_v9  ;;  %v2622_v7 = vrot.slane %v7527_v9, 7  ;;  %v2377_v53 = vadd.f32 %v2376_v45, %v2151_v4  ;;  %v2914_v11 = vld [vmem:[#allocation8 + $0x10] sm:$0xff]  ;;  %v2734_v63 = vrot.slane %v7527_v9, 1  ;;  %v7576_v1 = vpop.f32.mrf.mxu0 }
 0x26d   : > { %v2485_v51 = vadd.f32 %v7269_v58, %v2446_v0  ;;  %5482 = vmatprep.mubr.f32.mxu1 %v2733_v12  ;;  %3578 = vmatpush1.msra.mxu1 %v2916_v50  ;;  %v2153_v36 = vpop.f32.mrf.mxu1 }
 0x26e   : > { %3579 = vmatprep.subr.mxu1 %v7345_v18  ;;  %5524 = vmatpush3.msra.mxu0 %v2949_v5  ;;  %2692 = vst [vmem:[#allocation2 + $0x210] sm:$0xfe] %v2622_v7  ;;  %v2447_v27 = vadd.f32 %v2377_v53, %v1781_v47  ;;  %v2912_v5 = vld [vmem:[#allocation8] sm:$0xff] }
 0x26f   : > { %v7544_v57 = vmax.f32 %v2485_v51, 0.0  ;;  %3220 = vmatmul.mubr.f32.gmra.mxu0 %v7539_v43  ;;  %3580 = vmatpush1.msra.mxu1 %v2915_v56  ;;  %v2156_v26 = vpop.f32.mrf.mxu1  ;;  %v2396_v56 = vpop.f32.mrf.mxu0 }
 0x270   : > { %3224 = vmatprep.mubr.f32.mxu0 %v7388_v55  ;;  %3581 = vmatprep.subr.mxu1 %v7345_v18  ;;  %v2486_v31 = vadd.f32 %v7269_v58, %v2447_v27  ;;  %v2382_v62 = vadd.f32 %v7509_v52, %v2156_v26  ;;  %v2913_v55 = vld [vmem:[#allocation8 + $0x8] sm:$0xff]  ;;  %v8617_v26 = vld [vmem:[#allocation48_spill] sm:$0xff] }
 0x271   : > { %2549 = vst [vmem:[#allocation2 + $0x230] sm:$0xff] %v7544_v57  ;;  %v2623_v42 = vrot.slane %v7544_v57, 7  ;;  %v2735_v14 = vrot.slane %v7544_v57, 1  ;;  %3582 = vmatpush1.msra.mxu1 %v2914_v11  ;;  %5525 = vmatprep.subr.mxu0 %v2948_v15  ;;  %v2158_v19 = vpop.f32.mrf.mxu1  ;;  %v7555_v34 = vld [vmem:[#allocation2 + $0x208] sm:$0xff] }
 0x272   : > { %3583 = vmatprep.subr.mxu1 %v7345_v18  ;;  %5526 = vmatpush3.msra.mxu0 %v2948_v15  ;;  %v7562_v2 = vmax.f32 %v2486_v31, 0.0  ;;  %v2448_v52 = vadd.f32 %v2382_v62, %v7243_v13  ;;  %v2941_v27 = vld [vmem:[#allocation8 + $0xe8] sm:$0xff]  ;;  %v7609_v19 = vld [vmem:[#allocation2 + $0x180] sm:$0xff] }
 0x273   : > { %v7559_v17 = vsel %vm414_vm1, %v2622_v7, %v2623_v42  ;;  %v2736_v46 = vsel %vm527_vm0, %v2734_v63, %v2735_v14  ;;  %2805 = vst [vmem:[#allocation2 + $0x238] sm:$0x7f] %v2735_v14  ;;  %3225 = vmatmul.mubr.f32.gmra.mxu0 %v7425_v37  ;;  %5483 = vmatmul.mubr.f32.gmra.mxu1 %v7555_v34  ;;  %v2161_v61 = vpop.f32.mrf.mxu1  ;;  %v2945_v7 = vld [vmem:[#allocation8 + $0x108] sm:$0xff]  ;;  %v8616_v63 = vld [vmem:[#allocation43_spill] sm:$0xff] }
 0x274   : > { %2693 = vst [vmem:[#allocation2 + $0x228] sm:$0xff] %v7559_v17  ;;  %2804 = vst [vmem:[#allocation2 + $0x220] sm:$0xff] %v2736_v46  ;;  %3229 = vmatprep.mubr.f32.mxu0 %v7418_v41  ;;  %5485 = vmatprep.mubr.f32.mxu1 %v2736_v46  ;;  %v2625_v10 = vrot.slane %v7562_v2, 7  ;;  %v2487_v13 = vadd.f32 %v7269_v58, %v2448_v52  ;;  %v2387_v37 = vadd.f32 %v2386_v54, %v2161_v61  ;;  %v2943_v41 = vld [vmem:[#allocation8 + $0xf8] sm:$0xff]  ;;  %v7611_v54 = vpop.f32.mrf.mxu0 }
 0x275   : > { %2550 = vst [vmem:[#allocation2 + $0x248] sm:$0xff] %v7562_v2  ;;  %3584 = vmatpush1.msra.mxu1 %v2913_v55  ;;  %5527 = vmatprep.subr.mxu0 %v2947_v38  ;;  %v2163_v59 = vpop.f32.mrf.mxu1  ;;  %v2737_v35 = vrot.slane %v7562_v2, 1  ;;  %v1801_v42 = vadd.f32 %v8617_v26, %v8616_v63  ;;  %v2944_v55 = vld [vmem:[#allocation8 + $0x100] sm:$0xff] }
 0x276   : > { %3585 = vmatprep.subr.mxu1 %v7345_v18  ;;  %5528 = vmatpush3.msra.mxu0 %v2947_v38  ;;  %2694 = vst [vmem:[#allocation2 + $0x240] sm:$0xfe] %v2625_v10  ;;  %v7579_v21 = vmax.f32 %v2487_v13, 0.0  ;;  %v2449_v22 = vadd.f32 %v2387_v37, %v1791_v3  ;;  %v7626_v3 = vld [vmem:[%s8501_s2] ss:$0 sm:$0xff]  ;;  %v2406_v37 = vpop.f32.mrf.mxu0 }
 0x277   : > { %3230 = vmatmul.mubr.f32.gmra.mxu0 %v7574_v29  ;;  %3586 = vmatpush1.msra.mxu1 %v2912_v5  ;;  %v2166_v45 = vpop.f32.mrf.mxu1 }
 0x278   : > { %3234 = vmatprep.mubr.f32.mxu0 %v7403_v20  ;;  %3587 = vmatprep.subr.mxu1 %v7345_v18  ;;  %2551 = vst [vmem:[#allocation2 + $0x260] sm:$0xff] %v7579_v21  ;;  %v2626_v50 = vrot.slane %v7579_v21, 7  ;;  %v2738_v12 = vrot.slane %v7579_v21, 1  ;;  %v2488_v0 = vadd.f32 %v7269_v58, %v2449_v22  ;;  %v2392_v8 = vadd.f32 %v7541_v6, %v2166_v45  ;;  %v2942_v20 = vld [vmem:[#allocation8 + $0xf0] sm:$0xff]  ;;  %v8615_v6 = vld [vmem:[#allocation46_spill] sm:$0xff] }
 0x279   : > { %3588 = vmatpush2.msra.mxu1 %v2943_v41  ;;  %5529 = vmatprep.subr.mxu0 %v2946_v40  ;;  %v2168_v4 = vpop.f32.mrf.mxu1  ;;  %v2939_v41 = vld [vmem:[#allocation8 + $0xd8] sm:$0xff]  ;;  %v8618_v45 = vld [vmem:[#allocation47_spill] sm:$0xff] }
 0x27a   : > { %v7590_v47 = vld [vmem:[#allocation2 + $0x238] sm:$0xff]  ;;  %3589 = vmatprep.subr.mxu1 %v7345_v18  ;;  %5530 = vmatpush3.msra.mxu0 %v2946_v40  ;;  %v7594_v51 = vsel %vm414_vm1, %v2625_v10, %v2626_v50  ;;  %v2739_v53 = vsel %vm527_vm0, %v2737_v35, %v2738_v12  ;;  %2807 = vst [vmem:[#allocation2 + $0x268] sm:$0x7f] %v2738_v12  ;;  %v7597_v36 = vmax.f32 %v2488_v0, 0.0  ;;  %v2938_v12 = vld [vmem:[#allocation8 + $0xd0] sm:$0xff] }
 0x27b   : > { %v2450_v11 = vadd.f32 %v2392_v8, %v8615_v6  ;;  %3235 = vmatmul.mubr.f32.gmra.mxu0 %v7442_v16  ;;  %5486 = vmatmul.mubr.f32.gmra.mxu1 %v7590_v47  ;;  %2695 = vst [vmem:[#allocation2 + $0x258] sm:$0xff] %v7594_v51  ;;  %2806 = vst [vmem:[#allocation2 + $0x250] sm:$0xff] %v2739_v53  ;;  %v2171_v15 = vpop.f32.mrf.mxu1  ;;  %v8619_v0 = vld [vmem:[#allocation44_spill] sm:$0xff]  ;;  %v8620_v8 = vld [vmem:[#allocation50_spill] sm:$0xff]  ;;  %v5422_v6 = vpop.f32.mrf.mxu0 }
 0x27c   : > { %3239 = vmatprep.mubr.f32.mxu0 %v7447_v60  ;;  %5488 = vmatprep.mubr.f32.mxu1 %v2739_v53  ;;  %2552 = vst [vmem:[#allocation2 + $0x278] sm:$0xff] %v7597_v36  ;;  %v2628_v14 = vrot.slane %v7597_v36, 7  ;;  %v2397_v16 = vadd.f32 %v2396_v56, %v2171_v15  ;;  %v2940_v60 = vld [vmem:[#allocation8 + $0xe0] sm:$0xff]  ;;  %v1811_v4 = vadd.f32 %v8620_v8, %v8619_v0  ;;  %v7650_v53 = vld [vmem:[#allocation2 + $0x1b0] sm:$0xff] }
 0x27d   : > { %v2489_v31 = vadd.f32 %v7269_v58, %v2450_v11  ;;  %3590 = vmatpush2.msra.mxu1 %v2942_v20  ;;  %5531 = vmatprep.subr.mxu0 %v2945_v7  ;;  %v2173_v62 = vpop.f32.mrf.mxu1  ;;  %v2740_v58 = vrot.slane %v7597_v36, 1 }
 0x27e   : > { %3591 = vmatprep.subr.mxu1 %v7345_v18  ;;  %5532 = vmatpush3.msra.mxu0 %v2945_v7  ;;  %2696 = vst [vmem:[#allocation2 + $0x270] sm:$0xfe] %v2628_v14  ;;  %v2451_v46 = vadd.f32 %v2397_v16, %v1801_v42  ;;  %v2416_v62 = vpop.f32.mrf.mxu0 }
 0x27f   : > { %v7614_v38 = vmax.f32 %v2489_v31, 0.0  ;;  %3240 = vmatmul.mubr.f32.gmra.mxu0 %v7609_v19  ;;  %3592 = vmatpush2.msra.mxu1 %v2941_v27  ;;  %v2176_v52 = vpop.f32.mrf.mxu1 }
 0x280   : > { %3244 = vmatprep.mubr.f32.mxu0 %v7445_v33  ;;  %3593 = vmatprep.subr.mxu1 %v7345_v18  ;;  %v2490_v10 = vadd.f32 %v7626_v3, %v2451_v46  ;;  %v2402_v13 = vadd.f32 %v7576_v1, %v2176_v52  ;;  %v8621_v52 = vld [vmem:[#allocation49_spill] sm:$0xff] }
 0x281   : > { %2553 = vst [vmem:[#allocation2 + $0x290] sm:$0xff] %v7614_v38  ;;  %v2629_v61 = vrot.slane %v7614_v38, 7  ;;  %v2741_v5 = vrot.slane %v7614_v38, 1  ;;  %3594 = vmatpush2.msra.mxu1 %v2940_v60  ;;  %5533 = vmatprep.subr.mxu0 %v2944_v55  ;;  %v2178_v33 = vpop.f32.mrf.mxu1  ;;  %v7630_v59 = vld [vmem:[#allocation2 + $0x268] sm:$0xff] }
 0x282   : > { %3595 = vmatprep.subr.mxu1 %v7345_v18  ;;  %5534 = vmatpush3.msra.mxu0 %v2944_v55  ;;  %v7637_v35 = vmax.f32 %v2490_v10, 0.0  ;;  %v2452_v1 = vadd.f32 %v2402_v13, %v8618_v45  ;;  %v8622_v10 = vld [vmem:[#allocation45_spill] sm:$0xff]  ;;  %v8623_v13 = vld [vmem:[#allocation52_spill] sm:$0xff] }
 0x283   : > { %v7634_v40 = vsel %vm414_vm1, %v2628_v14, %v2629_v61  ;;  %v2742_v22 = vsel %vm527_vm0, %v2740_v58, %v2741_v5  ;;  %2809 = vst [vmem:[#allocation2 + $0x298] sm:$0x7f] %v2741_v5  ;;  %3245 = vmatmul.mubr.f32.gmra.mxu0 %v7467_v49  ;;  %5489 = vmatmul.mubr.f32.gmra.mxu1 %v7630_v59  ;;  %v2181_v50 = vpop.f32.mrf.mxu1  ;;  %v2935_v5 = vld [vmem:[#allocation8 + $0xb8] sm:$0xff]  ;;  %v7687_v45 = vld [vmem:[#allocation2 + $0x1e0] sm:$0xff] }
 0x284   : > { %2697 = vst [vmem:[#allocation2 + $0x288] sm:$0xff] %v7634_v40  ;;  %2808 = vst [vmem:[#allocation2 + $0x280] sm:$0xff] %v2742_v22  ;;  %3249 = vmatprep.mubr.f32.mxu0 %v7462_v44  ;;  %5491 = vmatprep.mubr.f32.mxu1 %v2742_v22  ;;  %v2631_v56 = vrot.slane %v7637_v35, 7  ;;  %v2491_v20 = vadd.f32 %v7626_v3, %v2452_v1  ;;  %v2407_v49 = vadd.f32 %v2406_v37, %v2181_v50  ;;  %v2937_v44 = vld [vmem:[#allocation8 + $0xc8] sm:$0xff] }
 0x285   : > { %2554 = vst [vmem:[#allocation2 + $0x2a8] sm:$0xff] %v7637_v35  ;;  %3596 = vmatpush2.msra.mxu1 %v2939_v41  ;;  %4150 = vmatprep.subr.mxu0 %v7345_v18  ;;  %v2183_v7 = vpop.f32.mrf.mxu1  ;;  %v2743_v27 = vrot.slane %v7637_v35, 1  ;;  %v1821_v33 = vadd.f32 %v8623_v13, %v8622_v10  ;;  %v2928_v10 = vld [vmem:[#allocation8 + $0x80] sm:$0xff]  ;;  %v4149_v13 = vld [vmem:[#allocation8 + $0x478] sm:$0xff] }
 0x286   : > { %3597 = vmatprep.subr.mxu1 %v7345_v18  ;;  %2698 = vst [vmem:[#allocation2 + $0x2a0] sm:$0xfe] %v2631_v56  ;;  %v7653_v11 = vmax.f32 %v2491_v20, 0.0  ;;  %v2453_v15 = vadd.f32 %v2407_v49, %v1811_v4  ;;  %v2933_v7 = vld [vmem:[#allocation8 + $0xa8] sm:$0xff] }
 0x287   : > { %3250 = vmatmul.mubr.f32.gmra.mxu0 %v7650_v53  ;;  %3598 = vmatpush2.msra.mxu1 %v2938_v12  ;;  %v2186_v63 = vpop.f32.mrf.mxu1 }
 0x288   : > { %3254 = vmatprep.mubr.f32.mxu0 %v7480_v23  ;;  %3599 = vmatprep.subr.mxu1 %v7345_v18  ;;  %2555 = vst [vmem:[#allocation2 + $0x2c0] sm:$0xff] %v7653_v11  ;;  %v2632_v26 = vrot.slane %v7653_v11, 7  ;;  %v2744_v42 = vrot.slane %v7653_v11, 1  ;;  %v2492_v14 = vadd.f32 %v7626_v3, %v2453_v15  ;;  %v2412_v31 = vadd.f32 %v7611_v54, %v2186_v63  ;;  %v2936_v23 = vld [vmem:[#allocation8 + $0xc0] sm:$0xff]  ;;  %v8624_v63 = vld [vmem:[#allocation51_spill] sm:$0xff] }
 0x289   : > { %3600 = vmatpush2.msra.mxu1 %v2937_v44  ;;  %v2188_v16 = vpop.f32.mrf.mxu1 }
 0x28a   : > { %v7664_v60 = vld [vmem:[#allocation2 + $0x298] sm:$0xff]  ;;  %3601 = vmatprep.subr.mxu1 %v7345_v18  ;;  %v7668_v55 = vsel %vm414_vm1, %v2631_v56, %v2632_v26  ;;  %v7671_v46 = vsel %vm527_vm0, %v2743_v27, %v2744_v42  ;;  %2811 = vst [vmem:[#allocation2 + $0x2c8] sm:$0x7f] %v2744_v42  ;;  %v7673_v58 = vmax.f32 %v2492_v14, 0.0  ;;  %v2454_v61 = vadd.f32 %v2412_v31, %v8621_v52  ;;  %v7721_v14 = vld [vmem:[#allocation2 + $0x210] sm:$0xff] }
 0x28b   : > { %3255 = vmatmul.mubr.f32.gmra.mxu0 %v7496_v32  ;;  %5492 = vmatmul.mubr.f32.gmra.mxu1 %v7664_v60  ;;  %2699 = vst [vmem:[#allocation2 + $0x2b8] sm:$0xff] %v7668_v55  ;;  %2810 = vst [vmem:[#allocation2 + $0x2b0] sm:$0xff] %v7671_v46  ;;  %v2191_v54 = vpop.f32.mrf.mxu1  ;;  %v2931_v31 = vld [vmem:[#allocation8 + $0x98] sm:$0xff]  ;;  %v2930_v52 = vld [vmem:[#allocation8 + $0x90] sm:$0xff] }
 0x28c   : > { %3259 = vmatprep.mubr.f32.mxu0 %v7490_v48  ;;  %5494 = vmatprep.mubr.f32.mxu1 %v7671_v46  ;;  %2556 = vst [vmem:[#allocation2 + $0x2d8] sm:$0xff] %v7673_v58  ;;  %v2634_v37 = vrot.slane %v7673_v58, 7  ;;  %v2493_v32 = vadd.f32 %v7626_v3, %v2454_v61  ;;  %v2417_v41 = vadd.f32 %v2416_v62, %v2191_v54  ;;  %v2934_v48 = vld [vmem:[#allocation8 + $0xb0] sm:$0xff]  ;;  %v2746_v12 = vrot.slane %v7673_v58, 1  ;;  %v2929_v54 = vld [vmem:[#allocation8 + $0x88] sm:$0xff] }
 0x28d   : > { %3602 = vmatpush2.msra.mxu1 %v2936_v23  ;;  %v2193_v22 = vpop.f32.mrf.mxu1 }
 0x28e   : > { %3603 = vmatprep.subr.mxu1 %v7345_v18  ;;  %2700 = vst [vmem:[#allocation2 + $0x2d0] sm:$0xfe] %v2634_v37  ;;  %v7690_v1 = vmax.f32 %v2493_v32, 0.0  ;;  %v2455_v50 = vadd.f32 %v2417_v41, %v1821_v33  ;;  %v4148_v33 = vld [vmem:[#allocation8 + $0x470] sm:$0xff]  ;;  %v4146_v32 = vld [vmem:[#allocation8 + $0x460] sm:$0xff]  ;;  %v4145_v41 = vld [vmem:[#allocation8 + $0x458] sm:$0xff] }
 0x28f   : > { %3260 = vmatmul.mubr.f32.gmra.mxu0 %v7687_v45  ;;  %3604 = vmatpush2.msra.mxu1 %v2935_v5  ;;  %v2196_v0 = vpop.f32.mrf.mxu1  ;;  %v7746_v5 = vld [vmem:[#allocation2 + $0x240] sm:$0xff] }
 0x290   : > { %3264 = vmatprep.mubr.f32.mxu0 %v7511_v28  ;;  %3605 = vmatprep.subr.mxu1 %v7345_v18  ;;  %2557 = vst [vmem:[#allocation2 + $0x2f0] sm:$0xff] %v7690_v1  ;;  %v2635_v8 = vrot.slane %v7690_v1, 7  ;;  %v2747_v4 = vrot.slane %v7690_v1, 1  ;;  %v2494_v56 = vadd.f32 %v7626_v3, %v2455_v50  ;;  %v2422_v20 = vadd.f32 %v5422_v6, %v2196_v0  ;;  %v7787_v50 = vld [vmem:[#allocation2 + $0x98] sm:$0xff] }
 0x291   : > { %3606 = vmatpush2.msra.mxu1 %v2934_v48  ;;  %v7700_v49 = vld [vmem:[#allocation2 + $0x2c8] sm:$0xff]  ;;  %v2198_v44 = vpop.f32.mrf.mxu1  ;;  %v7775_v48 = vld [vmem:[#allocation2 + $0x60] sm:$0xff] }
 0x292   : > { %3607 = vmatprep.subr.mxu1 %v7345_v18  ;;  %v7704_v28 = vsel %vm414_vm1, %v2634_v37, %v2635_v8  ;;  %v7707_v15 = vsel %vm527_vm0, %v2746_v12, %v2747_v4  ;;  %2813 = vst [vmem:[#allocation2 + $0x2f8] sm:$0x7f] %v2747_v4  ;;  %v7709_v27 = vmax.f32 %v2494_v56, 0.0  ;;  %v2456_v26 = vadd.f32 %v2422_v20, %v8624_v63  ;;  %v2932_v18 = vld [vmem:[#allocation8 + $0xa0] sm:$0xff]  ;;  %v2822_v37 = vld [vmem:[#allocation2 + $0x30] sm:$0xff]  ;;  %v4143_v12 = vld [vmem:[#allocation8 + $0x448] sm:$0xff] }
 0x293   : > { %3265 = vmatmul.mubr.f32.gmra.mxu0 %v7524_v39  ;;  %5495 = vmatmul.mubr.f32.gmra.mxu1 %v7700_v49  ;;  %2701 = vst [vmem:[#allocation2 + $0x2e8] sm:$0xff] %v7704_v28  ;;  %2812 = vst [vmem:[#allocation2 + $0x2e0] sm:$0xff] %v7707_v15  ;;  %v7723_v39 = vld [vmem:[#allocation2] sm:$0xff]  ;;  %v7796_v4 = vld [vmem:[#allocation2 + $0xa8] sm:$0xff] }
 0x294   : > { %3269 = vmatprep.mubr.f32.mxu0 %v7527_v9  ;;  %5497 = vmatprep.mubr.f32.mxu1 %v7707_v15  ;;  %2558 = vst [vmem:[#allocation2 + $0x308] sm:$0xff] %v7709_v27  ;;  %v2637_v6 = vrot.slane %v7709_v27, 7  ;;  %v2495_v42 = vadd.f32 %v7626_v3, %v2456_v26  ;;  %v2749_v9 = vrot.slane %v7709_v27, 1  ;;  %v4142_v8 = vld [vmem:[#allocation8 + $0x440] sm:$0xff]  ;;  %v7800_v56 = vld [vmem:[#allocation2 + $0xc8] sm:$0xff]  ;;  %v4141_v20 = vld [vmem:[#allocation8 + $0x438] sm:$0xff] }
 0x295   : > { %3608 = vmatpush2.msra.mxu1 %v2933_v7  ;;  %v7773_v22 = vld [vmem:[#allocation2 + $0x2d0] sm:$0xff]  ;;  %v2824_v7 = vld [vmem:[#allocation2 + $0x40] sm:$0xff]  ;;  %v4115_v63 = vld [vmem:[#allocation8 + $0x368] sm:$0xff] }
 0x296   : > { %3609 = vmatprep.subr.mxu1 %v7723_v39  ;;  %2702 = vst [vmem:[#allocation2 + $0x300] sm:$0xfe] %v2637_v6  ;;  %v7726_v16 = vmax.f32 %v2495_v42, 0.0  ;;  %v4116_v44 = vld [vmem:[#allocation8 + $0x370] sm:$0xff]  ;;  %v7811_v26 = vld [vmem:[#allocation2 + $0xd8] sm:$0xff]  ;;  %v4114_v42 = vld [vmem:[#allocation8 + $0x360] sm:$0xff] }
 0x297   : > { %3270 = vmatmul.mubr.f32.gmra.mxu0 %v7721_v14  ;;  %3610 = vmatpush2.msra.mxu1 %v2932_v18  ;;  %v4140_v18 = vld [vmem:[#allocation8 + $0x430] sm:$0xff] }
 0x298   : > { %3274 = vmatprep.mubr.f32.mxu0 %v7544_v57  ;;  %3611 = vmatprep.subr.mxu1 %v7723_v39  ;;  %2559 = vst [vmem:[#allocation2 + $0x320] sm:$0xff] %v7726_v16  ;;  %v2638_v3 = vrot.slane %v7726_v16, 7  ;;  %v2750_v62 = vrot.slane %v7726_v16, 1 }
 0x299   : > { %3612 = vmatpush2.msra.mxu1 %v2931_v31  ;;  %v7735_v23 = vld [vmem:[#allocation2 + $0x2f8] sm:$0xff]  ;;  %v7821_v31 = vld [vmem:[#allocation2 + $0x88] sm:$0xff] }
 0x29a   : > { %3613 = vmatprep.subr.mxu1 %v7723_v39  ;;  %v7739_v61 = vsel %vm414_vm1, %v2637_v6, %v2638_v3  ;;  %v2751_v57 = vsel %vm527_vm0, %v2749_v9, %v2750_v62  ;;  %2815 = vst [vmem:[#allocation2 + $0x328] sm:$0x7f] %v2750_v62  ;;  %5498 = vmatmul.mubr.f32.gmra.mxu1 %v7735_v23  ;;  %v7817_v6 = vld [vmem:[#allocation2 + $0xf8] sm:$0xff]  ;;  %v7825_v9 = vld [vmem:[#allocation2 + $0xa0] sm:$0xff]  ;;  %v4139_v3 = vld [vmem:[#allocation8 + $0x428] sm:$0xff] }
 0x29b   : > { %3275 = vmatmul.mubr.f32.gmra.mxu0 %v7559_v17  ;;  %2703 = vst [vmem:[#allocation2 + $0x318] sm:$0xff] %v7739_v61  ;;  %2814 = vst [vmem:[#allocation2 + $0x310] sm:$0xff] %v2751_v57  ;;  %5500 = vmatprep.mubr.f32.mxu1 %v2751_v57  ;;  %v7829_v62 = vld [vmem:[#allocation2 + $0x110] sm:$0xff]  ;;  %v4111_v57 = vld [vmem:[#allocation8 + $0x348] sm:$0xff] }
 0x29c   : > { %3279 = vmatprep.mubr.f32.mxu0 %v7562_v2  ;;  %3614 = vmatpush2.msra.mxu1 %v2930_v52  ;;  %v7755_v2 = vld [vmem:[#allocation2 + $0x270] sm:$0xff] }
 0x29d   : > { %3615 = vmatprep.subr.mxu1 %v7723_v39  ;;  %v3050_v0 = vld [vmem:[#allocation2 + $0x300] sm:$0xff]  ;;  %v4112_v52 = vld [vmem:[#allocation8 + $0x350] sm:$0xff] }
 0x29e   : > { %3616 = vmatpush2.msra.mxu1 %v2929_v54  ;;  %v7839_v54 = vld [vmem:[#allocation2 + $0xd0] sm:$0xff] }
 0x29f   : > { %3280 = vmatmul.mubr.f32.gmra.mxu0 %v7746_v5  ;;  %3617 = vmatprep.subr.mxu1 %v7723_v39 }
 0x2a0   : > { %3284 = vmatprep.mubr.f32.mxu0 %v7579_v21  ;;  %3618 = vmatpush2.msra.mxu1 %v2928_v10  ;;  %v2823_v21 = vld [vmem:[#allocation2 + $0x38] sm:$0xff]  ;;  %v4138_v10 = vld [vmem:[#allocation8 + $0x420] sm:$0xff] }
 0x2a1   : > { %v3055_v17 = vld [vmem:[#allocation2 + $0x328] sm:$0xff]  ;;  %5583 = vmatprep.subr.mxu1 %v4149_v13 }
 0x2a2   : > { %5501 = vmatmul.mubr.f32.gmra.mxu1 %v3055_v17  ;;  %v4110_v17 = vld [vmem:[#allocation8 + $0x340] sm:$0xff] }
 0x2a3   : > { %3285 = vmatmul.mubr.f32.gmra.mxu0 %v7594_v51  ;;  %3619 = vmatprep.mubr.f32.mxu1 %v7723_v39  ;;  %v4147_v51 = vld [vmem:[#allocation8 + $0x468] sm:$0xff] }
 0x2a4   : > { %3289 = vmatprep.mubr.f32.mxu0 %v7597_v36  ;;  %v7764_v36 = vld [vmem:[#allocation2 + $0x2a0] sm:$0xff] }
 0x2a6   : > { %3620 = vmatmul.mubr.f32.vlgmr.msra.gmra.mxu1 %v7723_v39 }
 0x2a7   : > { %3290 = vmatmul.mubr.f32.gmra.mxu0 %v7755_v2  ;;  %3624 = vmatprep.mubr.f32.mxu1 %v7723_v39 }
 0x2a8   : > { %3294 = vmatprep.mubr.f32.mxu0 %v7614_v38  ;;  %5584 = vmatpush3.msra.mxu1 %v4149_v13  ;;  %v2826_v38 = vld [vmem:[#allocation2 + $0x50] sm:$0xff]  ;;  %v7843_v13 = vld [vmem:[#allocation2 + $0x128] sm:$0xff] }
 0x2a9   : > { %5585 = vmatprep.subr.mxu1 %v4148_v33 }
 0x2aa   : > { %3625 = vmatmul.mubr.f32.gmra.mxu1 %v7723_v39 }
 0x2ab   : > { %3295 = vmatmul.mubr.f32.gmra.mxu0 %v7634_v40  ;;  %3629 = vmatprep.mubr.f32.mxu1 %v2823_v21  ;;  %v2825_v40 = vld [vmem:[#allocation2 + $0x48] sm:$0xff]  ;;  %v4109_v21 = vld [vmem:[#allocation8 + $0x338] sm:$0xff] }
 0x2ac   : > { %3299 = vmatprep.mubr.f32.mxu0 %v7637_v35  ;;  %5586 = vmatpush3.msra.mxu1 %v4148_v33  ;;  %v7769_v35 = vld [vmem:[#allocation2 + $0x68] sm:$0xff] }
 0x2ad   : > { %5587 = vmatprep.subr.mxu1 %v4147_v51  ;;  %v7847_v33 = vld [vmem:[#allocation2 + $0xe8] sm:$0xff] }
 0x2ae   : > { %3630 = vmatmul.mubr.f32.gmra.mxu1 %v2822_v37  ;;  %v4137_v37 = vld [vmem:[#allocation8 + $0x418] sm:$0xff] }
 0x2af   : > { %3300 = vmatmul.mubr.f32.gmra.mxu0 %v7764_v36  ;;  %3634 = vmatprep.mubr.f32.mxu1 %v2826_v38  ;;  %v7855_v38 = vld [vmem:[#allocation2 + $0x140] sm:$0xff] }
 0x2b0   : > { %3304 = vmatprep.mubr.f32.mxu0 %v7653_v11  ;;  %5588 = vmatpush3.msra.mxu1 %v4147_v51  ;;  %v7779_v11 = vld [vmem:[#allocation2 + $0x80] sm:$0xff] }
 0x2b1   : > { %5589 = vmatprep.subr.mxu1 %v4146_v32  ;;  %v7851_v51 = vld [vmem:[#allocation2 + $0x100] sm:$0xff] }
 0x2b2   : > { %3635 = vmatmul.mubr.f32.gmra.mxu1 %v2825_v40  ;;  %v7859_v40 = vld [vmem:[#allocation2 + $0x118] sm:$0xff] }
 0x2b3   : > { %3305 = vmatmul.mubr.f32.gmra.mxu0 %v7668_v55  ;;  %3639 = vmatprep.mubr.f32.mxu1 %v7769_v35  ;;  %v4144_v55 = vld [vmem:[#allocation8 + $0x450] sm:$0xff] }
 0x2b4   : > { %3309 = vmatprep.mubr.f32.mxu0 %v7673_v58  ;;  %5590 = vmatpush3.msra.mxu1 %v4146_v32  ;;  %v7783_v58 = vld [vmem:[#allocation2 + $0x78] sm:$0xff]  ;;  %v4108_v32 = vld [vmem:[#allocation8 + $0x330] sm:$0xff] }
 0x2b5   : > { %5591 = vmatprep.subr.mxu1 %v4145_v41 }
 0x2b6   : > { %3640 = vmatmul.mubr.f32.gmra.mxu1 %v7775_v48 }
 0x2b7   : > { %3310 = vmatmul.mubr.f32.gmra.mxu0 %v7773_v22  ;;  %3644 = vmatprep.mubr.f32.mxu1 %v7779_v11 }
 0x2b8   : > { %3314 = vmatprep.mubr.f32.mxu0 %v7690_v1  ;;  %5592 = vmatpush3.msra.mxu1 %v4145_v41  ;;  %v7792_v1 = vld [vmem:[#allocation2 + $0xb0] sm:$0xff]  ;;  %v4107_v41 = vld [vmem:[#allocation8 + $0x328] sm:$0xff] }
 0x2b9   : > { %5593 = vmatprep.subr.mxu1 %v4144_v55 }
 0x2ba   : > { %3645 = vmatmul.mubr.f32.gmra.mxu1 %v7783_v58 }
 0x2bb   : > { %3315 = vmatmul.mubr.f32.gmra.mxu0 %v7704_v28  ;;  %3649 = vmatprep.mubr.f32.mxu1 %v7787_v50  ;;  %v7806_v28 = vld [vmem:[#allocation2 + $0xe0] sm:$0xff] }
 0x2bc   : > { %3319 = vmatprep.mubr.f32.mxu0 %v7709_v27  ;;  %5594 = vmatpush3.msra.mxu1 %v4144_v55  ;;  %v2827_v27 = vld [vmem:[#allocation2 + $0x58] sm:$0xff]  ;;  %v7865_v55 = vld [vmem:[#allocation2 + $0x130] sm:$0xff] }
 0x2bd   : > { %5595 = vmatprep.subr.mxu1 %v4143_v12 }
 0x2be   : > { %3650 = vmatmul.mubr.f32.gmra.mxu1 %v7429_v25  ;;  %v4117_v25 = vld [vmem:[#allocation8 + $0x378] sm:$0xff] }
 0x2bf   : > { %3320 = vmatmul.mubr.f32.gmra.mxu0 %v3050_v0  ;;  %3654 = vmatprep.mubr.f32.mxu1 %v7792_v1  ;;  %v7869_v0 = vld [vmem:[#allocation2 + $0x158] sm:$0xff] }
 0x2c0   : > { %3324 = vmatprep.mubr.f32.mxu0 %v7726_v16  ;;  %5596 = vmatpush3.msra.mxu1 %v4143_v12  ;;  %v4113_v16 = vld [vmem:[#allocation8 + $0x358] sm:$0xff]  ;;  %v4136_v12 = vld [vmem:[#allocation8 + $0x410] sm:$0xff] }
 0x2c1   : > { %5597 = vmatprep.subr.mxu1 %v4142_v8 }
 0x2c2   : > { %3655 = vmatmul.mubr.f32.gmra.mxu1 %v7796_v4 }
 0x2c3   : > { %3325 = vmatmul.mubr.f32.gmra.mxu0 %v7739_v61  ;;  %3659 = vmatprep.mubr.f32.mxu1 %v7800_v56  ;;  %v7833_v61 = vld [vmem:[#allocation2 + $0xb8] sm:$0xff] }
 0x2c4   : > { %5535 = vmatprep.mubr.f32.mxu0 %v7723_v39  ;;  %5598 = vmatpush3.msra.mxu1 %v4142_v8  ;;  %v4106_v8 = vld [vmem:[#allocation8 + $0x320] sm:$0xff] }
 0x2c5   : > { %5599 = vmatprep.subr.mxu1 %v4141_v20 }
 0x2c6   : > { %3660 = vmatmul.mubr.f32.gmra.mxu1 %v7475_v30  ;;  %v7813_v30 = vld [vmem:[#allocation2 + $0x70] sm:$0xff] }
 0x2c7   : > { %5536 = vmatmul.mubr.f32.vlgmr.msra.gmra.mxu0 %v7723_v39  ;;  %3664 = vmatprep.mubr.f32.mxu1 %v7806_v28 }
 0x2c8   : > { %5538 = vmatprep.mubr.f32.mxu0 %v2824_v7  ;;  %4151 = vmatpush1.msra.mxu0 %v4117_v25  ;;  %v4105_v25 = vld [vmem:[#allocation8 + $0x318] sm:$0xff]  ;;  %v7877_v7 = vld [vmem:[#allocation2 + $0x160] sm:$0xff] }
 0x2c9   : > { %4152 = vmatprep.subr.mxu0 %v7723_v39  ;;  %5600 = vmatpush3.msra.mxu1 %v4141_v20  ;;  %v7873_v20 = vld [vmem:[#allocation2 + $0x148] sm:$0xff] }
 0x2ca   : > { %4153 = vmatpush1.msra.mxu0 %v4116_v44  ;;  %3665 = vmatmul.mubr.f32.gmra.mxu1 %v7811_v26  ;;  %v4135_v44 = vld [vmem:[#allocation8 + $0x408] sm:$0xff] }
 0x2cb   : > { %5539 = vmatmul.mubr.f32.gmra.mxu0 %v2827_v27  ;;  %4154 = vmatprep.subr.mxu0 %v7723_v39  ;;  %v7881_v27 = vld [vmem:[#allocation2 + $0x170] sm:$0xff] }
 0x2cc   : > { %5541 = vmatprep.mubr.f32.mxu0 %v7813_v30  ;;  %4155 = vmatpush1.msra.mxu0 %v4115_v63  ;;  %v4104_v63 = vld [vmem:[#allocation8 + $0x310] sm:$0xff] }
 0x2cd   : > { %3669 = vmatprep.mubr.f32.mxu1 %v7817_v6  ;;  %4156 = vmatprep.subr.mxu0 %v7723_v39 }
 0x2ce   : > { %5601 = vmatprep.subr.mxu1 %v4140_v18  ;;  %4157 = vmatpush1.msra.mxu0 %v4114_v42  ;;  %v4103_v42 = vld [vmem:[#allocation8 + $0x308] sm:$0xff] }
 0x2cf   : > { %5602 = vmatpush3.msra.mxu1 %v4140_v18  ;;  %5542 = vmatmul.mubr.f32.gmra.mxu0 %v7821_v31  ;;  %v7885_v18 = vld [vmem:[#allocation2 + $0x178] sm:$0xff] }
 0x2d0   : > { %4158 = vmatprep.subr.mxu0 %v7723_v39  ;;  %3670 = vmatmul.mubr.f32.gmra.mxu1 %v7507_v24  ;;  %v7837_v24 = vld [vmem:[#allocation2 + $0x108] sm:$0xff] }
 0x2d1   : > { %5544 = vmatprep.mubr.f32.mxu0 %v7825_v9  ;;  %4159 = vmatpush1.msra.mxu0 %v4113_v16  ;;  %v7891_v16 = vld [vmem:[#allocation2 + $0x190] sm:$0xff] }
 0x2d2   : > { %3674 = vmatprep.mubr.f32.mxu1 %v7829_v62  ;;  %4160 = vmatprep.subr.mxu0 %v7723_v39 }
 0x2d3   : > { %5603 = vmatprep.subr.mxu1 %v4139_v3  ;;  %4161 = vmatpush1.msra.mxu0 %v4112_v52  ;;  %v7895_v52 = vld [vmem:[#allocation2 + $0x188] sm:$0xff] }
 0x2d4   : > { %5604 = vmatpush3.msra.mxu1 %v4139_v3  ;;  %5545 = vmatmul.mubr.f32.gmra.mxu0 %v7833_v61  ;;  %v4134_v3 = vld [vmem:[#allocation8 + $0x400] sm:$0xff] }
 0x2d5   : > { %4162 = vmatprep.subr.mxu0 %v7723_v39  ;;  %3675 = vmatmul.mubr.f32.gmra.mxu1 %v7837_v24 }
 0x2d6   : > { %5547 = vmatprep.mubr.f32.mxu0 %v7839_v54  ;;  %4163 = vmatpush1.msra.mxu0 %v4111_v57  ;;  %v4102_v57 = vld [vmem:[#allocation8 + $0x300] sm:$0xff] }
 0x2d7   : > { %3679 = vmatprep.mubr.f32.mxu1 %v7843_v13  ;;  %4164 = vmatprep.subr.mxu0 %v7723_v39 }
 0x2d8   : > { %5605 = vmatprep.subr.mxu1 %v4138_v10  ;;  %4165 = vmatpush1.msra.mxu0 %v4110_v17  ;;  %v4133_v17 = vld [vmem:[#allocation8 + $0x3f8] sm:$0xff] }
 0x2d9   : > { %5606 = vmatpush3.msra.mxu1 %v4138_v10  ;;  %5548 = vmatmul.mubr.f32.gmra.mxu0 %v7847_v33  ;;  %v7899_v10 = vld [vmem:[#allocation2 + $0x1a8] sm:$0xff] }
 0x2da   : > { %4166 = vmatprep.subr.mxu0 %v7723_v39  ;;  %3680 = vmatmul.mubr.f32.gmra.mxu1 %v7539_v43  ;;  %v7863_v43 = vld [vmem:[#allocation2 + $0x138] sm:$0xff] }
 0x2db   : > { %5550 = vmatprep.mubr.f32.mxu0 %v7851_v51  ;;  %4167 = vmatpush1.msra.mxu0 %v4109_v21  ;;  %v7903_v21 = vld [vmem:[#allocation2 + $0x1c0] sm:$0xff] }
 0x2dc   : > { %3684 = vmatprep.mubr.f32.mxu1 %v7855_v38  ;;  %4168 = vmatprep.subr.mxu0 %v7723_v39 }
 0x2dd   : > { %5607 = vmatprep.subr.mxu1 %v4137_v37  ;;  %4169 = vmatpush1.msra.mxu0 %v4108_v32  ;;  %v4132_v32 = vld [vmem:[#allocation8 + $0x3f0] sm:$0xff] }
 0x2de   : > { %5608 = vmatpush3.msra.mxu1 %v4137_v37  ;;  %5551 = vmatmul.mubr.f32.gmra.mxu0 %v7859_v40  ;;  %v7907_v37 = vld [vmem:[#allocation2 + $0x1a0] sm:$0xff] }
 0x2df   : > { %4170 = vmatprep.subr.mxu0 %v7723_v39  ;;  %3685 = vmatmul.mubr.f32.gmra.mxu1 %v7863_v43 }
 0x2e0   : > { %5553 = vmatprep.mubr.f32.mxu0 %v7865_v55  ;;  %4171 = vmatpush1.msra.mxu0 %v4107_v41  ;;  %v7911_v41 = vld [vmem:[#allocation2 + $0x1d8] sm:$0xff] }
 0x2e1   : > { %3689 = vmatprep.mubr.f32.mxu1 %v7869_v0  ;;  %4172 = vmatprep.subr.mxu0 %v7723_v39 }
 0x2e2   : > { %5609 = vmatprep.subr.mxu1 %v4136_v12  ;;  %4173 = vmatpush1.msra.mxu0 %v4106_v8  ;;  %v7915_v8 = vld [vmem:[#allocation2 + $0x198] sm:$0xff] }
 0x2e3   : > { %5610 = vmatpush3.msra.mxu1 %v4136_v12  ;;  %5554 = vmatmul.mubr.f32.gmra.mxu0 %v7873_v20  ;;  %v4131_v12 = vld [vmem:[#allocation8 + $0x3e8] sm:$0xff] }
 0x2e4   : > { %4174 = vmatprep.subr.mxu0 %v7723_v39  ;;  %3690 = vmatmul.mubr.f32.gmra.mxu1 %v7574_v29  ;;  %v7889_v29 = vld [vmem:[#allocation2 + $0x168] sm:$0xff] }
 0x2e5   : > { %5556 = vmatprep.mubr.f32.mxu0 %v7877_v7  ;;  %4175 = vmatpush1.msra.mxu0 %v4105_v25  ;;  %v7921_v25 = vld [vmem:[#allocation2 + $0x1b8] sm:$0xff] }
 0x2e6   : > { %3694 = vmatprep.mubr.f32.mxu1 %v7881_v27  ;;  %4176 = vmatprep.subr.mxu0 %v7723_v39 }
 0x2e7   : > { %5611 = vmatprep.subr.mxu1 %v4135_v44  ;;  %4177 = vmatpush1.msra.mxu0 %v4104_v63  ;;  %v4129_v63 = vld [vmem:[#allocation8 + $0x3d8] sm:$0xff] }
 0x2e8   : > { %5612 = vmatpush3.msra.mxu1 %v4135_v44  ;;  %5557 = vmatmul.mubr.f32.gmra.mxu0 %v7885_v18  ;;  %v4130_v44 = vld [vmem:[#allocation8 + $0x3e0] sm:$0xff] }
 0x2e9   : > { %4178 = vmatprep.subr.mxu0 %v7723_v39  ;;  %3695 = vmatmul.mubr.f32.gmra.mxu1 %v7889_v29 }
 0x2ea   : > { %5559 = vmatprep.mubr.f32.mxu0 %v7891_v16  ;;  %4179 = vmatpush1.msra.mxu0 %v4103_v42  ;;  %v7927_v42 = vld [vmem:[#allocation2 + $0x220] sm:$0xff] }
 0x2eb   : > { %3699 = vmatprep.mubr.f32.mxu1 %v7895_v52  ;;  %4180 = vmatprep.subr.mxu0 %v7723_v39  ;;  %8625 = vst [vmem:[#allocation46_spill] sm:$0xff] %v7927_v42 }
 0x2ec   : > { %5613 = vmatprep.subr.mxu1 %v4134_v3  ;;  %4181 = vmatpush1.msra.mxu0 %v4102_v57  ;;  %v4128_v57 = vld [vmem:[#allocation8 + $0x3d0] sm:$0xff] }
 0x2ed   : > { %5614 = vmatpush3.msra.mxu1 %v4134_v3  ;;  %5560 = vmatmul.mubr.f32.gmra.mxu0 %v7899_v10  ;;  %v7931_v3 = vld [vmem:[#allocation2 + $0x1d0] sm:$0xff] }
 0x2ee   : > { %4182 = vmatprep.subr.mxu0 %v7723_v39  ;;  %3700 = vmatmul.mubr.f32.gmra.mxu1 %v7609_v19  ;;  %v7917_v19 = vld [vmem:[#allocation2 + $0x1f0] sm:$0xff] }
 0x2ef   : > { %5562 = vmatprep.mubr.f32.mxu0 %v7903_v21  ;;  %4183 = vmatpush2.msra.mxu0 %v4133_v17  ;;  %v4127_v17 = vld [vmem:[#allocation8 + $0x3c8] sm:$0xff] }
 0x2f0   : > { %3704 = vmatprep.mubr.f32.mxu1 %v7907_v37  ;;  %4184 = vmatprep.subr.mxu0 %v7723_v39 }
 0x2f1   : > { %4185 = vmatpush2.msra.mxu0 %v4132_v32  ;;  %v7939_v32 = vld [vmem:[#allocation2 + $0x250] sm:$0xff] }
 0x2f2   : > { %5563 = vmatmul.mubr.f32.gmra.mxu0 %v7911_v41  ;;  %4186 = vmatprep.subr.mxu0 %v7723_v39  ;;  %8626 = vst [vmem:[#allocation43_spill] sm:$0xff] %v7939_v32 }
 0x2f3   : > { %3705 = vmatmul.mubr.f32.gmra.mxu1 %v7915_v8  ;;  %5565 = vmatprep.mubr.f32.mxu0 %v7917_v19 }
 0x2f4   : > { %4187 = vmatpush2.msra.mxu0 %v4131_v12  ;;  %3709 = vmatprep.mubr.f32.mxu1 %v7921_v25  ;;  %v4126_v12 = vld [vmem:[#allocation8 + $0x3c0] sm:$0xff] }
 0x2f5   : > { %4188 = vmatprep.subr.mxu0 %v7723_v39 }
 0x2f6   : > { %4189 = vmatpush2.msra.mxu0 %v4130_v44  ;;  %v7949_v44 = vld [vmem:[#allocation2 + $0x280] sm:$0xff] }
 0x2f7   : > { %5566 = vmatmul.mubr.f32.gmra.mxu0 %v7555_v34  ;;  %4190 = vmatprep.subr.mxu0 %v7723_v39  ;;  %v7937_v34 = vld [vmem:[#allocation2 + $0x1c8] sm:$0xff]  ;;  %8627 = vst [vmem:[#allocation48_spill] sm:$0xff] %v7949_v44 }
 0x2f8   : > { %3710 = vmatmul.mubr.f32.gmra.mxu1 %v7650_v53  ;;  %5568 = vmatprep.mubr.f32.mxu0 %v7927_v42  ;;  %v7943_v53 = vld [vmem:[#allocation2 + $0x1e8] sm:$0xff]  ;;  %v4121_v42 = vld [vmem:[#allocation8 + $0x398] sm:$0xff] }
 0x2f9   : > { %4191 = vmatpush2.msra.mxu0 %v4129_v63  ;;  %3714 = vmatprep.mubr.f32.mxu1 %v7931_v3  ;;  %v7953_v63 = vld [vmem:[#allocation2 + $0x200] sm:$0xff] }
 0x2fa   : > { %4192 = vmatprep.subr.mxu0 %v7723_v39  ;;  %8628 = vst [vmem:[#allocation47_spill] sm:$0xff] %v7953_v63 }
 0x2fb   : > { %4193 = vmatpush2.msra.mxu0 %v4128_v57  ;;  %v4124_v57 = vld [vmem:[#allocation8 + $0x3b0] sm:$0xff] }
 0x2fc   : > { %5569 = vmatmul.mubr.f32.gmra.mxu0 %v7590_v47  ;;  %4194 = vmatprep.subr.mxu0 %v7723_v39  ;;  %v4125_v47 = vld [vmem:[#allocation8 + $0x3b8] sm:$0xff] }
 0x2fd   : > { %3715 = vmatmul.mubr.f32.gmra.mxu1 %v7937_v34  ;;  %5571 = vmatprep.mubr.f32.mxu0 %v7939_v32  ;;  %v4122_v32 = vld [vmem:[#allocation8 + $0x3a0] sm:$0xff] }
 0x2fe   : > { %4195 = vmatpush2.msra.mxu0 %v4127_v17  ;;  %3719 = vmatprep.mubr.f32.mxu1 %v7943_v53 }
 0x2ff   : > { %4196 = vmatprep.subr.mxu0 %v7723_v39 }
 0x300   : > { %4197 = vmatpush2.msra.mxu0 %v4126_v12  ;;  %v4123_v12 = vld [vmem:[#allocation8 + $0x3a8] sm:$0xff] }
 0x301   : > { %5572 = vmatmul.mubr.f32.gmra.mxu0 %v7630_v59  ;;  %4198 = vmatprep.subr.mxu0 %v7723_v39  ;;  %v7959_v59 = vld [vmem:[#allocation2 + $0x1f8] sm:$0xff] }
 0x302   : > { %3720 = vmatmul.mubr.f32.gmra.mxu1 %v7687_v45  ;;  %5574 = vmatprep.mubr.f32.mxu0 %v7949_v44 }
 0x303   : > { %4199 = vmatpush2.msra.mxu0 %v4125_v47  ;;  %3724 = vmatprep.mubr.f32.mxu1 %v7953_v63  ;;  %v7967_v47 = vld [vmem:[#allocation2 + $0x218] sm:$0xff] }
 0x304   : > { %4200 = vmatprep.subr.mxu0 %v7723_v39  ;;  %v5457_v17 = vpop.f32.mrf.mxu1 }
 0x305   : > { %4201 = vmatpush2.msra.mxu0 %v4124_v57 }
 0x306   : > { %5575 = vmatmul.mubr.f32.gmra.mxu0 %v7664_v60  ;;  %4202 = vmatprep.subr.mxu0 %v7723_v39  ;;  %v7961_v45 = vpop.f32.mrf.mxu0  ;;  %v7963_v44 = vpop.f32.mrf.mxu1 }
 0x307   : > { %8629 = vst [vmem:[#allocation44_spill] sm:$0xff] %v7961_v45  ;;  %8630 = vst [vmem:[#allocation50_spill] sm:$0xff] %v7963_v44  ;;  %3725 = vmatmul.mubr.f32.gmra.mxu1 %v7959_v59  ;;  %5577 = vmatprep.mubr.f32.mxu0 %v7671_v46 }
 0x308   : > { %4203 = vmatpush2.msra.mxu0 %v4123_v12  ;;  %3729 = vmatprep.mubr.f32.mxu1 %v7967_v47  ;;  %v3173_v57 = vpop.f32.mrf.mxu0  ;;  %v5460_v60 = vpop.f32.mrf.mxu1  ;;  %v7979_v12 = vld [vmem:[#allocation2 + $0x230] sm:$0xff] }
 0x309   : > { %4204 = vmatprep.subr.mxu0 %v7723_v39  ;;  %v4120_v57 = vld [vmem:[#allocation8 + $0x390] sm:$0xff] }
 0x30a   : > { %4205 = vmatpush2.msra.mxu0 %v4122_v32  ;;  %v3176_v63 = vpop.f32.mrf.mxu0  ;;  %v7971_v45 = vpop.f32.mrf.mxu1 }
 0x30b   : > { %8631 = vst [vmem:[#allocation49_spill] sm:$0xff] %v7971_v45  ;;  %5578 = vmatmul.mubr.f32.gmra.mxu0 %v7700_v49  ;;  %4206 = vmatprep.subr.mxu0 %v7723_v39  ;;  %v7975_v46 = vadd.f32 %v5457_v17, %v3176_v63  ;;  %v4119_v45 = vld [vmem:[#allocation8 + $0x388] sm:$0xff] }
 0x30c   : > { %3730 = vmatmul.mubr.f32.gmra.mxu1 %v7721_v14  ;;  %5580 = vmatprep.mubr.f32.mxu0 %v7707_v15  ;;  %v3178_v44 = vpop.f32.mrf.mxu0  ;;  %v7989_v15 = vld [vmem:[#allocation2 + $0x228] sm:$0xff] }
 0x30d   : > { %4207 = vmatpush2.msra.mxu0 %v4121_v42  ;;  %3734 = vmatprep.mubr.f32.mxu1 %v7979_v12  ;;  %v7992_v42 = vld [vmem:[#allocation2 + $0x248] sm:$0xff]  ;;  %v4118_v44 = vld [vmem:[#allocation8 + $0x380] sm:$0xff] }
 0x30e   : > { %v5463_v32 = vpop.f32.mrf.mxu1  ;;  %4208 = vmatprep.subr.mxu0 %v7723_v39 }
 0x30f   : > { %v7983_v49 = vpop.f32.mrf.mxu0  ;;  %4209 = vmatpush2.msra.mxu0 %v4120_v57 }
 0x310   : > { %8632 = vst [vmem:[#allocation45_spill] sm:$0xff] %v7983_v49  ;;  %v7985_v63 = vpop.f32.mrf.mxu1  ;;  %5581 = vmatmul.mubr.f32.gmra.mxu0 %v7735_v23  ;;  %4210 = vmatprep.subr.mxu0 %v7723_v39  ;;  %v8009_v49 = vld [vmem:[#allocation2 + $0x258] sm:$0xff] }
 0x311   : > { %8633 = vst [vmem:[#allocation52_spill] sm:$0xff] %v7985_v63  ;;  %v3183_v14 = vpop.f32.mrf.mxu0  ;;  %3735 = vmatmul.mubr.f32.gmra.mxu1 %v7989_v15  ;;  %4211 = vmatpush2.msra.mxu0 %v4119_v45  ;;  %v8001_v45 = vld [vmem:[#allocation2 + $0x260] sm:$0xff] }
 0x312   : > { %4214 = vmatprep.mubr.f32.mxu0 %v7769_v35  ;;  %3739 = vmatprep.mubr.f32.mxu1 %v7992_v42 }
 0x313   : > { %v3186_v17 = vpop.f32.mrf.mxu0  ;;  %v5466_v57 = vpop.f32.mrf.mxu1  ;;  %4212 = vmatprep.subr.mxu0 %v7723_v39 }
 0x314   : > { %v7997_v23 = vadd.f32 %v5460_v60, %v3186_v17  ;;  %4213 = vmatpush2.msra.mxu0 %v4118_v44  ;;  %v8020_v17 = vld [vmem:[#allocation2 + $0x290] sm:$0xff] }
 0x315   : > { %v3188_v63 = vpop.f32.mrf.mxu0  ;;  %4215 = vmatmul.mubr.f32.vlgmr.msra.gmra.mxu0 %v7775_v48  ;;  %3740 = vmatmul.mubr.f32.gmra.mxu1 %v7746_v5  ;;  %v8007_v14 = vpop.f32.mrf.mxu1  ;;  %v8013_v48 = vld [vmem:[#allocation2 + $0x278] sm:$0xff] }
 0x316   : > { %4219 = vmatprep.mubr.f32.mxu0 %v7779_v11  ;;  %3744 = vmatprep.mubr.f32.mxu1 %v8001_v45  ;;  %8634 = vst [vmem:[#allocation51_spill] sm:$0xff] %v8007_v14  ;;  %v4011_v63 = vld [vmem:[#allocation2 + $0x90] sm:$0xff] }
 0x317   : > { %v8005_v35 = vpop.f32.mrf.mxu0  ;;  %v5469_v5 = vpop.f32.mrf.mxu1 }
 0x319   : > { %v3193_v39 = vpop.f32.mrf.mxu0  ;;  %4220 = vmatmul.mubr.f32.gmra.mxu0 %v7783_v58  ;;  %3745 = vmatmul.mubr.f32.gmra.mxu1 %v8009_v49  ;;  %v8024_v58 = vpop.f32.mrf.mxu1 }
 0x31a   : > { %4224 = vmatprep.mubr.f32.mxu0 %v7787_v50  ;;  %3749 = vmatprep.mubr.f32.mxu1 %v8013_v48  ;;  %8635 = vst [vmem:[#allocation53_spill] sm:$0xff] %v8024_v58  ;;  %v8028_v39 = vld [vmem:[#allocation2 + $0x288] sm:$0xff]  ;;  %v8047_v58 = vld [vmem:[#allocation2 + $0x2b8] sm:$0xff] }
 0x31b   : > { %v3196_v11 = vpop.f32.mrf.mxu0 }
 0x31c   : > { %v8017_v60 = vadd.f32 %v5463_v32, %v3196_v11  ;;  %v8032_v32 = vld [vmem:[#allocation2 + $0x2a8] sm:$0xff] }
 0x31d   : > { %v3198_v44 = vpop.f32.mrf.mxu0  ;;  %4225 = vmatmul.mubr.f32.gmra.mxu0 %v4011_v63  ;;  %3750 = vmatmul.mubr.f32.gmra.mxu1 %v7755_v2  ;;  %v5472_v2 = vpop.f32.mrf.mxu1  ;;  %v4017_v63 = vld [vmem:[#allocation2 + $0xc0] sm:$0xff] }
 0x31e   : > { %4229 = vmatprep.mubr.f32.mxu0 %v7792_v1  ;;  %3754 = vmatprep.mubr.f32.mxu1 %v8020_v17 }
 0x31f   : > { %v8026_v50 = vpop.f32.mrf.mxu0 }
 0x320   : > { %8636 = vst [vmem:[#allocation54_spill] sm:$0xff] %v8026_v50 }
 0x321   : > { %v3203_v14 = vpop.f32.mrf.mxu0  ;;  %4230 = vmatmul.mubr.f32.gmra.mxu0 %v7796_v4  ;;  %3755 = vmatmul.mubr.f32.gmra.mxu1 %v8028_v39  ;;  %v8043_v4 = vpop.f32.mrf.mxu1 }
 0x322   : > { %4234 = vmatprep.mubr.f32.mxu0 %v7800_v56  ;;  %3759 = vmatprep.mubr.f32.mxu1 %v8032_v32  ;;  %v8039_v14 = vld [vmem:[#allocation2 + $0x2c0] sm:$0xff]  ;;  %8637 = vst [vmem:[#allocation55_spill] sm:$0xff] %v8043_v4  ;;  %v8066_v4 = vld [vmem:[#allocation2 + $0x2e8] sm:$0xff] }
 0x323   : > { %v3206_v1 = vpop.f32.mrf.mxu0 }
 0x324   : > { %v8036_v11 = vadd.f32 %v5466_v57, %v3206_v1  ;;  %v8051_v57 = vld [vmem:[#allocation2 + $0x2d8] sm:$0xff] }
 0x325   : > { %v3208_v44 = vpop.f32.mrf.mxu0  ;;  %4235 = vmatmul.mubr.f32.gmra.mxu0 %v4017_v63  ;;  %3760 = vmatmul.mubr.f32.gmra.mxu1 %v7764_v36  ;;  %v5475_v36 = vpop.f32.mrf.mxu1  ;;  %v4023_v63 = vld [vmem:[#allocation2 + $0xf0] sm:$0xff] }
 0x326   : > { %4239 = vmatprep.mubr.f32.mxu0 %v7806_v28  ;;  %3764 = vmatprep.mubr.f32.mxu1 %v8039_v14 }
 0x327   : > { %v8045_v56 = vpop.f32.mrf.mxu0 }
 0x328   : > { %8638 = vst [vmem:[#allocation56_spill] sm:$0xff] %v8045_v56 }
 0x329   : > { %v3213_v50 = vpop.f32.mrf.mxu0  ;;  %4240 = vmatmul.mubr.f32.gmra.mxu0 %v7811_v26  ;;  %3765 = vmatmul.mubr.f32.gmra.mxu1 %v8047_v58  ;;  %v8062_v26 = vpop.f32.mrf.mxu1 }
 0x32a   : > { %4244 = vmatprep.mubr.f32.mxu0 %v7817_v6  ;;  %3769 = vmatprep.mubr.f32.mxu1 %v8051_v57  ;;  %v8058_v50 = vld [vmem:[#allocation2 + $0x2f0] sm:$0xff] }
 0x32b   : > { %v3216_v28 = vpop.f32.mrf.mxu0 }
 0x32c   : > { %v8055_v1 = vadd.f32 %v5469_v5, %v3216_v28  ;;  %v4029_v28 = vld [vmem:[#allocation2 + $0x120] sm:$0xff] }
 0x32d   : > { %v3218_v44 = vpop.f32.mrf.mxu0  ;;  %4245 = vmatmul.mubr.f32.gmra.mxu0 %v4023_v63  ;;  %3770 = vmatmul.mubr.f32.gmra.mxu1 %v7773_v22  ;;  %v5478_v22 = vpop.f32.mrf.mxu1 }
 0x32e   : > { %4249 = vmatprep.mubr.f32.mxu0 %v7829_v62  ;;  %3774 = vmatprep.mubr.f32.mxu1 %v8058_v50 }
 0x32f   : > { %v8064_v6 = vpop.f32.mrf.mxu0  ;;  %v8075_v44 = vpop.f32.mrf.mxu1 }
 0x331   : > { %v3223_v56 = vpop.f32.mrf.mxu0  ;;  %4250 = vmatmul.mubr.f32.gmra.mxu0 %v7837_v24  ;;  %3775 = vmatmul.mubr.f32.gmra.mxu1 %v8066_v4 }
 0x332   : > { %4254 = vmatprep.mubr.f32.mxu0 %v7843_v13  ;;  %5615 = vmatprep.mubr.f32.mxu1 %v7813_v30  ;;  %v5481_v13 = vpop.f32.mrf.mxu1 }
 0x333   : > { %v3226_v5 = vpop.f32.mrf.mxu0 }
 0x334   : > { %v8072_v62 = vadd.f32 %v5472_v2, %v3226_v5  ;;  %v3476_v2 = vpop.f32.mrf.mxu1  ;;  %v4035_v5 = vld [vmem:[#allocation2 + $0x150] sm:$0xff] }
 0x335   : > { %v3228_v63 = vpop.f32.mrf.mxu0  ;;  %4255 = vmatmul.mubr.f32.gmra.mxu0 %v4029_v28  ;;  %5616 = vmatmul.mubr.f32.vlgmr.msra.gmra.mxu1 %v7821_v31 }
 0x336   : > { %4259 = vmatprep.mubr.f32.mxu0 %v7855_v38  ;;  %5618 = vmatprep.mubr.f32.mxu1 %v7825_v9  ;;  %v5484_v9 = vpop.f32.mrf.mxu1 }
 0x337   : > { %v8079_v24 = vpop.f32.mrf.mxu0 }
 0x339   : > { %v3233_v56 = vpop.f32.mrf.mxu0  ;;  %4260 = vmatmul.mubr.f32.gmra.mxu0 %v7863_v43  ;;  %5619 = vmatmul.mubr.f32.gmra.mxu1 %v7833_v61 }
 0x33a   : > { %4264 = vmatprep.mubr.f32.mxu0 %v7869_v0  ;;  %5621 = vmatprep.mubr.f32.mxu1 %v7839_v54  ;;  %v3486_v54 = vpop.f32.mrf.mxu1 }
 0x33b   : > { %v3236_v30 = vpop.f32.mrf.mxu0 }
 0x33c   : > { %v8085_v31 = vadd.f32 %v5475_v36, %v3236_v30 }
 0x33d   : > { %v3238_v38 = vpop.f32.mrf.mxu0  ;;  %4265 = vmatmul.mubr.f32.gmra.mxu0 %v4035_v5  ;;  %5622 = vmatmul.mubr.f32.gmra.mxu1 %v7847_v33  ;;  %v4041_v33 = vld [vmem:[#allocation2 + $0x180] sm:$0xff]  ;;  %v8640_v5 = vld [vmem:[#allocation46_spill] sm:$0xff] }
 0x33e   : > { %4269 = vmatprep.mubr.f32.mxu0 %v7881_v27  ;;  %5624 = vmatprep.mubr.f32.mxu1 %v7851_v51  ;;  %v5487_v27 = vpop.f32.mrf.mxu1 }
 0x33f   : > { %v8090_v43 = vpop.f32.mrf.mxu0 }
 0x341   : > { %v3243_v61 = vpop.f32.mrf.mxu0  ;;  %4270 = vmatmul.mubr.f32.gmra.mxu0 %v7889_v29  ;;  %5625 = vmatmul.mubr.f32.gmra.mxu1 %v7859_v40  ;;  %v3496_v29 = vpop.f32.mrf.mxu1 }
 0x342   : > { %4274 = vmatprep.mubr.f32.mxu0 %v7895_v52  ;;  %5627 = vmatprep.mubr.f32.mxu1 %v7865_v55 }
 0x343   : > { %v3246_v0 = vpop.f32.mrf.mxu0  ;;  %v5490_v55 = vpop.f32.mrf.mxu1 }
 0x344   : > { %v8096_v36 = vadd.f32 %v5478_v22, %v3246_v0 }
 0x345   : > { %v3248_v28 = vpop.f32.mrf.mxu0  ;;  %4275 = vmatmul.mubr.f32.gmra.mxu0 %v4041_v33  ;;  %5628 = vmatmul.mubr.f32.gmra.mxu1 %v7873_v20  ;;  %v4059_v33 = vld [vmem:[#allocation2 + $0x210] sm:$0xff] }
 0x346   : > { %4279 = vmatprep.mubr.f32.mxu0 %v7907_v37  ;;  %5630 = vmatprep.mubr.f32.mxu1 %v7877_v7  ;;  %v4047_v37 = vld [vmem:[#allocation2 + $0x1b0] sm:$0xff]  ;;  %v3506_v7 = vpop.f32.mrf.mxu1  ;;  %v4070_v28 = vld [vmem:[#allocation2 + $0x268] sm:$0xff] }
 0x347   : > { %v3251_v51 = vpop.f32.mrf.mxu0 }
 0x348   : > { %v8101_v40 = vadd.f32 %v3476_v2, %v3251_v51  ;;  %v8639_v2 = vld [vmem:[#allocation47_spill] sm:$0xff] }
 0x349   : > { %v3253_v52 = vpop.f32.mrf.mxu0  ;;  %4280 = vmatmul.mubr.f32.gmra.mxu0 %v7915_v8  ;;  %5631 = vmatmul.mubr.f32.gmra.mxu1 %v7885_v18 }
 0x34a   : > { %4284 = vmatprep.mubr.f32.mxu0 %v7921_v25  ;;  %5633 = vmatprep.mubr.f32.mxu1 %v7891_v16 }
 0x34b   : > { %v3256_v22 = vpop.f32.mrf.mxu0  ;;  %v8114_v25 = vpop.f32.mrf.mxu1 }
 0x34c   : > { %v8107_v20 = vadd.f32 %v5481_v13, %v3256_v22 }
 0x34d   : > { %v3258_v63 = vpop.f32.mrf.mxu0  ;;  %4285 = vmatmul.mubr.f32.gmra.mxu0 %v4047_v37  ;;  %5634 = vmatmul.mubr.f32.gmra.mxu1 %v7899_v10  ;;  %v3516_v56 = vpop.f32.mrf.mxu1 }
 0x34e   : > { %4289 = vmatprep.mubr.f32.mxu0 %v7931_v3  ;;  %5636 = vmatprep.mubr.f32.mxu1 %v7903_v21  ;;  %v4053_v3 = vld [vmem:[#allocation2 + $0x1e0] sm:$0xff]  ;;  %v4058_v21 = vld [vmem:[#allocation2 + $0x208] sm:$0xff] }
 0x34f   : > { %v3261_v8 = vpop.f32.mrf.mxu0 }
 0x350   : > { %v8112_v18 = vadd.f32 %v3486_v54, %v3261_v8 }
 0x351   : > { %v3263_v16 = vpop.f32.mrf.mxu0  ;;  %4290 = vmatmul.mubr.f32.gmra.mxu0 %v7937_v34  ;;  %5637 = vmatmul.mubr.f32.gmra.mxu1 %v7911_v41 }
 0x352   : > { %4294 = vmatprep.mubr.f32.mxu0 %v7943_v53  ;;  %5639 = vmatprep.mubr.f32.mxu1 %v7917_v19  ;;  %v4064_v53 = vld [vmem:[#allocation2 + $0x238] sm:$0xff] }
 0x353   : > { %v3266_v10 = vpop.f32.mrf.mxu0  ;;  %v8124_v34 = vpop.f32.mrf.mxu1 }
 0x354   : > { %v8120_v13 = vadd.f32 %v5484_v9, %v3266_v10  ;;  %v8641_v9 = vld [vmem:[#allocation43_spill] sm:$0xff]  ;;  %v4065_v10 = vld [vmem:[#allocation2 + $0x240] sm:$0xff] }
 0x355   : > { %v3268_v30 = vpop.f32.mrf.mxu0  ;;  %4295 = vmatmul.mubr.f32.gmra.mxu0 %v4053_v3  ;;  %5640 = vmatmul.mubr.f32.gmra.mxu1 %v4058_v21  ;;  %v3526_v61 = vpop.f32.mrf.mxu1  ;;  %v4082_v3 = vld [vmem:[#allocation2 + $0x2c8] sm:$0xff] }
 0x356   : > { %4299 = vmatprep.mubr.f32.mxu0 %v8639_v2  ;;  %5642 = vmatprep.mubr.f32.mxu1 %v8640_v5  ;;  %v8643_v30 = vld [vmem:[#allocation44_spill] sm:$0xff]  ;;  %v8644_v2 = vld [vmem:[#allocation50_spill] sm:$0xff] }
 0x357   : > { %v3271_v41 = vpop.f32.mrf.mxu0  ;;  %v3397_v5 = vadd.f32 %v8644_v2, %v8643_v30 }
 0x358   : > { %v8126_v38 = vadd.f32 %v3496_v29, %v3271_v41  ;;  %v8642_v29 = vld [vmem:[#allocation48_spill] sm:$0xff] }
 0x359   : > { %v3273_v19 = vpop.f32.mrf.mxu0  ;;  %4300 = vmatmul.mubr.f32.gmra.mxu0 %v7959_v59  ;;  %5643 = vmatmul.mubr.f32.gmra.mxu1 %v4064_v53 }
 0x35a   : > { %4304 = vmatprep.mubr.f32.mxu0 %v7967_v47  ;;  %5645 = vmatprep.mubr.f32.mxu1 %v8641_v9  ;;  %v8133_v51 = vpop.f32.mrf.mxu1  ;;  %v4076_v47 = vld [vmem:[#allocation2 + $0x298] sm:$0xff] }
 0x35b   : > { %v3276_v54 = vpop.f32.mrf.mxu0  ;;  %v4088_v19 = vld [vmem:[#allocation2 + $0x2f8] sm:$0xff] }
 0x35c   : > { %v8131_v0 = vadd.f32 %v5487_v27, %v3276_v54  ;;  %v8139_v37 = vpop.f32.mrf.mxu1  ;;  %v4079_v27 = vld [vmem:[#allocation2 + $0x2b0] sm:$0xff] }
 0x35d   : > { %v3278_v52 = vpop.f32.mrf.mxu0  ;;  %4305 = vmatmul.mubr.f32.gmra.mxu0 %v4059_v33  ;;  %5646 = vmatmul.mubr.f32.gmra.mxu1 %v4070_v28  ;;  %v4091_v33 = vld [vmem:[#allocation2 + $0x310] sm:$0xff] }
 0x35e   : > { %4309 = vmatprep.mubr.f32.mxu0 %v7979_v12  ;;  %5648 = vmatprep.mubr.f32.mxu1 %v8642_v29  ;;  %v4071_v29 = vld [vmem:[#allocation2 + $0x270] sm:$0xff] }
 0x35f   : > { %v3281_v59 = vpop.f32.mrf.mxu0 }
 0x360   : > { %v8137_v22 = vadd.f32 %v3506_v7, %v3281_v59  ;;  %v4094_v59 = vld [vmem:[#allocation2 + $0x328] sm:$0xff] }
 0x361   : > { %v3283_v63 = vpop.f32.mrf.mxu0  ;;  %4310 = vmatmul.mubr.f32.gmra.mxu0 %v7989_v15  ;;  %5649 = vmatmul.mubr.f32.gmra.mxu1 %v4076_v47  ;;  %v4085_v15 = vld [vmem:[#allocation2 + $0x2e0] sm:$0xff] }
 0x362   : > { %4314 = vmatprep.mubr.f32.mxu0 %v7992_v42  ;;  %5651 = vmatprep.mubr.f32.mxu1 %v4079_v27  ;;  %v8143_v16 = vpop.f32.mrf.mxu1  ;;  %v8645_v27 = vld [vmem:[#allocation45_spill] sm:$0xff] }
 0x363   : > { %v3286_v8 = vpop.f32.mrf.mxu0 }
 0x364   : > { %v8145_v12 = vadd.f32 %v5490_v55, %v3286_v8  ;;  %v8147_v21 = vpop.f32.mrf.mxu1  ;;  %v8646_v8 = vld [vmem:[#allocation49_spill] sm:$0xff] }
 0x365   : > { %v3288_v7 = vpop.f32.mrf.mxu0  ;;  %4315 = vmatmul.mubr.f32.gmra.mxu0 %v4065_v10  ;;  %5652 = vmatmul.mubr.f32.gmra.mxu1 %v4082_v3  ;;  %v8167_v3 = vld [vmem:[#allocation2] sm:$0xff] }
 0x366   : > { %4319 = vmatprep.mubr.f32.mxu0 %v8001_v45  ;;  %5654 = vmatprep.mubr.f32.mxu1 %v4085_v15  ;;  %v3621_v41 = vpop.f32.mrf.mxu1 }
 0x367   : > { %v3291_v42 = vpop.f32.mrf.mxu0  ;;  %v8154_v55 = vadd.f32 %v3621_v41, %v3397_v5 }
 0x368   : > { %v8152_v53 = vadd.f32 %v3516_v56, %v3291_v42  ;;  %v3623_v54 = vpop.f32.mrf.mxu1  ;;  %v4077_v42 = vld [vmem:[#allocation2 + $0x2a0] sm:$0xff] }
 0x369   : > { %v3293_v9 = vpop.f32.mrf.mxu0  ;;  %4320 = vmatmul.mubr.f32.gmra.mxu0 %v8009_v49  ;;  %5655 = vmatmul.mubr.f32.gmra.mxu1 %v4088_v19  ;;  %v3407_v49 = vadd.f32 %v8646_v8, %v8645_v27  ;;  %v8647_v19 = vld [vmem:[#allocation52_spill] sm:$0xff] }
 0x36a   : > { %4324 = vmatprep.mubr.f32.mxu0 %v8013_v48  ;;  %5657 = vmatprep.mubr.f32.mxu1 %v4091_v33  ;;  %v3626_v52 = vpop.f32.mrf.mxu1  ;;  %v3417_v9 = vadd.f32 %v8647_v19, %v8005_v35  ;;  %v4093_v19 = vld [vmem:[#allocation2 + $0x320] sm:$0xff] }
 0x36b   : > { %v3296_v28 = vpop.f32.mrf.mxu0  ;;  %v8162_v56 = vadd.f32 %v3626_v52, %v7975_v46 }
 0x36c   : > { %v8159_v45 = vadd.f32 %v8114_v25, %v3296_v28  ;;  %v3628_v63 = vpop.f32.mrf.mxu1 }
 0x36d   : > { %v3298_v47 = vpop.f32.mrf.mxu0  ;;  %4325 = vmatmul.mubr.f32.gmra.mxu0 %v4071_v29  ;;  %5658 = vmatmul.mubr.f32.gmra.mxu1 %v4094_v59  ;;  %v8648_v63 = vld [vmem:[#allocation54_spill] sm:$0xff] }
 0x36e   : > { %4329 = vmatprep.mubr.f32.mxu0 %v8020_v17  ;;  %v3631_v10 = vpop.f32.mrf.mxu1  ;;  %5660 = vmatprep.mubr.f32.mxu1 %v8167_v3 }
 0x36f   : > { %v3301_v48 = vpop.f32.mrf.mxu0  ;;  %v8172_v46 = vadd.f32 %v3631_v10, %v3407_v49 }
 0x370   : > { %v8170_v25 = vadd.f32 %v3526_v61, %v3301_v48  ;;  %v3633_v30 = vpop.f32.mrf.mxu1 }
 0x371   : > { %v3303_v7 = vpop.f32.mrf.mxu0  ;;  %4330 = vmatmul.mubr.f32.gmra.mxu0 %v8028_v39  ;;  %5661 = vmatmul.mubr.f32.gmra.mxu1 %v8167_v3 }
 0x372   : > { %4334 = vmatprep.mubr.f32.mxu0 %v8032_v32  ;;  %v3636_v17 = vpop.f32.mrf.mxu1 }
 0x373   : > { %v3306_v2 = vpop.f32.mrf.mxu0  ;;  %v3637_v15 = vadd.f32 %v3636_v17, %v7997_v23 }
 0x374   : > { %v8178_v5 = vadd.f32 %v8124_v34, %v3306_v2  ;;  %v3638_v41 = vpop.f32.mrf.mxu1 }
 0x375   : > { %v3308_v61 = vpop.f32.mrf.mxu0  ;;  %4335 = vmatmul.mubr.f32.gmra.mxu0 %v4077_v42 }
 0x376   : > { %4339 = vmatprep.mubr.f32.mxu0 %v8039_v14  ;;  %v3641_v54 = vpop.f32.mrf.mxu1  ;;  %v4083_v14 = vld [vmem:[#allocation2 + $0x2d0] sm:$0xff]  ;;  %v8650_v61 = vld [vmem:[#allocation56_spill] sm:$0xff] }
 0x377   : > { %v3311_v39 = vpop.f32.mrf.mxu0  ;;  %v3642_v33 = vadd.f32 %v3641_v54, %v3417_v9 }
 0x378   : > { %v8185_v32 = vadd.f32 %v8139_v37, %v3311_v39  ;;  %v3643_v34 = vpop.f32.mrf.mxu1  ;;  %v8649_v37 = vld [vmem:[#allocation51_spill] sm:$0xff] }
 0x379   : > { %v3313_v28 = vpop.f32.mrf.mxu0  ;;  %4340 = vmatmul.mubr.f32.gmra.mxu0 %v8047_v58  ;;  %v3427_v27 = vadd.f32 %v8649_v37, %v8648_v63 }
 0x37a   : > { %4344 = vmatprep.mubr.f32.mxu0 %v8051_v57  ;;  %v3646_v52 = vpop.f32.mrf.mxu1  ;;  %v4092_v28 = vld [vmem:[#allocation2 + $0x318] sm:$0xff] }
 0x37b   : > { %v3316_v23 = vpop.f32.mrf.mxu0  ;;  %v3647_v35 = vadd.f32 %v3646_v52, %v8017_v60  ;;  %v4090_v60 = vld [vmem:[#allocation2 + $0x308] sm:$0xff] }
 0x37c   : > { %v8190_v29 = vadd.f32 %v8133_v51, %v3316_v23  ;;  %v3648_v47 = vpop.f32.mrf.mxu1 }
 0x37d   : > { %v3318_v59 = vpop.f32.mrf.mxu0  ;;  %4345 = vmatmul.mubr.f32.gmra.mxu0 %v4083_v14 }
 0x37e   : > { %4349 = vmatprep.mubr.f32.mxu0 %v8058_v50  ;;  %v3651_v58 = vpop.f32.mrf.mxu1  ;;  %v4089_v50 = vld [vmem:[#allocation2 + $0x300] sm:$0xff] }
 0x37f   : > { %v3321_v8 = vpop.f32.mrf.mxu0  ;;  %v3652_v49 = vadd.f32 %v3651_v58, %v3427_v27 }
 0x380   : > { %v8197_v57 = vadd.f32 %v8147_v21, %v3321_v8  ;;  %v3653_v51 = vpop.f32.mrf.mxu1  ;;  %v8651_v21 = vld [vmem:[#allocation53_spill] sm:$0xff] }
 0x381   : > { %v3323_v48 = vpop.f32.mrf.mxu0  ;;  %4350 = vmatmul.mubr.f32.gmra.mxu0 %v8066_v4  ;;  %v3437_v41 = vadd.f32 %v8651_v21, %v8650_v61 }
 0x382   : > { %4354 = vmatprep.mubr.f32.mxu0 %v4090_v60  ;;  %v3656_v7 = vpop.f32.mrf.mxu1 }
 0x383   : > { %v3326_v10 = vpop.f32.mrf.mxu0  ;;  %v3657_v2 = vadd.f32 %v3656_v7, %v8036_v11 }
 0x384   : > { %v8201_v30 = vadd.f32 %v8143_v16, %v3326_v10  ;;  %v3658_v42 = vpop.f32.mrf.mxu1 }
 0x385   : > { %v3328_v17 = vpop.f32.mrf.mxu0  ;;  %4355 = vmatmul.mubr.f32.gmra.mxu0 %v4089_v50 }
 0x386   : > { %4359 = vmatprep.mubr.f32.mxu0 %v4093_v19  ;;  %v3661_v4 = vpop.f32.mrf.mxu1 }
 0x387   : > { %v5537_v9 = vpop.f32.mrf.mxu0  ;;  %v3662_v54 = vadd.f32 %v3661_v4, %v3437_v41 }
 0x388   : > { %v8207_v39 = vadd.f32 %v5537_v9, %v8162_v56  ;;  %v3663_v34 = vpop.f32.mrf.mxu1 }
 0x389   : > { %v3846_v16 = vpop.f32.mrf.mxu0  ;;  %4360 = vmatmul.mubr.f32.gmra.mxu0 %v4092_v28 }
 0x38a   : > { %v8210_v11 = vadd.f32 %v3846_v16, %v8154_v55  ;;  %4364 = vmatprep.mubr.f32.mxu0 %v8167_v3  ;;  %v3666_v14 = vpop.f32.mrf.mxu1  ;;  %v8652_v55 = vld [vmem:[#allocation55_spill] sm:$0xff] }
 0x38b   : > { %v5540_v23 = vpop.f32.mrf.mxu0  ;;  %v3667_v59 = vadd.f32 %v3666_v14, %v8055_v1  ;;  %v3447_v37 = vadd.f32 %v8652_v55, %v8064_v6 }
 0x38c   : > { %v8213_v52 = vadd.f32 %v5540_v23, %v3637_v15  ;;  %v3668_v63 = vpop.f32.mrf.mxu1 }
 0x38d   : > { %v3856_v47 = vpop.f32.mrf.mxu0  ;;  %4365 = vmatmul.mubr.f32.gmra.mxu0 %v8167_v3 }
 0x38e   : > { %v8218_v56 = vadd.f32 %v3856_v47, %v8172_v46  ;;  %4369 = vmatprep.mubr.f32.mxu0 %v8167_v3 }
 0x38f   : > { %v5543_v27 = vpop.f32.mrf.mxu0 }
 0x390   : > { %v8223_v8 = vadd.f32 %v5543_v27, %v3647_v35  ;;  %v3671_v15 = vpop.f32.mrf.mxu1  ;;  %v3457_v35 = vadd.f32 %v8062_v26, %v8079_v24  ;;  %v3467_v26 = vadd.f32 %v8075_v44, %v8090_v43 }
 0x391   : > { %4370 = vmatmul.mubr.f32.gmra.mxu0 %v8167_v3  ;;  %v3672_v58 = vadd.f32 %v3671_v15, %v3447_v37  ;;  %v3866_v1 = vpop.f32.mrf.mxu0 }
 0x392   : > { %v8226_v48 = vadd.f32 %v3866_v1, %v3642_v33  ;;  %v3673_v51 = vpop.f32.mrf.mxu1 }
 0x394   : > { %v5546_v60 = vpop.f32.mrf.mxu0 }
 0x395   : > { %v8228_v46 = vadd.f32 %v5546_v60, %v3657_v2  ;;  %v3676_v10 = vpop.f32.mrf.mxu1 }
 0x396   : > { %v3677_v7 = vadd.f32 %v3676_v10, %v8072_v62  ;;  %v3876_v50 = vpop.f32.mrf.mxu0 }
 0x397   : > { %v8231_v17 = vadd.f32 %v3876_v50, %v3652_v49  ;;  %v3678_v6 = vpop.f32.mrf.mxu1 }
 0x399   : > { %v5549_v42 = vpop.f32.mrf.mxu0 }
 0x39a   : > { %v8235_v3 = vadd.f32 %v5549_v42, %v3667_v59  ;;  %v3681_v61 = vpop.f32.mrf.mxu1 }
 0x39b   : > { %v3682_v33 = vadd.f32 %v3681_v61, %v3457_v35  ;;  %v3886_v21 = vpop.f32.mrf.mxu0 }
 0x39c   : > { %v8237_v41 = vadd.f32 %v3886_v21, %v3662_v54  ;;  %v3683_v2 = vpop.f32.mrf.mxu1 }
 0x39e   : > { %v5552_v19 = vpop.f32.mrf.mxu0 }
 0x39f   : > { %v8239_v9 = vadd.f32 %v5552_v19, %v3677_v7  ;;  %v3686_v62 = vpop.f32.mrf.mxu1 }
 0x3a0   : > { %v3687_v49 = vadd.f32 %v3686_v62, %v8085_v31  ;;  %v3896_v4 = vpop.f32.mrf.mxu0 }
 0x3a1   : > { %v8242_v28 = vadd.f32 %v3896_v4, %v3672_v58  ;;  %v3688_v16 = vpop.f32.mrf.mxu1 }
 0x3a3   : > { %v5555_v24 = vpop.f32.mrf.mxu0 }
 0x3a4   : > { %v8246_v34 = vadd.f32 %v5555_v24, %v3687_v49  ;;  %v3691_v23 = vpop.f32.mrf.mxu1 }
 0x3a5   : > { %v3692_v54 = vadd.f32 %v3691_v23, %v3467_v26  ;;  %v3906_v14 = vpop.f32.mrf.mxu0 }
 0x3a6   : > { %v8248_v59 = vadd.f32 %v3906_v14, %v3682_v33  ;;  %v3693_v47 = vpop.f32.mrf.mxu1 }
 0x3a8   : > { %v5558_v63 = vpop.f32.mrf.mxu0 }
 0x3a9   : > { %v3696_v55 = vpop.f32.mrf.mxu1 }
 0x3aa   : > { %v3697_v31 = vadd.f32 %v3696_v55, %v8096_v36  ;;  %v3916_v37 = vpop.f32.mrf.mxu0 }
 0x3ab   : > { %v8251_v27 = vadd.f32 %v3916_v37, %v3692_v54  ;;  %v3698_v15 = vpop.f32.mrf.mxu1 }
 0x3ac   : > { %v8253_v58 = vadd.f32 %v5558_v63, %v3697_v31 }
 0x3ad   : > { %v5561_v44 = vpop.f32.mrf.mxu0 }
 0x3ae   : > { %v3701_v43 = vpop.f32.mrf.mxu1 }
 0x3af   : > { %v3702_v1 = vadd.f32 %v3701_v43, %v8101_v40  ;;  %v3926_v51 = vpop.f32.mrf.mxu0 }
 0x3b0   : > { %v3703_v60 = vpop.f32.mrf.mxu1 }
 0x3b1   : > { %v8256_v10 = vadd.f32 %v3926_v51, %v3702_v1 }
 0x3b2   : > { %v5564_v7 = vpop.f32.mrf.mxu0 }
 0x3b3   : > { %v3706_v50 = vpop.f32.mrf.mxu1 }
 0x3b4   : > { %v3707_v6 = vadd.f32 %v3706_v50, %v8107_v20  ;;  %v3936_v35 = vpop.f32.mrf.mxu0 }
 0x3b5   : > { %v3708_v36 = vpop.f32.mrf.mxu1 }
 0x3b6   : > { %v8259_v42 = vadd.f32 %v5561_v44, %v3707_v6 }
 0x3b7   : > { %v5567_v61 = vpop.f32.mrf.mxu0 }
 0x3b8   : > { %v3711_v33 = vpop.f32.mrf.mxu1 }
 0x3b9   : > { %v3712_v21 = vadd.f32 %v3711_v33, %v8112_v18  ;;  %v3946_v2 = vpop.f32.mrf.mxu0 }
 0x3ba   : > { %v3713_v19 = vpop.f32.mrf.mxu1 }
 0x3bb   : > { %v8262_v62 = vadd.f32 %v3936_v35, %v3712_v21 }
 0x3bc   : > { %v5570_v40 = vpop.f32.mrf.mxu0 }
 0x3bd   : > { %v3716_v49 = vpop.f32.mrf.mxu1 }
 0x3be   : > { %v3717_v4 = vadd.f32 %v3716_v49, %v8120_v13  ;;  %v3956_v16 = vpop.f32.mrf.mxu0 }
 0x3bf   : > { %v3718_v26 = vpop.f32.mrf.mxu1 }
 0x3c0   : > { %v8265_v24 = vadd.f32 %v5564_v7, %v3717_v4 }
 0x3c1   : > { %v5573_v20 = vpop.f32.mrf.mxu0 }
 0x3c2   : > { %v3721_v23 = vpop.f32.mrf.mxu1 }
 0x3c3   : > { %v3722_v54 = vadd.f32 %v3721_v23, %v8126_v38  ;;  %v3966_v14 = vpop.f32.mrf.mxu0 }
 0x3c4   : > { %v3723_v47 = vpop.f32.mrf.mxu1 }
 0x3c5   : > { %v8268_v63 = vadd.f32 %v3946_v2, %v3722_v54 }
 0x3c6   : > { %v5576_v18 = vpop.f32.mrf.mxu0 }
 0x3c7   : > { %v3726_v55 = vpop.f32.mrf.mxu1 }
 0x3c8   : > { %v3727_v31 = vadd.f32 %v3726_v55, %v8131_v0  ;;  %v3976_v37 = vpop.f32.mrf.mxu0 }
 0x3c9   : > { %v3728_v15 = vpop.f32.mrf.mxu1 }
 0x3ca   : > { %v8271_v44 = vadd.f32 %v5567_v61, %v3727_v31 }
 0x3cb   : > { %v5579_v13 = vpop.f32.mrf.mxu0 }
 0x3cc   : > { %v3731_v43 = vpop.f32.mrf.mxu1 }
 0x3cd   : > { %v3732_v1 = vadd.f32 %v3731_v43, %v8137_v22  ;;  %v3986_v51 = vpop.f32.mrf.mxu0 }
 0x3ce   : > { %v3733_v60 = vpop.f32.mrf.mxu1 }
 0x3cf   : > { %v8274_v7 = vadd.f32 %v3956_v16, %v3732_v1 }
 0x3d0   : > { %v5582_v38 = vpop.f32.mrf.mxu0 }
 0x3d1   : > { %v3736_v50 = vpop.f32.mrf.mxu1 }
 0x3d2   : > { %v3737_v6 = vadd.f32 %v3736_v50, %v8145_v12  ;;  %v3996_v35 = vpop.f32.mrf.mxu0 }
 0x3d3   : > { %v3738_v36 = vpop.f32.mrf.mxu1 }
 0x3d4   : > { %v8277_v33 = vadd.f32 %v5570_v40, %v3737_v6 }
 0x3d5   : > { %v4216_v0 = vpop.f32.mrf.mxu0  ;;  %v3741_v21 = vpop.f32.mrf.mxu1 }
 0x3d6   : > { %v3742_v61 = vadd.f32 %v3741_v21, %v8152_v53 }
 0x3d7   : > { %v4218_v2 = vpop.f32.mrf.mxu0  ;;  %v3743_v19 = vpop.f32.mrf.mxu1 }
 0x3d8   : > { %v8280_v49 = vadd.f32 %v3966_v14, %v3742_v61 }
 0x3d9   : > { %v4221_v22 = vpop.f32.mrf.mxu0  ;;  %v3746_v4 = vpop.f32.mrf.mxu1 }
 0x3da   : > { %v3747_v16 = vadd.f32 %v3746_v4, %v8159_v45 }
 0x3db   : > { %v4223_v26 = vpop.f32.mrf.mxu0  ;;  %v3748_v23 = vpop.f32.mrf.mxu1 }
 0x3dc   : > { %v8283_v54 = vadd.f32 %v5573_v20, %v3747_v16 }
 0x3dd   : > { %v4226_v12 = vpop.f32.mrf.mxu0  ;;  %v3751_v47 = vpop.f32.mrf.mxu1 }
 0x3de   : > { %v3752_v40 = vadd.f32 %v3751_v47, %v8170_v25 }
 0x3df   : > { %v4228_v55 = vpop.f32.mrf.mxu0  ;;  %v3753_v31 = vpop.f32.mrf.mxu1 }
 0x3e0   : > { %v8286_v15 = vadd.f32 %v3976_v37, %v3752_v40 }
 0x3e1   : > { %v4231_v53 = vpop.f32.mrf.mxu0  ;;  %v3756_v43 = vpop.f32.mrf.mxu1 }
 0x3e2   : > { %v3757_v14 = vadd.f32 %v3756_v43, %v8178_v5 }
 0x3e3   : > { %v4233_v1 = vpop.f32.mrf.mxu0  ;;  %v3758_v60 = vpop.f32.mrf.mxu1 }
 0x3e4   : > { %v8289_v50 = vadd.f32 %v5576_v18, %v3757_v14 }
 0x3e5   : > { %v4236_v45 = vpop.f32.mrf.mxu0  ;;  %v3761_v6 = vpop.f32.mrf.mxu1 }
 0x3e6   : > { %v3762_v20 = vadd.f32 %v3761_v6, %v8185_v32 }
 0x3e7   : > { %v4238_v36 = vpop.f32.mrf.mxu0  ;;  %v3763_v21 = vpop.f32.mrf.mxu1 }
 0x3e8   : > { %v8292_v61 = vadd.f32 %v3986_v51, %v3762_v20 }
 0x3e9   : > { %v4241_v25 = vpop.f32.mrf.mxu0  ;;  %v3766_v2 = vpop.f32.mrf.mxu1 }
 0x3ea   : > { %v3767_v37 = vadd.f32 %v3766_v2, %v8190_v29 }
 0x3eb   : > { %v4243_v19 = vpop.f32.mrf.mxu0  ;;  %v3768_v4 = vpop.f32.mrf.mxu1 }
 0x3ec   : > { %v8295_v16 = vadd.f32 %v5579_v13, %v3767_v37  ;;  %v5774_v19 = vld [vmem:[%s6107_s13 + $0x8] sm:$0xff] }
 0x3ed   : > { %v8297_v5 = vpop.f32.mrf.mxu0  ;;  %v3771_v18 = vpop.f32.mrf.mxu1 }
 0x3ee   : > { %v3772_v26 = vadd.f32 %v3771_v18, %v8197_v57  ;;  %v8310_v57 = vld [vmem:[%s8503_s4] ss:$0 sm:$0xff] }
 0x3ef   : > { %v4248_v23 = vpop.f32.mrf.mxu0  ;;  %v3773_v47 = vpop.f32.mrf.mxu1 }
 0x3f0   : > { %v8300_v32 = vadd.f32 %v3996_v35, %v3772_v26 }
 0x3f1   : > { %v4251_v40 = vpop.f32.mrf.mxu0  ;;  %v3776_v51 = vpop.f32.mrf.mxu1 }
 0x3f2   : > { %v3777_v55 = vadd.f32 %v3776_v51, %v8201_v30  ;;  %v5775_v51 = vld [vmem:[%s6107_s13] sm:$0xff]  ;;  %s5860_s13 = sshll.u32 %s5932_s22, 4  ;;  %s5861_s13 = int_to_ptr.vmem [resolvable:$false] %s5860_s13 }
 0x3f3   : > { %v4253_v31 = vpop.f32.mrf.mxu0  ;;  %v3778_v43 = vpop.f32.mrf.mxu1  ;;  %s5862_s24 = scalar_lea.vmem %s5861_s13, 8192  ;;  %p5863_p13 = scmp.lt.s32.totalorder %s8455_s28, %s5861_s13 }
 0x3f4   : > { %v8303_v29 = vadd.f32 %v5582_v38, %v3777_v55  ;;  %p5864_p0 = scmp.lt.s32.totalorder %s5862_s24, %s5856_s29 }
 0x3f5   : > { %v8305_v13 = vpop.f32.mrf.mxu0  ;;  %v5617_v14 = vpop.f32.mrf.mxu1 }
 0x3f6   : > { %v4447_v1 = vadd.f32 %v5617_v14, %v4221_v22  ;;  %p5865_p10 = por %p5864_p0, %p5863_p13 }
 0x3f7   : > { %v4258_v35 = vpop.f32.mrf.mxu0  ;;  %v4441_v60 = vpop.f32.mrf.mxu1 }
 0x3f8   : > { %v4601_v6 = vadd.f32 %v4447_v1, %v8207_v39  ;;  %v4442_v20 = vadd.f32 %v4441_v60, %v4216_v0  ;;  %p5866_p3 = pnand %p5865_p10, %p5859_p12 }
 0x3f9   : > { %v4261_v30 = vpop.f32.mrf.mxu0  ;;  %v5620_v36 = vpop.f32.mrf.mxu1 }
 0x3fa   : > { %v4640_v38 = vadd.f32 %v8310_v57, %v4601_v6  ;;  %v4600_v21 = vadd.f32 %v4442_v20, %v8210_v11  ;;  %v4457_v2 = vadd.f32 %v5620_v36, %v4231_v53  ;;  %v8654_v36 = vld [vmem:[#allocation19_spill] sm:$0xff] }
 0x3fb   : > { %v4263_v37 = vpop.f32.mrf.mxu0  ;;  %v4451_v22 = vpop.f32.mrf.mxu1 }
 0x3fc   : > { %v4672_v4 = vadd.f32 %v5774_v19, %v4640_v38  ;;  %v4639_v18 = vadd.f32 %v8310_v57, %v4600_v21  ;;  %v4603_v26 = vadd.f32 %v4457_v2, %v8213_v52  ;;  %v4452_v23 = vadd.f32 %v4451_v22, %v4226_v12  ;;  %v8653_v12 = vld [vmem:[#allocation20_spill] sm:$0xff] }
 0x3fd   : > { %v8318_v39 = vpop.f32.mrf.mxu0  ;;  %v5623_v0 = vpop.f32.mrf.mxu1 }
 0x3fe   : > { %v4704_v47 = vmax.f32 %v4672_v4, 0.0  ;;  %v4671_v55 = vadd.f32 %v5775_v51, %v4639_v18  ;;  %v4642_v31 = vadd.f32 %v8310_v57, %v4603_v26  ;;  %v4602_v11 = vadd.f32 %v4452_v23, %v8218_v56  ;;  %v8655_v26 = vld [vmem:[#allocation22_spill] sm:$0xff] }
 0x3ff   : > { %v4467_v53 = vadd.f32 %v5623_v0, %v4241_v25  ;;  %v4268_v43 = vpop.f32.mrf.mxu0  ;;  %v4461_v14 = vpop.f32.mrf.mxu1 }
 0x400   : > { %4736 = vst [vmem:[%s8325_s6 + $0x8] sm:$0xff] %v4704_v47  ;;  %v4703_v52 = vmax.f32 %v4671_v55, 0.0  ;;  %v4674_v1 = vadd.f32 %v8653_v12, %v4642_v31  ;;  %v4641_v35 = vadd.f32 %v8310_v57, %v4602_v11  ;;  %v4462_v60 = vadd.f32 %v4461_v14, %v4236_v45  ;;  %v8657_v14 = vld [vmem:[#allocation24_spill] sm:$0xff] }
 0x401   : > { %v4605_v6 = vadd.f32 %v4467_v53, %v8223_v8  ;;  %v4271_v20 = vpop.f32.mrf.mxu0  ;;  %v5626_v56 = vpop.f32.mrf.mxu1 }
 0x402   : > { %4735 = vst [vmem:[%s8325_s6] sm:$0xff] %v4703_v52  ;;  %v4706_v25 = vmax.f32 %v4674_v1, 0.0  ;;  %v4673_v38 = vadd.f32 %v8654_v36, %v4641_v35  ;;  %v4604_v21 = vadd.f32 %v4462_v60, %v8226_v48  ;;  %v4477_v2 = vadd.f32 %v5626_v56, %v4251_v40  ;;  %v8656_v48 = vld [vmem:[#allocation21_spill] sm:$0xff] }
 0x403   : > { %v4644_v37 = vadd.f32 %v8310_v57, %v4605_v6  ;;  %v4273_v22 = vpop.f32.mrf.mxu0  ;;  %v4471_v19 = vpop.f32.mrf.mxu1 }
 0x404   : > { %4738 = vst [vmem:[%s8325_s6 + $0x18] sm:$0xff] %v4706_v25  ;;  %v4705_v4 = vmax.f32 %v4673_v38, 0.0  ;;  %v4643_v45 = vadd.f32 %v8310_v57, %v4604_v21  ;;  %v4607_v8 = vadd.f32 %v4477_v2, %v8228_v46  ;;  %v4472_v18 = vadd.f32 %v4471_v19, %v8297_v5  ;;  %v8659_v2 = vld [vmem:[#allocation26_spill] sm:$0xff] }
 0x405   : > { %v4676_v23 = vadd.f32 %v8655_v26, %v4644_v37  ;;  %v4276_v0 = vpop.f32.mrf.mxu0  ;;  %v5629_v47 = vpop.f32.mrf.mxu1  ;;  %v8660_v26 = vld [vmem:[#allocation25_spill] sm:$0xff] }
 0x406   : > { %4737 = vst [vmem:[%s8325_s6 + $0x10] sm:$0xff] %v4705_v4  ;;  %v4675_v40 = vadd.f32 %v8656_v48, %v4643_v45  ;;  %v4646_v51 = vadd.f32 %v8310_v57, %v4607_v8  ;;  %v4606_v55 = vadd.f32 %v4472_v18, %v8231_v17  ;;  %v4487_v31 = vadd.f32 %v5629_v47, %v4261_v30  ;;  %v8658_v30 = vld [vmem:[#allocation23_spill] sm:$0xff] }
 0x407   : > { %v4708_v11 = vmax.f32 %v4676_v23, 0.0  ;;  %v4278_v53 = vpop.f32.mrf.mxu0  ;;  %v4481_v43 = vpop.f32.mrf.mxu1 }
 0x408   : > { %v4707_v46 = vmax.f32 %v4675_v40, 0.0  ;;  %v4678_v5 = vadd.f32 %v8657_v14, %v4646_v51  ;;  %v4645_v52 = vadd.f32 %v8310_v57, %v4606_v55  ;;  %v4609_v12 = vadd.f32 %v4487_v31, %v8235_v3 }
 0x409   : > { %4740 = vst [vmem:[%s8325_s6 + $0x28] sm:$0xff] %v4708_v11  ;;  %v4482_v1 = vadd.f32 %v4481_v43, %v8305_v13  ;;  %v4281_v35 = vpop.f32.mrf.mxu0  ;;  %v5632_v60 = vpop.f32.mrf.mxu1 }
 0x40a   : > { %4739 = vst [vmem:[%s8325_s6 + $0x20] sm:$0xff] %v4707_v46  ;;  %v4710_v17 = vmax.f32 %v4678_v5, 0.0  ;;  %v4677_v6 = vadd.f32 %v8658_v30, %v4645_v52  ;;  %v4648_v56 = vadd.f32 %v8310_v57, %v4609_v12  ;;  %v4497_v25 = vadd.f32 %v5632_v60, %v4271_v20 }
 0x40b   : > { %v4608_v36 = vadd.f32 %v4482_v1, %v8237_v41  ;;  %v4283_v38 = vpop.f32.mrf.mxu0  ;;  %v4491_v21 = vpop.f32.mrf.mxu1 }
 0x40c   : > { %4742 = vst [vmem:[%s8325_s6 + $0x38] sm:$0xff] %v4710_v17  ;;  %v4709_v3 = vmax.f32 %v4677_v6, 0.0  ;;  %v4680_v37 = vadd.f32 %v8659_v2, %v4648_v56  ;;  %v4611_v13 = vadd.f32 %v4497_v25, %v8239_v9  ;;  %v4492_v22 = vadd.f32 %v4491_v21, %v8318_v39  ;;  %v8661_v9 = vld [vmem:[#allocation28_spill] sm:$0xff] }
 0x40d   : > { %v4647_v19 = vadd.f32 %v8310_v57, %v4608_v36  ;;  %v4286_v4 = vpop.f32.mrf.mxu0  ;;  %v5635_v45 = vpop.f32.mrf.mxu1 }
 0x40e   : > { %4741 = vst [vmem:[%s8325_s6 + $0x30] sm:$0xff] %v4709_v3  ;;  %v4712_v8 = vmax.f32 %v4680_v37, 0.0  ;;  %v4650_v20 = vadd.f32 %v8310_v57, %v4611_v13  ;;  %v4610_v41 = vadd.f32 %v4492_v22, %v8242_v28  ;;  %v4507_v18 = vadd.f32 %v5635_v45, %v4281_v35  ;;  %v8662_v28 = vld [vmem:[#allocation27_spill] sm:$0xff] }
 0x40f   : > { %v4679_v23 = vadd.f32 %v8660_v26, %v4647_v19  ;;  %v4288_v47 = vpop.f32.mrf.mxu0  ;;  %v4501_v48 = vpop.f32.mrf.mxu1 }
 0x410   : > { %4744 = vst [vmem:[%s8325_s6 + $0x48] sm:$0xff] %v4712_v8  ;;  %v4682_v39 = vadd.f32 %v8661_v9, %v4650_v20  ;;  %v4649_v40 = vadd.f32 %v8310_v57, %v4610_v41  ;;  %v4613_v51 = vadd.f32 %v4507_v18, %v8246_v34  ;;  %v4502_v55 = vadd.f32 %v4501_v48, %v4276_v0  ;;  %v8663_v34 = vld [vmem:[#allocation13_spill] sm:$0xff]  ;;  %v8666_v8 = vld [vmem:[#allocation16_spill] sm:$0xff] }
 0x411   : > { %v4711_v31 = vmax.f32 %v4679_v23, 0.0  ;;  %v4291_v11 = vpop.f32.mrf.mxu0  ;;  %v5638_v53 = vpop.f32.mrf.mxu1 }
 0x412   : > { %v4714_v43 = vmax.f32 %v4682_v39, 0.0  ;;  %v4681_v46 = vadd.f32 %v8662_v28, %v4649_v40  ;;  %v4652_v14 = vadd.f32 %v8310_v57, %v4613_v51  ;;  %v4612_v5 = vadd.f32 %v4502_v55, %v8248_v59  ;;  %v8664_v59 = vld [vmem:[#allocation29_spill] sm:$0xff]  ;;  %v8667_v40 = vld [vmem:[#allocation15_spill] sm:$0xff] }
 0x413   : > { %4743 = vst [vmem:[%s8325_s6 + $0x40] sm:$0xff] %v4711_v31  ;;  %v4517_v52 = vadd.f32 %v5638_v53, %v4291_v11  ;;  %v4293_v12 = vpop.f32.mrf.mxu0  ;;  %v4511_v1 = vpop.f32.mrf.mxu1  ;;  %v8668_v53 = vld [vmem:[#allocation30_spill] sm:$0xff] }
 0x414   : > { %4746 = vst [vmem:[%s8325_s6 + $0x58] sm:$0xff] %v4714_v43  ;;  %v4713_v35 = vmax.f32 %v4681_v46, 0.0  ;;  %v4684_v0 = vadd.f32 %v8663_v34, %v4652_v14  ;;  %v4651_v60 = vadd.f32 %v8310_v57, %v4612_v5  ;;  %v4512_v17 = vadd.f32 %v4511_v1, %v4286_v4  ;;  %v8669_v1 = vld [vmem:[#allocation31_spill] sm:$0xff] }
 0x415   : > { %v4615_v30 = vadd.f32 %v4517_v52, %v8253_v58  ;;  %v4296_v6 = vpop.f32.mrf.mxu0  ;;  %v5641_v56 = vpop.f32.mrf.mxu1  ;;  %v8665_v58 = vld [vmem:[#allocation14_spill] sm:$0xff] }
 0x416   : > { %4745 = vst [vmem:[%s8325_s6 + $0x50] sm:$0xff] %v4713_v35  ;;  %v4716_v25 = vmax.f32 %v4684_v0, 0.0  ;;  %v4683_v36 = vadd.f32 %v8664_v59, %v4651_v60  ;;  %v4614_v38 = vadd.f32 %v4512_v17, %v8251_v27 }
 0x417   : > { %v4654_v21 = vadd.f32 %v8310_v57, %v4615_v30  ;;  %v4298_v3 = vpop.f32.mrf.mxu0  ;;  %v4521_v2 = vpop.f32.mrf.mxu1 }
 0x418   : > { %4748 = vst [vmem:[%s8325_s6 + $0x68] sm:$0xff] %v4716_v25  ;;  %v4715_v37 = vmax.f32 %v4683_v36, 0.0  ;;  %v4653_v13 = vadd.f32 %v8310_v57, %v4614_v38  ;;  %v4522_v22 = vadd.f32 %v4521_v2, %v4296_v6 }
 0x419   : > { %v4686_v19 = vadd.f32 %v8665_v58, %v4654_v21  ;;  %v4301_v4 = vpop.f32.mrf.mxu0  ;;  %v5644_v45 = vpop.f32.mrf.mxu1 }
 0x41a   : > { %4747 = vst [vmem:[%s8325_s6 + $0x60] sm:$0xff] %v4715_v37  ;;  %v4685_v20 = vadd.f32 %v8666_v8, %v4653_v13  ;;  %v4616_v27 = vadd.f32 %v4522_v22, %v8256_v10  ;;  %v4527_v41 = vadd.f32 %v5641_v56, %v4301_v4  ;;  %v8670_v56 = vld [vmem:[#allocation32_spill] sm:$0xff]  ;;  %v8671_v37 = vld [vmem:[#allocation33_spill] sm:$0xff] }
 0x41b   : > { %v4718_v18 = vmax.f32 %v4686_v19, 0.0  ;;  %v4303_v26 = vpop.f32.mrf.mxu0  ;;  %v4531_v9 = vpop.f32.mrf.mxu1 }
 0x41c   : > { %v4717_v23 = vmax.f32 %v4685_v20, 0.0  ;;  %v4655_v47 = vadd.f32 %v8310_v57, %v4616_v27  ;;  %v4617_v48 = vadd.f32 %v4527_v41, %v8259_v42  ;;  %v8672_v20 = vld [vmem:[#allocation34_spill] sm:$0xff] }
 0x41d   : > { %4750 = vst [vmem:[%s8325_s6 + $0x78] sm:$0xff] %v4718_v18  ;;  %v4306_v39 = vpop.f32.mrf.mxu0  ;;  %v5647_v46 = vpop.f32.mrf.mxu1 }
 0x41e   : > { %4749 = vst [vmem:[%s8325_s6 + $0x70] sm:$0xff] %v4717_v23  ;;  %v4687_v51 = vadd.f32 %v8667_v40, %v4655_v47  ;;  %v4656_v55 = vadd.f32 %v8310_v57, %v4617_v48  ;;  %v4532_v31 = vadd.f32 %v4531_v9, %v4306_v39  ;;  %v8673_v9 = vld [vmem:[#allocation35_spill] sm:$0xff] }
 0x41f   : > { %v4308_v10 = vpop.f32.mrf.mxu0  ;;  %v4541_v0 = vpop.f32.mrf.mxu1 }
 0x420   : > { %v4719_v11 = vmax.f32 %v4687_v51, 0.0  ;;  %v4688_v43 = vadd.f32 %v8668_v53, %v4656_v55  ;;  %v4618_v28 = vadd.f32 %v4532_v31, %v8262_v62  ;;  %v8674_v53 = vld [vmem:[#allocation36_spill] sm:$0xff] }
 0x421   : > { %v4311_v14 = vpop.f32.mrf.mxu0  ;;  %v5650_v36 = vpop.f32.mrf.mxu1 }
 0x422   : > { %4751 = vst [vmem:[%s8325_s6 + $0x80] sm:$0xff] %v4719_v11  ;;  %v4720_v42 = vmax.f32 %v4688_v43, 0.0  ;;  %v4657_v5 = vadd.f32 %v8310_v57, %v4618_v28  ;;  %v4537_v52 = vadd.f32 %v5644_v45, %v4311_v14 }
 0x423   : > { %v4313_v12 = vpop.f32.mrf.mxu0  ;;  %v4551_v58 = vpop.f32.mrf.mxu1 }
 0x424   : > { %4752 = vst [vmem:[%s8325_s6 + $0x88] sm:$0xff] %v4720_v42  ;;  %v4689_v35 = vadd.f32 %v8669_v1, %v4657_v5  ;;  %v4619_v34 = vadd.f32 %v4537_v52, %v8265_v24  ;;  %v8675_v12 = vld [vmem:[#allocation37_spill] sm:$0xff] }
 0x425   : > { %v4316_v60 = vpop.f32.mrf.mxu0  ;;  %v5653_v18 = vpop.f32.mrf.mxu1 }
 0x426   : > { %v4721_v17 = vmax.f32 %v4689_v35, 0.0  ;;  %v4658_v62 = vadd.f32 %v8310_v57, %v4619_v34  ;;  %v4542_v30 = vadd.f32 %v4541_v0, %v4316_v60 }
 0x427   : > { %v4318_v6 = vpop.f32.mrf.mxu0  ;;  %v4561_v51 = vpop.f32.mrf.mxu1 }
 0x428   : > { %4753 = vst [vmem:[%s8325_s6 + $0x90] sm:$0xff] %v4721_v17  ;;  %v4690_v25 = vadd.f32 %v8670_v56, %v4658_v62  ;;  %v4620_v59 = vadd.f32 %v4542_v30, %v8268_v63  ;;  %v8676_v30 = vld [vmem:[#allocation38_spill] sm:$0xff] }
 0x429   : > { %v4321_v38 = vpop.f32.mrf.mxu0 }
 0x42a   : > { %v4722_v21 = vmax.f32 %v4690_v25, 0.0  ;;  %v4659_v3 = vadd.f32 %v8310_v57, %v4620_v59  ;;  %v4547_v24 = vadd.f32 %v5647_v46, %v4321_v38  ;;  %v5656_v46 = vpop.f32.mrf.mxu1 }
 0x42b   : > { %v4323_v2 = vpop.f32.mrf.mxu0 }
 0x42c   : > { %4754 = vst [vmem:[%s8325_s6 + $0x98] sm:$0xff] %v4722_v21  ;;  %v4691_v13 = vadd.f32 %v8671_v37, %v4659_v3  ;;  %v4621_v22 = vadd.f32 %v4547_v24, %v8271_v44  ;;  %v4571_v34 = vpop.f32.mrf.mxu1  ;;  %v8677_v3 = vld [vmem:[#allocation39_spill] sm:$0xff] }
 0x42d   : > { %v4326_v19 = vpop.f32.mrf.mxu0 }
 0x42e   : > { %v4723_v4 = vmax.f32 %v4691_v13, 0.0  ;;  %v4660_v45 = vadd.f32 %v8310_v57, %v4621_v22  ;;  %v4552_v63 = vadd.f32 %v4551_v58, %v4326_v19  ;;  %v5659_v25 = vpop.f32.mrf.mxu1 }
 0x42f   : > { %v4328_v8 = vpop.f32.mrf.mxu0 }
 0x430   : > { %4755 = vst [vmem:[%s8325_s6 + $0xa0] sm:$0xff] %v4723_v4  ;;  %v4692_v27 = vadd.f32 %v8672_v20, %v4660_v45  ;;  %v4622_v41 = vadd.f32 %v4552_v63, %v8274_v7  ;;  %v4581_v37 = vpop.f32.mrf.mxu1  ;;  %v8678_v45 = vld [vmem:[#allocation40_spill] sm:$0xff] }
 0x431   : > { %v4331_v26 = vpop.f32.mrf.mxu0 }
 0x432   : > { %v4724_v23 = vmax.f32 %v4692_v27, 0.0  ;;  %v4661_v47 = vadd.f32 %v8310_v57, %v4622_v41  ;;  %v4557_v44 = vadd.f32 %v5650_v36, %v4331_v26  ;;  %v5662_v4 = vpop.f32.mrf.mxu1 }
 0x433   : > { %v4333_v48 = vpop.f32.mrf.mxu0 }
 0x434   : > { %4756 = vst [vmem:[%s8325_s6 + $0xa8] sm:$0xff] %v4724_v23  ;;  %v4693_v39 = vadd.f32 %v8673_v9, %v4661_v47  ;;  %v4623_v40 = vadd.f32 %v4557_v44, %v8277_v33  ;;  %v4591_v26 = vpop.f32.mrf.mxu1  ;;  %v8679_v23 = vld [vmem:[#allocation41_spill] sm:$0xff] }
 0x435   : > { %v4336_v55 = vpop.f32.mrf.mxu0 }
 0x436   : > { %v4725_v31 = vmax.f32 %v4693_v39, 0.0  ;;  %v4662_v10 = vadd.f32 %v8310_v57, %v4623_v40  ;;  %v4562_v7 = vadd.f32 %v4561_v51, %v4336_v55  ;;  %v8680_v51 = vld [vmem:[#allocation42_spill] sm:$0xff] }
 0x437   : > { %v4338_v11 = vpop.f32.mrf.mxu0 }
 0x438   : > { %4757 = vst [vmem:[%s8325_s6 + $0xb0] sm:$0xff] %v4725_v31  ;;  %v4694_v43 = vadd.f32 %v8674_v53, %v4662_v10  ;;  %v4624_v28 = vadd.f32 %v4562_v7, %v8280_v49 }
 0x439   : > { %v4341_v14 = vpop.f32.mrf.mxu0 }
 0x43a   : > { %v4726_v42 = vmax.f32 %v4694_v43, 0.0  ;;  %v4663_v5 = vadd.f32 %v8310_v57, %v4624_v28  ;;  %v4567_v33 = vadd.f32 %v5653_v18, %v4341_v14  ;;  %v8681_v43 = vld [vmem:[#allocation17_spill] sm:$0xff] }
 0x43b   : > { %v4343_v52 = vpop.f32.mrf.mxu0 }
 0x43c   : > { %4758 = vst [vmem:[%s8325_s6 + $0xb8] sm:$0xff] %v4726_v42  ;;  %v4695_v1 = vadd.f32 %v8675_v12, %v4663_v5  ;;  %v4625_v35 = vadd.f32 %v4567_v33, %v8283_v54 }
 0x43d   : > { %v4346_v0 = vpop.f32.mrf.mxu0 }
 0x43e   : > { %v4727_v60 = vmax.f32 %v4695_v1, 0.0  ;;  %v4664_v17 = vadd.f32 %v8310_v57, %v4625_v35  ;;  %v4572_v49 = vadd.f32 %v4571_v34, %v4346_v0 }
 0x43f   : > { %v4348_v62 = vpop.f32.mrf.mxu0 }
 0x440   : > { %4759 = vst [vmem:[%s8325_s6 + $0xc0] sm:$0xff] %v4727_v60  ;;  %v4696_v6 = vadd.f32 %v8676_v30, %v4664_v17  ;;  %v4626_v56 = vadd.f32 %v4572_v49, %v8286_v15 }
 0x441   : > { %v4351_v59 = vpop.f32.mrf.mxu0 }
 0x442   : > { %v4728_v36 = vmax.f32 %v4696_v6, 0.0  ;;  %v4665_v38 = vadd.f32 %v8310_v57, %v4626_v56  ;;  %v4577_v54 = vadd.f32 %v5656_v46, %v4351_v59 }
 0x443   : > { %v4353_v21 = vpop.f32.mrf.mxu0 }
 0x444   : > { %4760 = vst [vmem:[%s8325_s6 + $0xc8] sm:$0xff] %v4728_v36  ;;  %v4697_v24 = vadd.f32 %v8677_v3, %v4665_v38  ;;  %v4627_v2 = vadd.f32 %v4577_v54, %v8289_v50 }
 0x445   : > { %v4356_v13 = vpop.f32.mrf.mxu0 }
 0x446   : > { %v4729_v22 = vmax.f32 %v4697_v24, 0.0  ;;  %v4666_v58 = vadd.f32 %v8310_v57, %v4627_v2  ;;  %v4582_v15 = vadd.f32 %v4581_v37, %v4356_v13 }
 0x447   : > { %v4358_v19 = vpop.f32.mrf.mxu0 }
 0x448   : > { %4761 = vst [vmem:[%s8325_s6 + $0xd0] sm:$0xff] %v4729_v22  ;;  %v4698_v63 = vadd.f32 %v8678_v45, %v4666_v58  ;;  %v4628_v8 = vadd.f32 %v4582_v15, %v8292_v61 }
 0x449   : > { %v4361_v20 = vpop.f32.mrf.mxu0 }
 0x44a   : > { %v4730_v27 = vmax.f32 %v4698_v63, 0.0  ;;  %v4667_v41 = vadd.f32 %v8310_v57, %v4628_v8  ;;  %v4587_v50 = vadd.f32 %v5659_v25, %v4361_v20 }
 0x44b   : > { %v4363_v18 = vpop.f32.mrf.mxu0 }
 0x44c   : > { %4762 = vst [vmem:[%s8325_s6 + $0xd8] sm:$0xff] %v4730_v27  ;;  %v4699_v47 = vadd.f32 %v8679_v23, %v4667_v41  ;;  %v4629_v44 = vadd.f32 %v4587_v50, %v8295_v16 }
 0x44d   : > { %v4366_v48 = vpop.f32.mrf.mxu0 }
 0x44e   : > { %v4731_v9 = vmax.f32 %v4699_v47, 0.0  ;;  %v4668_v39 = vadd.f32 %v8310_v57, %v4629_v44  ;;  %v4592_v40 = vadd.f32 %v4591_v26, %v4366_v48 }
 0x44f   : > { %v4368_v61 = vpop.f32.mrf.mxu0 }
 0x450   : > { %4763 = vst [vmem:[%s8325_s6 + $0xe0] sm:$0xff] %v4731_v9  ;;  %v4700_v55 = vadd.f32 %v8680_v51, %v4668_v39  ;;  %v4630_v31 = vadd.f32 %v4592_v40, %v8300_v32  ;;  %v8682_v32 = vld [vmem:[#allocation18_spill] sm:$0xff] }
 0x451   : > { %v4371_v10 = vpop.f32.mrf.mxu0 }
 0x452   : > { %v4732_v7 = vmax.f32 %v4700_v55, 0.0  ;;  %v4669_v11 = vadd.f32 %v8310_v57, %v4630_v31  ;;  %v4597_v16 = vadd.f32 %v5662_v4, %v4371_v10 }
 0x453   : > { %v4373_v53 = vpop.f32.mrf.mxu0 }
 0x454   : > { %4764 = vst [vmem:[%s8325_s6 + $0xe8] sm:$0xff] %v4732_v7  ;;  %v4701_v28 = vadd.f32 %v4669_v11, %v8681_v43  ;;  %v4631_v46 = vadd.f32 %v4597_v16, %v8303_v29 }
 0x456   : > { %v4733_v14 = vmax.f32 %v4701_v28, 0.0  ;;  %v4670_v42 = vadd.f32 %v8310_v57, %v4631_v46 }
 0x458   : > { %4765 = vst [vmem:[%s8325_s6 + $0xf0] sm:$0xff] %v4733_v14  ;;  %v4702_v5 = vadd.f32 %v4670_v42, %v8682_v32 }
 0x45a   : > { %v4734_v33 = vmax.f32 %v4702_v5, 0.0 }
 0x45c   : > { %4766 = vst [vmem:[%s8325_s6 + $0xf8] sm:$0xff] %v4734_v33 }
 0x45d   : > { %5869 = shalt.err (!%p5866_p3)
}
 0x45e   : > { %s5870_s26 = scalar_lea.hbm %s8453_s16, 4096  ;;  %s5874_s12 = scalar_lea.hbm %s8504_s5, 8192 }
 0x45f   : > { %p5871_p11 = scmp.ne.s32.totalorder %s8453_s16, %s5870_s26  ;;  %p5875_p4 = scmp.lt.s32.totalorder %s8453_s16, %s8504_s5 }
 0x460   : > { %p5876_p6 = scmp.lt.s32.totalorder %s5874_s12, %s5870_s26 }
 0x461   : > { %p5872_p9 = pnand %p5871_p11, %p8683_p2 }
 0x462   : > { %p5877_p8 = por %p5876_p6, %p5875_p4 }
 0x463   : > { %p5873_p1 = pneg %p5872_p9 }
 0x465   : > { %p5878_p5 = pnand %p5877_p8, %p5873_p1 }
 0x467   : > { %5881 = shalt.err (!%p5878_p5)
}
 0x468   : > { %s5933_s7 = smov 128   ;;  %s5934_s11 = smov 8  }
 0x469   : > { %5673 = dma.vmem_to_hbm [thread:$0]  (%p8683_p2), %s8455_s28, 4096, %s8453_s16, %s4768_s8, %s5933_s7, %s5933_s7, %s5934_s11  }
 0x46a PF: > { %s4796_s17 = sand.u32 1, %s5912_s18   ;;  %p8684_p7 = scmp.ne.s32.totalorder %s8554_s25, 0 }
 0x46b   : > { %p8685_p12 = scmp.ge.s32.totalorder %s5924_s21, 2  ;;  %s4797_s29 = scalar_lea.sflag [#allocation5], %s4796_s17 }
 0x46d   : > { %p5687_p13 = pnand %p8685_p12, %p8684_p7 }
 0x46f   : > { %p5688_p0 = pneg %p5687_p13 }
 0x471   : > { %5907 = dma.done.wait (%p5688_p0), %s4797_s29, 4096  }
 0x472   : > { %5909 = vsyncadd (%p5688_p0), %s4797_s29, 4294963200  ;;  %p19_p10 = scmp.ge.s32.totalorder %s6043_s15, 4   ;;  %s8686_s18 = smov %s5916_s19 }
 0x473   : > { %s8687_s19 = smov %s5920_s20  ;;  %s8688_s20 = smov %s6059_s27 }
 0x474   : > { %s8689_s21 = smov %s6043_s15  ;;  %21 = sbr.rel (!%p19_p10) target bundleno = 6 (0x6), region = 100 }
 0x479   :  { %4802 = vsyncpa [#allocation4], 1 }
 0x47a   :  { %4804 = vsyncpa [#allocation4 + $0x1], 1 }
 0x47b   :  { %4805 = vsyncpa [#allocation7], 1 }
 0x47c   :  { %4806 = vsyncpa [#allocation5], 1 }
 0x47d   :  { %4808 = vsyncpa [#allocation5 + $0x1], 1 }

</bundles_post_ra>
